<compile_context>
chip_gen: v5e
topology: v5e:2x2
jax: 0.10.0
libtpu: 0.0.40
codegen_flags: <defaults>
</compile_context>

<pallas_src>
import math
import numpy as np
import jax
import jax.numpy as jnp
from jax.experimental import pallas as pl
from jax.experimental.pallas import tpu as pltpu

D_MODEL = 256            # d_model (gen_sineembed hardcodes 128 dims/coord -> 512 total)
SINE_DIM = 2 * D_MODEL   # query_dim == 4  ->  sine embed width 512
EPS_LN = 1e-5

# Host-side constants for gen_sineembed_for_position; passed to the kernel as
# (1, 128) inputs (NOT captured) so Pallas tracing accepts them.
_LANE = np.arange(128)
_INV_DIM_T = 1.0 / (10000.0 ** (2.0 * (_LANE // 2).astype(np.float64) / 128.0))
_SCALE_INV_DIM_T = (2.0 * math.pi * _INV_DIM_T).astype(np.float32).reshape(1, 128)
_ODD_PHASE = ((_LANE % 2).astype(np.float32) * (math.pi / 2.0)).reshape(1, 128)


# ------------------------------------------------------------------ kernel ---
def _fused_decoder_kernel(scale_ref, phase_ref, ref_ref, tgt_ref,
                          w1_ref, b1_ref, w2_ref, b2_ref,
                          wl_ref, bl_ref, gamma_ref, beta_ref,
                          normed_ref, out_acc, qpos_acc):
    """Grid = (row_tiles, num_layers). One invocation = one (row tile, layer).

    scale/phase : (1, 128) sine-embed constants (2*pi/dim_t, odd-lane +pi/2).
    ref_ref     : (TM, 4)   sigmoid'ed + valid-ratio-scaled reference points.
    tgt_ref     : (TM, 256) initial decoder queries (read at layer 0 only).
    w1/b1,w2/b2 : ref_point_head MLP(512 -> 256 -> 256).
    wl/bl       : FULL stacked per-layer weights (L,256,256)/(L,1,256), VMEM-resident.
    gamma/beta  : LayerNorm (self.norm) parameters.
    normed_ref  : (1, TM, 256) block of the stacked (L, N, 256) output.
    out_acc     : VMEM scratch - running decoder output, resident across layers.
    qpos_acc    : VMEM scratch - layer-invariant query_pos.
    """
    layer = pl.program_id(1)
    mm_dtype = w1_ref.dtype

    @pl.when(layer == 0)
    def _():
        # --- gen_sineembed_for_position + ref_point_head, computed ONCE -----
        ref = ref_ref[...]                                   # (TM, 4) = (x, y, w, h)
        scale = scale_ref[...]                               # (1, 128)
        phase = phase_ref[...]                               # (1, 128)
        # torch concat order is (pos_y, pos_x, pos_w, pos_h) -> coord cols (1,0,2,3);
        # cos(x) == sin(x + pi/2) on odd lanes -> single transcendental per lane.
        embs = [jnp.sin(ref[:, c:c + 1] * scale + phase) for c in (1, 0, 2, 3)]
        sine = jnp.concatenate(embs, axis=-1)                # (TM, 512), one K=512 dot
        h1 = jnp.maximum(
            jnp.dot(sine.astype(mm_dtype), w1_ref[...],
                    preferred_element_type=jnp.float32) + b1_ref[...], 0.0)
        # query_scale is None -> pos_scale = 1, so query_pos == raw_query_pos.
        qpos_acc[...] = jnp.dot(h1.astype(mm_dtype), w2_ref[...],
                                preferred_element_type=jnp.float32) + b2_ref[...]
        out_acc[...] = tgt_ref[...]

    # --- decoder layer --------------------------------------------------------
    # TODO(synk): the real `decoder_layer` (self-attn + MSDeformAttn cross-attn
    # over `memory`) is an externally supplied module in the PyTorch code, not
    # defined by TransformerDecoder; a deterministic residual FFN stand-in that
    # consumes (tgt + query_pos) is used here.
    wl = wl_ref[layer]                                       # (256, 256), VMEM-resident
    bl = bl_ref[layer]                                       # (1, 256)
    out_in = out_acc[...]
    lin = jnp.dot((out_in + qpos_acc[...]).astype(wl.dtype), wl,
                  preferred_element_type=jnp.float32) + bl
    out_new = out_in + jnp.maximum(lin, 0.0)
    out_acc[...] = out_new

    # --- self.norm = LayerNorm(d_model), f32, one-pass statistics -------------
    mean = jnp.mean(out_new, axis=1, keepdims=True)
    mean_sq = jnp.mean(out_new * out_new, axis=1, keepdims=True)
    var = jnp.maximum(mean_sq - mean * mean, 0.0)
    normed_ref[0] = ((out_new - mean) * jax.lax.rsqrt(var + EPS_LN)) \
        * gamma_ref[...] + beta_ref[...]


def _round_up(x, m):
    return (x + m - 1) // m * m


def _pick_row_tile(n):
    # 512-row tiles keep mem-bound kernels near the HBM roofline (~85% vs ~63%
    # at 256) and stay far under the 64 MiB/TC v7x VMEM budget (<~6 MiB total
    # working set including double-buffering and resident layer weights).
    if n >= 512:
        return 512
    return max(8, _round_up(n, 8))


def _fused_decoder(ref_bm, tgt_bm, params, matmul_dtype):
    """ref_bm: (N, 4), tgt_bm: (N, 256), batch-major rows. Returns (L, N, 256)."""
    N = tgt_bm.shape[0]
    L = params['wl'].shape[0]
    tile_m = _pick_row_tile(N)
    n_pad = _round_up(N, tile_m)
    if n_pad != N:
        ref_bm = jnp.pad(ref_bm, ((0, n_pad - N), (0, 0)))
        tgt_bm = jnp.pad(tgt_bm, ((0, n_pad - N), (0, 0)))

    # bf16 operands -> MXU fast path + half the weight bytes; f32 accumulation.
    w1 = params['w1'].astype(matmul_dtype)
    w2 = params['w2'].astype(matmul_dtype)
    wl = params['wl'].astype(matmul_dtype)

    sine_scale = jnp.asarray(_SCALE_INV_DIM_T)   # (1, 128)
    odd_phase = jnp.asarray(_ODD_PHASE)          # (1, 128)

    row = lambda i, l: (i, 0)
    const2 = lambda i, l: (0, 0)
    const3 = lambda i, l: (0, 0, 0)

    out = pl.pallas_call(
        _fused_decoder_kernel,
        out_shape=jax.ShapeDtypeStruct((L, n_pad, D_MODEL), jnp.float32),
        grid_spec=pltpu.PrefetchScalarGridSpec(
            num_scalar_prefetch=0,
            grid=(n_pad // tile_m, L),
            in_specs=[
                pl.BlockSpec((1, 128), const2),               # sine scale const
                pl.BlockSpec((1, 128), const2),               # odd-lane phase const
                pl.BlockSpec((tile_m, 4), row),               # reference points
                pl.BlockSpec((tile_m, D_MODEL), row),         # tgt (initial output)
                pl.BlockSpec((SINE_DIM, D_MODEL), const2),    # w1
                pl.BlockSpec((1, D_MODEL), const2),           # b1
                pl.BlockSpec((D_MODEL, D_MODEL), const2),     # w2
                pl.BlockSpec((1, D_MODEL), const2),           # b2
                pl.BlockSpec((L, D_MODEL, D_MODEL), const3),  # stacked wl (resident)
                pl.BlockSpec((L, 1, D_MODEL), const3),        # stacked bl (resident)
                pl.BlockSpec((1, D_MODEL), const2),           # gamma
                pl.BlockSpec((1, D_MODEL), const2),           # beta
            ],
            out_specs=pl.BlockSpec((1, tile_m, D_MODEL), lambda i, l: (l, i, 0)),
            scratch_shapes=[pltpu.VMEM((tile_m, D_MODEL), jnp.float32),   # output
                            pltpu.VMEM((tile_m, D_MODEL), jnp.float32)],  # query_pos
        ),
        compiler_params=pltpu.CompilerParams(
            dimension_semantics=("parallel", "arbitrary"),
            vmem_limit_bytes=32 * 1024 * 1024),
    )(sine_scale, odd_phase, ref_bm, tgt_bm, w1, params['b1'], w2, params['b2'],
      wl, params['bl'], params['gamma'], params['beta'])
    return out[:, :N, :]


# ----------------------------------------------------------------- wrapper ---
def transformer_decoder_forward(tgt, memory, refpoints_unsigmoid, valid_ratios,
                                params, matmul_dtype=jnp.bfloat16):
    """Mirrors TransformerDecoder.forward (bbox_embed is None, query_scale is None)."""
    del memory  # TODO(synk): memory/pos are consumed by the external decoder_layer only.
    nq, bs, d = tgt.shape
    L = params['wl'].shape[0]

    reference_points = jax.nn.sigmoid(refpoints_unsigmoid)             # (nq, bs, 4)
    vr4 = jnp.concatenate([valid_ratios, valid_ratios], axis=-1)       # (bs, nlvl, 4)
    ref_in0 = reference_points * vr4[None, :, 0, :]                    # level-0 slice, (nq, bs, 4)

    # Batch-major rows so the stacked kernel output is already (L, bs, nq, d).
    ref_bm = ref_in0.transpose(1, 0, 2).reshape(bs * nq, 4)
    tgt_bm = tgt.transpose(1, 0, 2).reshape(bs * nq, d)

    normed = _fused_decoder(ref_bm, tgt_bm, params, matmul_dtype)      # (L, bs*nq, d)
    normed = normed.reshape(L, bs, nq, d)

    intermediate = [normed[l] for l in range(L)]                       # each (bs, nq, d)
    ref_points_out = [reference_points.transpose(1, 0, 2)]             # (bs, nq, 4)
    return intermediate, ref_points_out


# ----------------------------------------------------------- plain-JAX ref ---
def _sine_embed_ref(pos4):  # (nq, bs, 4)
    scale = 2.0 * math.pi
    dim_t = jnp.arange(128, dtype=jnp.float32)
    dim_t = 10000.0 ** (2.0 * jnp.floor(dim_t / 2.0) / 128.0)

    def one(coord):  # (nq, bs)
        p = coord[:, :, None] * scale / dim_t                          # (nq, bs, 128)
        return jnp.stack([jnp.sin(p[:, :, 0::2]), jnp.cos(p[:, :, 1::2])],
                         axis=3).reshape(p.shape[0], p.shape[1], 128)

    return jnp.concatenate([one(pos4[..., 1]), one(pos4[..., 0]),
                            one(pos4[..., 2]), one(pos4[..., 3])], axis=-1)


def reference_forward(tgt, refpoints_unsigmoid, valid_ratios, params):
    reference_points = jax.nn.sigmoid(refpoints_unsigmoid)
    vr4 = jnp.concatenate([valid_ratios, valid_ratios], axis=-1)
    ref_in0 = reference_points * vr4[None, :, 0, :]
    sine = _sine_embed_ref(ref_in0)
    h1 = jax.nn.relu(sine @ params['w1'] + params['b1'][0])
    query_pos = h1 @ params['w2'] + params['b2'][0]
    output = tgt
    inter = []
    for l in range(params['wl'].shape[0]):
        lin = (output + query_pos) @ params['wl'][l] + params['bl'][l, 0]
        output = output + jax.nn.relu(lin)
        mean = output.mean(-1, keepdims=True)
        var = ((output - mean) ** 2).mean(-1, keepdims=True)
        normed = (output - mean) / jnp.sqrt(var + EPS_LN) * params['gamma'][0] + params['beta'][0]
        inter.append(normed.transpose(1, 0, 2))
    return inter, [reference_points.transpose(1, 0, 2)]


# ------------------------------------------------------------------- setup ---
def init_params(key, num_layers):
    k_w1, k_b1, k_w2, k_b2, k_bl, *k_wl = jax.random.split(key, 5 + num_layers)

    def xavier(k, shape):
        bound = math.sqrt(6.0 / (shape[-2] + shape[-1]))
        return jax.random.uniform(k, shape, jnp.float32, -bound, bound)

    def bias(k, fan_in, shape):
        bound = 1.0 / math.sqrt(fan_in)
        return jax.random.uniform(k, shape, jnp.float32, -bound, bound)

    return {
        'w1': xavier(k_w1, (SINE_DIM, D_MODEL)),
        'b1': bias(k_b1, SINE_DIM, (1, D_MODEL)),
        'w2': xavier(k_w2, (D_MODEL, D_MODEL)),
        'b2': bias(k_b2, D_MODEL, (1, D_MODEL)),
        'wl': jnp.stack([xavier(k, (D_MODEL, D_MODEL)) for k in k_wl], axis=0),
        'bl': bias(k_bl, D_MODEL, (num_layers, 1, D_MODEL)),
        'gamma': jnp.ones((1, D_MODEL), jnp.float32),
        'beta': jnp.zeros((1, D_MODEL), jnp.float32),
    }


if __name__ == "__main__":
    key = jax.random.PRNGKey(0)
    nq, bs, hw, nlevel, num_layers = 8, 2, 16, 1, 2
    k1, k2, k3, k4, kp = jax.random.split(key, 5)

    tgt = jax.random.normal(k1, (nq, bs, D_MODEL), jnp.float32)
    memory = jax.random.normal(k2, (hw, bs, D_MODEL), jnp.float32)
    refpoints_unsigmoid = jax.random.normal(k3, (nq, bs, 4), jnp.float32)
    valid_ratios = jax.random.uniform(k4, (bs, nlevel, 2), jnp.float32, 0.5, 1.0)
    params = init_params(kp, num_layers)

    # f32 matmul path: strict check vs the pure-f32 reference.
    inter, refs = transformer_decoder_forward(
        tgt, memory, refpoints_unsigmoid, valid_ratios, params,
        matmul_dtype=jnp.float32)
    inter = [jax.block_until_ready(x) for x in inter]
    refs = [jax.block_until_ready(x) for x in refs]

    # bf16 matmul-operand path (production default; MXU fast path on
    # v5e/v6e/v7x): looser, mixed-precision tolerance vs the same f32 reference.
    inter_bf16, _ = transformer_decoder_forward(
        tgt, memory, refpoints_unsigmoid, valid_ratios, params)
    inter_bf16 = [jax.block_until_ready(x) for x in inter_bf16]

    inter_ref, refs_ref = reference_forward(tgt, refpoints_unsigmoid, valid_ratios, params)

    ok = all(np.allclose(np.asarray(a), np.asarray(b), rtol=2e-3, atol=2e-3)
             for a, b in zip(inter, inter_ref))
    ok = ok and np.allclose(np.asarray(refs[0]), np.asarray(refs_ref[0]),
                            rtol=1e-5, atol=1e-5)
    ok = ok and all(np.allclose(np.asarray(a), np.asarray(b), rtol=3e-2, atol=3e-2)
                    for a, b in zip(inter_bf16, inter_ref))
    assert ok, "Pallas kernel output mismatch vs plain-JAX reference"
    print("KERNEL_OK")
</pallas_src>

<mosaic_0001>
module attributes {stable_mosaic.version = 11 : i64} {
  func.func @_fused_decoder_kernel(%arg0: i32, %arg1: i32, %arg2: memref<1x128xf32, #tpu.memory_space<vmem>>, %arg3: memref<1x128xf32, #tpu.memory_space<vmem>>, %arg4: memref<16x4xf32, #tpu.memory_space<vmem>>, %arg5: memref<16x256xf32, #tpu.memory_space<vmem>>, %arg6: memref<512x256xf32, #tpu.memory_space<vmem>>, %arg7: memref<1x256xf32, #tpu.memory_space<vmem>>, %arg8: memref<256x256xf32, #tpu.memory_space<vmem>>, %arg9: memref<1x256xf32, #tpu.memory_space<vmem>>, %arg10: memref<2x256x256xf32, #tpu.memory_space<vmem>>, %arg11: memref<2x1x256xf32, #tpu.memory_space<vmem>>, %arg12: memref<1x256xf32, #tpu.memory_space<vmem>>, %arg13: memref<1x256xf32, #tpu.memory_space<vmem>>, %arg14: memref<1x16x256xf32, #tpu.memory_space<vmem>>, %arg15: memref<16x256xf32, #tpu.memory_space<vmem>>, %arg16: memref<16x256xf32, #tpu.memory_space<vmem>>) attributes {dimension_semantics = [#tpu.dimension_semantics<parallel>, #tpu.dimension_semantics<arbitrary>], iteration_bounds = array<i64: 1, 2>, scalar_prefetch = 0 : i64, scratch_operands = 2 : i64, tpu.core_type = #tpu.core_type<tc>, window_params = [{pipeline_mode = #tpu.pipeline_mode<synchronous>, transform_indices = @transform_0, window_bounds = array<i64: 1, 128>}, {pipeline_mode = #tpu.pipeline_mode<synchronous>, transform_indices = @transform_1, window_bounds = array<i64: 1, 128>}, {transform_indices = @transform_2, window_bounds = array<i64: 16, 4>}, {transform_indices = @transform_3, window_bounds = array<i64: 16, 256>}, {pipeline_mode = #tpu.pipeline_mode<synchronous>, transform_indices = @transform_4, window_bounds = array<i64: 512, 256>}, {pipeline_mode = #tpu.pipeline_mode<synchronous>, transform_indices = @transform_5, window_bounds = array<i64: 1, 256>}, {pipeline_mode = #tpu.pipeline_mode<synchronous>, transform_indices = @transform_6, window_bounds = array<i64: 256, 256>}, {pipeline_mode = #tpu.pipeline_mode<synchronous>, transform_indices = @transform_7, window_bounds = array<i64: 1, 256>}, {pipeline_mode = #tpu.pipeline_mode<synchronous>, transform_indices = @transform_8, window_bounds = array<i64: 2, 256, 256>}, {pipeline_mode = #tpu.pipeline_mode<synchronous>, transform_indices = @transform_9, window_bounds = array<i64: 2, 1, 256>}, {pipeline_mode = #tpu.pipeline_mode<synchronous>, transform_indices = @transform_10, window_bounds = array<i64: 1, 256>}, {pipeline_mode = #tpu.pipeline_mode<synchronous>, transform_indices = @transform_11, window_bounds = array<i64: 1, 256>}, {transform_indices = @transform_12, window_bounds = array<i64: 1, 16, 256>}]} {
    %c0_i32 = arith.constant 0 : i32
    %0 = arith.cmpi eq, %arg1, %c0_i32 : i32
    %1 = arith.extui %0 : i1 to i32
    %c0_i32_0 = arith.constant 0 : i32
    %2 = arith.cmpi ne, %1, %c0_i32_0 : i32
    scf.if %2 {
      %c0_24 = arith.constant 0 : index
      %c0_25 = arith.constant 0 : index
      %48 = vector.load %arg4[%c0_24, %c0_25] : memref<16x4xf32, #tpu.memory_space<vmem>>, vector<16x4xf32>
      %c0_26 = arith.constant 0 : index
      %c0_27 = arith.constant 0 : index
      %49 = vector.load %arg2[%c0_26, %c0_27] : memref<1x128xf32, #tpu.memory_space<vmem>>, vector<1x128xf32>
      %c0_28 = arith.constant 0 : index
      %c0_29 = arith.constant 0 : index
      %50 = vector.load %arg3[%c0_28, %c0_29] : memref<1x128xf32, #tpu.memory_space<vmem>>, vector<1x128xf32>
      %51 = vector.extract_strided_slice %48 {offsets = [0, 1], sizes = [16, 1], strides = [1, 1]} : vector<16x4xf32> to vector<16x1xf32>
      %52 = vector.broadcast %51 : vector<16x1xf32> to vector<16x128xf32>
      %53 = vector.broadcast %49 : vector<1x128xf32> to vector<16x128xf32>
      %54 = arith.mulf %52, %53 : vector<16x128xf32>
      %55 = vector.broadcast %50 : vector<1x128xf32> to vector<16x128xf32>
      %56 = arith.addf %54, %55 : vector<16x128xf32>
      %57 = math.sin %56 : vector<16x128xf32>
      %58 = vector.extract_strided_slice %48 {offsets = [0, 0], sizes = [16, 1], strides = [1, 1]} : vector<16x4xf32> to vector<16x1xf32>
      %59 = vector.broadcast %58 : vector<16x1xf32> to vector<16x128xf32>
      %60 = vector.broadcast %49 : vector<1x128xf32> to vector<16x128xf32>
      %61 = arith.mulf %59, %60 : vector<16x128xf32>
      %62 = vector.broadcast %50 : vector<1x128xf32> to vector<16x128xf32>
      %63 = arith.addf %61, %62 : vector<16x128xf32>
      %64 = math.sin %63 : vector<16x128xf32>
      %65 = vector.extract_strided_slice %48 {offsets = [0, 2], sizes = [16, 1], strides = [1, 1]} : vector<16x4xf32> to vector<16x1xf32>
      %66 = vector.broadcast %65 : vector<16x1xf32> to vector<16x128xf32>
      %67 = vector.broadcast %49 : vector<1x128xf32> to vector<16x128xf32>
      %68 = arith.mulf %66, %67 : vector<16x128xf32>
      %69 = vector.broadcast %50 : vector<1x128xf32> to vector<16x128xf32>
      %70 = arith.addf %68, %69 : vector<16x128xf32>
      %71 = math.sin %70 : vector<16x128xf32>
      %72 = vector.extract_strided_slice %48 {offsets = [0, 3], sizes = [16, 1], strides = [1, 1]} : vector<16x4xf32> to vector<16x1xf32>
      %73 = vector.broadcast %72 : vector<16x1xf32> to vector<16x128xf32>
      %74 = vector.broadcast %49 : vector<1x128xf32> to vector<16x128xf32>
      %75 = arith.mulf %73, %74 : vector<16x128xf32>
      %76 = vector.broadcast %50 : vector<1x128xf32> to vector<16x128xf32>
      %77 = arith.addf %75, %76 : vector<16x128xf32>
      %78 = math.sin %77 : vector<16x128xf32>
      %79 = tpu.concatenate %57, %64, %71, %78 in 1 : vector<16x128xf32>, vector<16x128xf32>, vector<16x128xf32>, vector<16x128xf32> -> vector<16x512xf32>
      %c0_30 = arith.constant 0 : index
      %c0_31 = arith.constant 0 : index
      %80 = vector.load %arg6[%c0_30, %c0_31] : memref<512x256xf32, #tpu.memory_space<vmem>>, vector<512x256xf32>
      %cst_32 = arith.constant dense<0.000000e+00> : vector<16x256xf32>
      %81 = tpu.matmul %79, %80, %cst_32 {dimension_numbers = #tpu.dot_dimension_numbers<[1], [0], [0], [1], [0, 0, 1, 1], [], []>} : vector<16x512xf32>, vector<512x256xf32>, vector<16x256xf32> -> vector<16x256xf32>
      %c0_33 = arith.constant 0 : index
      %c0_34 = arith.constant 0 : index
      %82 = vector.load %arg7[%c0_33, %c0_34] : memref<1x256xf32, #tpu.memory_space<vmem>>, vector<1x256xf32>
      %83 = vector.broadcast %82 : vector<1x256xf32> to vector<16x256xf32>
      %84 = arith.addf %81, %83 : vector<16x256xf32>
      %cst_35 = arith.constant 0.000000e+00 : f32
      %85 = vector.broadcast %cst_35 : f32 to vector<16x256xf32>
      %86 = arith.maximumf %84, %85 : vector<16x256xf32>
      %c0_36 = arith.constant 0 : index
      %c0_37 = arith.constant 0 : index
      %87 = vector.load %arg8[%c0_36, %c0_37] : memref<256x256xf32, #tpu.memory_space<vmem>>, vector<256x256xf32>
      %cst_38 = arith.constant dense<0.000000e+00> : vector<16x256xf32>
      %88 = tpu.matmul %86, %87, %cst_38 {dimension_numbers = #tpu.dot_dimension_numbers<[1], [0], [0], [1], [0, 0, 1, 1], [], []>} : vector<16x256xf32>, vector<256x256xf32>, vector<16x256xf32> -> vector<16x256xf32>
      %c0_39 = arith.constant 0 : index
      %c0_40 = arith.constant 0 : index
      %89 = vector.load %arg9[%c0_39, %c0_40] : memref<1x256xf32, #tpu.memory_space<vmem>>, vector<1x256xf32>
      %90 = vector.broadcast %89 : vector<1x256xf32> to vector<16x256xf32>
      %91 = arith.addf %88, %90 : vector<16x256xf32>
      %c0_41 = arith.constant 0 : index
      %c0_42 = arith.constant 0 : index
      %92 = vector.load %arg16[%c0_41, %c0_42] : memref<16x256xf32, #tpu.memory_space<vmem>>, vector<16x256xf32>
      tpu.vector_store %arg16[%c0_41, %c0_42], %91 {strides = array<i32>} : memref<16x256xf32, #tpu.memory_space<vmem>>, vector<16x256xf32>,
      %c0_43 = arith.constant 0 : index
      %c0_44 = arith.constant 0 : index
      %93 = vector.load %arg5[%c0_43, %c0_44] : memref<16x256xf32, #tpu.memory_space<vmem>>, vector<16x256xf32>
      %c0_45 = arith.constant 0 : index
      %c0_46 = arith.constant 0 : index
      %94 = vector.load %arg15[%c0_45, %c0_46] : memref<16x256xf32, #tpu.memory_space<vmem>>, vector<16x256xf32>
      tpu.vector_store %arg15[%c0_45, %c0_46], %93 {strides = array<i32>} : memref<16x256xf32, #tpu.memory_space<vmem>>, vector<16x256xf32>,
    } else {
    }
    %3 = arith.index_cast %arg1 : i32 to index
    %c0 = arith.constant 0 : index
    %c0_1 = arith.constant 0 : index
    %4 = vector.load %arg10[%3, %c0, %c0_1] : memref<2x256x256xf32, #tpu.memory_space<vmem>>, vector<1x256x256xf32>
    %5 = vector.shape_cast %4 : vector<1x256x256xf32> to vector<256x256xf32>
    %6 = arith.index_cast %arg1 : i32 to index
    %c0_2 = arith.constant 0 : index
    %c0_3 = arith.constant 0 : index
    %7 = vector.load %arg11[%6, %c0_2, %c0_3] : memref<2x1x256xf32, #tpu.memory_space<vmem>>, vector<1x1x256xf32>
    %8 = vector.shape_cast %7 : vector<1x1x256xf32> to vector<1x256xf32>
    %c0_4 = arith.constant 0 : index
    %c0_5 = arith.constant 0 : index
    %9 = vector.load %arg15[%c0_4, %c0_5] : memref<16x256xf32, #tpu.memory_space<vmem>>, vector<16x256xf32>
    %c0_6 = arith.constant 0 : index
    %c0_7 = arith.constant 0 : index
    %10 = vector.load %arg16[%c0_6, %c0_7] : memref<16x256xf32, #tpu.memory_space<vmem>>, vector<16x256xf32>
    %11 = arith.addf %9, %10 : vector<16x256xf32>
    %cst = arith.constant dense<0.000000e+00> : vector<16x256xf32>
    %12 = tpu.matmul %11, %5, %cst {dimension_numbers = #tpu.dot_dimension_numbers<[1], [0], [0], [1], [0, 0, 1, 1], [], []>} : vector<16x256xf32>, vector<256x256xf32>, vector<16x256xf32> -> vector<16x256xf32>
    %13 = vector.broadcast %8 : vector<1x256xf32> to vector<16x256xf32>
    %14 = arith.addf %12, %13 : vector<16x256xf32>
    %cst_8 = arith.constant 0.000000e+00 : f32
    %15 = vector.broadcast %cst_8 : f32 to vector<16x256xf32>
    %16 = arith.maximumf %14, %15 : vector<16x256xf32>
    %17 = arith.addf %9, %16 : vector<16x256xf32>
    %c0_9 = arith.constant 0 : index
    %c0_10 = arith.constant 0 : index
    %18 = vector.load %arg15[%c0_9, %c0_10] : memref<16x256xf32, #tpu.memory_space<vmem>>, vector<16x256xf32>
    tpu.vector_store %arg15[%c0_9, %c0_10], %17 {strides = array<i32>} : memref<16x256xf32, #tpu.memory_space<vmem>>, vector<16x256xf32>,
    %cst_11 = arith.constant dense<0.000000e+00> : vector<16xf32>
    %19 = vector.multi_reduction <add>, %17, %cst_11 [1] : vector<16x256xf32> to vector<16xf32>
    %20 = vector.shape_cast %19 : vector<16xf32> to vector<16x1xf32>
    %cst_12 = arith.constant 2.560000e+02 : f32
    %21 = vector.broadcast %cst_12 : f32 to vector<16x1xf32>
    %22 = arith.divf %20, %21 : vector<16x1xf32>
    %23 = arith.mulf %17, %17 : vector<16x256xf32>
    %cst_13 = arith.constant dense<0.000000e+00> : vector<16xf32>
    %24 = vector.multi_reduction <add>, %23, %cst_13 [1] : vector<16x256xf32> to vector<16xf32>
    %25 = vector.shape_cast %24 : vector<16xf32> to vector<16x1xf32>
    %cst_14 = arith.constant 2.560000e+02 : f32
    %26 = vector.broadcast %cst_14 : f32 to vector<16x1xf32>
    %27 = arith.divf %25, %26 : vector<16x1xf32>
    %28 = arith.mulf %22, %22 : vector<16x1xf32>
    %29 = arith.subf %27, %28 : vector<16x1xf32>
    %cst_15 = arith.constant 0.000000e+00 : f32
    %30 = vector.broadcast %cst_15 : f32 to vector<16x1xf32>
    %31 = arith.maximumf %29, %30 : vector<16x1xf32>
    %32 = vector.broadcast %22 : vector<16x1xf32> to vector<16x256xf32>
    %33 = arith.subf %17, %32 : vector<16x256xf32>
    %cst_16 = arith.constant 9.99999974E-6 : f32
    %34 = vector.broadcast %cst_16 : f32 to vector<16x1xf32>
    %35 = arith.addf %31, %34 : vector<16x1xf32>
    %36 = math.rsqrt %35 : vector<16x1xf32>
    %37 = vector.broadcast %36 : vector<16x1xf32> to vector<16x256xf32>
    %38 = arith.mulf %33, %37 : vector<16x256xf32>
    %c0_17 = arith.constant 0 : index
    %c0_18 = arith.constant 0 : index
    %39 = vector.load %arg12[%c0_17, %c0_18] : memref<1x256xf32, #tpu.memory_space<vmem>>, vector<1x256xf32>
    %40 = vector.broadcast %39 : vector<1x256xf32> to vector<16x256xf32>
    %41 = arith.mulf %38, %40 : vector<16x256xf32>
    %c0_19 = arith.constant 0 : index
    %c0_20 = arith.constant 0 : index
    %42 = vector.load %arg13[%c0_19, %c0_20] : memref<1x256xf32, #tpu.memory_space<vmem>>, vector<1x256xf32>
    %43 = vector.broadcast %42 : vector<1x256xf32> to vector<16x256xf32>
    %44 = arith.addf %41, %43 : vector<16x256xf32>
    %c0_21 = arith.constant 0 : index
    %c0_22 = arith.constant 0 : index
    %c0_23 = arith.constant 0 : index
    %45 = vector.load %arg14[%c0_21, %c0_22, %c0_23] : memref<1x16x256xf32, #tpu.memory_space<vmem>>, vector<1x16x256xf32>
    %46 = vector.shape_cast %45 : vector<1x16x256xf32> to vector<16x256xf32>
    %47 = vector.shape_cast %44 : vector<16x256xf32> to vector<1x16x256xf32>
    tpu.vector_store %arg14[%c0_21, %c0_22, %c0_23], %47 {strides = array<i32>} : memref<1x16x256xf32, #tpu.memory_space<vmem>>, vector<1x16x256xf32>,
    return
  }
  func.func @transform_0(%arg0: i32, %arg1: i32) -> (i32, i32) {
    %c0_i32 = arith.constant 0 : i32
    %c0_i32_0 = arith.constant 0 : i32
    %c0_i32_1 = arith.constant 0 : i32
    return %c0_i32, %c0_i32_0 : i32, i32
  }
  func.func @transform_1(%arg0: i32, %arg1: i32) -> (i32, i32) {
    %c0_i32 = arith.constant 0 : i32
    %c0_i32_0 = arith.constant 0 : i32
    %c0_i32_1 = arith.constant 0 : i32
    return %c0_i32, %c0_i32_0 : i32, i32
  }
  func.func @transform_2(%arg0: i32, %arg1: i32) -> (i32, i32) {
    %c0_i32 = arith.constant 0 : i32
    %c0_i32_0 = arith.constant 0 : i32
    return %arg0, %c0_i32 : i32, i32
  }
  func.func @transform_3(%arg0: i32, %arg1: i32) -> (i32, i32) {
    %c0_i32 = arith.constant 0 : i32
    %c0_i32_0 = arith.constant 0 : i32
    return %arg0, %c0_i32 : i32, i32
  }
  func.func @transform_4(%arg0: i32, %arg1: i32) -> (i32, i32) {
    %c0_i32 = arith.constant 0 : i32
    %c0_i32_0 = arith.constant 0 : i32
    %c0_i32_1 = arith.constant 0 : i32
    return %c0_i32, %c0_i32_0 : i32, i32
  }
  func.func @transform_5(%arg0: i32, %arg1: i32) -> (i32, i32) {
    %c0_i32 = arith.constant 0 : i32
    %c0_i32_0 = arith.constant 0 : i32
    %c0_i32_1 = arith.constant 0 : i32
    return %c0_i32, %c0_i32_0 : i32, i32
  }
  func.func @transform_6(%arg0: i32, %arg1: i32) -> (i32, i32) {
    %c0_i32 = arith.constant 0 : i32
    %c0_i32_0 = arith.constant 0 : i32
    %c0_i32_1 = arith.constant 0 : i32
    return %c0_i32, %c0_i32_0 : i32, i32
  }
  func.func @transform_7(%arg0: i32, %arg1: i32) -> (i32, i32) {
    %c0_i32 = arith.constant 0 : i32
    %c0_i32_0 = arith.constant 0 : i32
    %c0_i32_1 = arith.constant 0 : i32
    return %c0_i32, %c0_i32_0 : i32, i32
  }
  func.func @transform_8(%arg0: i32, %arg1: i32) -> (i32, i32, i32) {
    %c0_i32 = arith.constant 0 : i32
    %c0_i32_0 = arith.constant 0 : i32
    %c0_i32_1 = arith.constant 0 : i32
    %c0_i32_2 = arith.constant 0 : i32
    return %c0_i32, %c0_i32_0, %c0_i32_1 : i32, i32, i32
  }
  func.func @transform_9(%arg0: i32, %arg1: i32) -> (i32, i32, i32) {
    %c0_i32 = arith.constant 0 : i32
    %c0_i32_0 = arith.constant 0 : i32
    %c0_i32_1 = arith.constant 0 : i32
    %c0_i32_2 = arith.constant 0 : i32
    return %c0_i32, %c0_i32_0, %c0_i32_1 : i32, i32, i32
  }
  func.func @transform_10(%arg0: i32, %arg1: i32) -> (i32, i32) {
    %c0_i32 = arith.constant 0 : i32
    %c0_i32_0 = arith.constant 0 : i32
    %c0_i32_1 = arith.constant 0 : i32
    return %c0_i32, %c0_i32_0 : i32, i32
  }
  func.func @transform_11(%arg0: i32, %arg1: i32) -> (i32, i32) {
    %c0_i32 = arith.constant 0 : i32
    %c0_i32_0 = arith.constant 0 : i32
    %c0_i32_1 = arith.constant 0 : i32
    return %c0_i32, %c0_i32_0 : i32, i32
  }
  func.func @transform_12(%arg0: i32, %arg1: i32) -> (i32, i32, i32) {
    %c0_i32 = arith.constant 0 : i32
    %c0_i32_0 = arith.constant 0 : i32
    return %arg1, %arg0, %c0_i32 : i32, i32, i32
  }
}

</mosaic_0001>

<bundles_post_ra>
// kernel: tpu_custom_call.1
= control target key start
LH: loop header
LB: loop body
LE: loop exit
PB: predicated region body
PF: predicated region fallthrough
CT: control target
= control target key end

     0   :  { %s4665_s0 = inlined_call_operand.vmem [shape: f32[1,128], index: 0, kind: input, shape index: {}]   ;;  %s4666_s1 = inlined_call_operand.vmem [shape: f32[1,128], index: 1, kind: input, shape index: {}]   ;;  %s4667_s2 = inlined_call_operand.vmem [shape: f32[16,4], index: 2, kind: input, shape index: {}]   ;;  %s4668_s3 = inlined_call_operand.hbm [shape: f32[16,256], index: 3, kind: input, shape index: {}]   ;;  %s4669_s4 = inlined_call_operand.hbm [shape: f32[512,256], index: 4, kind: input, shape index: {}]   ;;  %s4670_s5 = inlined_call_operand.vmem [shape: f32[1,256], index: 5, kind: input, shape index: {}]   ;;  %s4671_s6 = inlined_call_operand.hbm [shape: f32[256,256], index: 6, kind: input, shape index: {}]   ;;  %s4672_s7 = inlined_call_operand.vmem [shape: f32[1,256], index: 7, kind: input, shape index: {}]   ;;  %s4673_s8 = inlined_call_operand.hbm [shape: f32[2,256,256], index: 8, kind: input, shape index: {}]   ;;  %s4674_s9 = inlined_call_operand.vmem [shape: f32[2,1,256], index: 9, kind: input, shape index: {}]   ;;  %s4675_s10 = inlined_call_operand.vmem [shape: f32[1,256], index: 10, kind: input, shape index: {}]   ;;  %s4676_s11 = inlined_call_operand.vmem [shape: f32[1,256], index: 11, kind: input, shape index: {}]   ;;  %s4677_s12 = inlined_call_operand.hbm [shape: f32[2,16,256], index: 12, kind: output, shape index: {}]  }
   0x1   :  { %4688 = sst [smem:[#allocation25_spill]] %s4669_s4 }
   0x2   :  { %4689 = sst [smem:[#allocation26_spill]] %s4677_s12 }
   0x3   :  { %17 = vsyncpa [#allocation5], 0 }
   0x4   :  { %18 = vsyncpa [#allocation8], 0 }
   0x5   :  { %19 = vsyncpa [#allocation11], 0 }
   0x6   :  { %20 = vsyncpa [#allocation6], 0 }
   0x7   :  { %22 = vsyncpa [#allocation6 + $0x1], 0  ;;  %s3199_s21 = smov 0   ;;  %s3201_s22 = smov 0  }
   0x8   :  { %s3203_s23 = smov 0   ;;  %s3205_s24 = smov 0  }
   0x9   :  { %s3207_s25 = smov 0   ;;  %s3209_s26 = smov 0  }
   0xa LB: > { %4690 = sst [smem:[#allocation17_spill]] %s3093_s21  ;;  %s2726_s27 = sadd.s32 4294967295, %s3113_s26   ;;  %s3113_s26 = sphi %s3209_s26, %s28_s26   ;;  %s3109_s25 = sphi %s3207_s25, %s4728_s25   ;;  %s3105_s24 = sphi %s3205_s24, %s4727_s24   ;;  %s3101_s23 = sphi %s3203_s23, %s4726_s23   ;;  %s3097_s22 = sphi %s3201_s22, %s4730_s22   ;;  %s3093_s21 = sphi %s3199_s21, %s4729_s21  }
   0xb   : > { %4691 = sst [smem:[#allocation18_spill]] %s3101_s23  ;;  %s2727_s28 = sadd.s32 4294967294, %s3113_s26  }
   0xc   : > { %4692 = sst [smem:[#allocation19_spill]] %s3109_s25  ;;  %s37_s29 = sadd.s32 1, %s3109_s25 }
   0xd   : > { %4693 = sst [smem:[#allocation20_spill]] %s3113_s26  ;;  %s311_s30 = sadd.s32 1, %s3101_s23 }
   0xe   : > { %p38_p0 = scmp.ge.s32.totalorder %s37_s29, 2  ;;  %p321_p1 = scmp.ne.s32.totalorder %s3101_s23, %s3097_s22 }
   0xf   : > { %p322_p2 = scmp.eq.s32.totalorder %s2726_s27, 1  ;;  %p327_p3 = scmp.ne.s32.totalorder %s3097_s22, %s3093_s21 }
  0x10   : > { %s4732_s29 = smov (%p38_p0, %s37_s29), 0  ;;  %p328_p5 = scmp.eq.s32.totalorder %s2727_s28, 1 }
  0x11   : > { %4694 = sst [smem:[#allocation21_spill]] %s4732_s29  ;;  %p3239_p4 = por %p322_p2, %p321_p1 }
  0x12   : > { %s306_s14 = ssub.s32 %s3109_s25, %s4732_s29  ;;  %p2728_p6 = scmp.ge.s32.totalorder %s3113_s26, 1 }
  0x13   : > { %s4695_s13 = scalar_select %p3239_p4, 1, 0 }
  0x14   : > { %p309_p7 = scmp.eq.s32.totalorder %s306_s14, 0  ;;  %p3246_p8 = por %p328_p5, %p327_p3 }
  0x15   : > { %4696 = sst [smem:[#allocation22_spill]] %s4695_s13  ;;  %p335_p9 = scmp.lt.s32.totalorder %s3113_s26, 3 }
  0x16   : > { %s4697_s15 = scalar_select %p3246_p8, 1, 0 }
  0x17   : > { %s3252_s16 = scalar_select %p309_p7, %s3101_s23, %s311_s30  }
  0x18   : > { %4698 = sst [smem:[#allocation23_spill]] %s4697_s15  ;;  %p3254_p10 = pnand %p2728_p6, %p335_p9 }
  0x19   : > { %4699 = sst [smem:[#allocation24_spill]] %s3252_s16  ;;  %p3258_p11 = scmp.eq.s32.totalorder %s2726_s27, 0 }
  0x1a   : > { %p2793_p12 = pneg %p3254_p10  ;;  %s4702_s4 = sld [smem:[#allocation25_spill]] }
  0x1b   : > { %s3115_s14 = smov [#allocation7]   ;;  %s3116_s29 = smov 256  }
  0x1c   : > { %p3269_p13 = pnand %p3258_p11, %p2793_p12  ;;  %s381_s27 = sshll.u32 %s3115_s14, 4  ;;  %s382_s27 = int_to_ptr.vmem [resolvable:$true] %s381_s27 }
  0x1d   : > { %s3117_s25 = smov 16   ;;  %s365_s19 = sshll.u32 %s4668_s3, 4  ;;  %s366_s19 = int_to_ptr.hbm [resolvable:$true] %s365_s19 }
  0x1e   : > { %s3118_s20 = smov [#allocation4]   ;;  %s396_s26 = sshll.u32 %s4671_s6, 4  ;;  %s397_s26 = int_to_ptr.hbm [resolvable:$true] %s396_s26 }
  0x1f   : > { %s3119_s14 = smov [#allocation9]   ;;  %s3120_s23 = smov [#allocation10]  }
  0x20   : > { %s379_s28 = sshll.u32 %s4702_s4, 4  ;;  %s367_s4 = sshll.u32 %s3118_s20, 4  ;;  %s380_s28 = int_to_ptr.hbm [resolvable:$true] %s379_s28  ;;  %s368_s4 = int_to_ptr.vmem [resolvable:$true] %s367_s4 }
  0x21   : > { %2799 = dma.hbm_to_vmem [thread:$0]  (!%p3269_p13), %s380_s28, 16384, %s382_s27, [#allocation8], %s3116_s29, %s3116_s29, %s3117_s25  }
  0x22   : > { %2796 = dma.hbm_to_vmem [thread:$0]  (!%p3269_p13), %s366_s19, 512, %s368_s4, [#allocation5], %s3116_s29, %s3116_s29, %s3117_s25  }
  0x23   : > { %s398_s13 = sshll.u32 %s3119_s14, 4  ;;  %s413_s27 = sshll.u32 %s4673_s8, 4  ;;  %s399_s13 = int_to_ptr.vmem [resolvable:$true] %s398_s13  ;;  %s414_s27 = int_to_ptr.hbm [resolvable:$true] %s413_s27 }
  0x24   : > { %2802 = dma.hbm_to_vmem [thread:$0]  (!%p3269_p13), %s397_s26, 8192, %s399_s13, [#allocation8], %s3116_s29, %s3116_s29, %s3117_s25  }
  0x25   : > { %s415_s16 = sshll.u32 %s3120_s23, 4  ;;  %440 = sbr.rel (%p3254_p10) target bundleno = 1136 (0x470), region = 68  ;;  %s416_s16 = int_to_ptr.vmem [resolvable:$true] %s415_s16 }
  0x26   : > { %2805 = dma.hbm_to_vmem [thread:$0]  (!%p3269_p13), %s414_s27, 16384, %s416_s16, [#allocation11], %s3116_s29, %s3116_s29, %s3117_s25  }
  0x2a   : > { %3076 = dma.done.wait (%p3258_p11), [#allocation5], 512  }
  0x2b   : > { %3078 = vsyncadd (%p3258_p11), [#allocation5], 4294966784 }
  0x2c   : > { %3080 = dma.done.wait (%p3258_p11), [#allocation8], 24576  }
  0x2d   : > { %3082 = vsyncadd (%p3258_p11), [#allocation8], 4294942720 }
  0x2e   : > { %3084 = dma.done.wait (%p3258_p11), [#allocation11], 16384  }
  0x2f   : > { %3086 = vsyncadd (%p3258_p11), [#allocation11], 4294950912  ;;  %s495_s4 = sand.u32 1, %s3097_s22   ;;  %p2740_p0 = scmp.ne.s32.totalorder %s3105_s24, 0 }
  0x30   : > { %s2739_s12 = sshll.u32 %s495_s4, 5 }
  0x31   : > { %s3307_s21 = scalar_lea.vmem [#allocation12], %s2739_s12  ;;  %509 = sbr.rel (%p2740_p0) target bundleno = 797 (0x31d), region = 88 }
  0x36   : > { %v511_v0 = vld [vmem:[%s4667_s2 + $0x8] sm:$0xff]  ;;  %v510_v1 = vld [vmem:[%s4667_s2] sm:$0xff]  ;;  %v3121_v2 = vmov 3   ;;  %v3122_v3 = vmov 2   ;;  %v3123_v4 = vmov 1   ;;  %v3124_v5 = vmov 0  }
  0x37   : > { %2888 = vset.pattern.permute.xlu1 %v3121_v2  ;;  %2890 = vset.pattern.permute.xlu2 %v3122_v3  ;;  %v3321_v7 = vld [vmem:[%s4665_s0] ss:$0 sm:$0xff]  ;;  %v1904_v26 = vld [vmem:[#allocation7 + $0x2f0] sm:$0xff] }
  0x38   : > { %2886 = vset.pattern.permute.xlu0 %v3122_v3  ;;  %1171 = vperm.xlu2 %2890, %v511_v0   ;;  %v3326_v9 = vld [vmem:[%s4666_s1] ss:$0 sm:$0xff]  ;;  %v1840_v29 = vld [vmem:[#allocation7 + $0xf0] sm:$0xff] }
  0x39   : > { %1489 = vperm.xlu1 %2888, %v510_v1   ;;  %1167 = vperm.xlu0 %2886, %v510_v1   ;;  %v1902_v27 = vld [vmem:[#allocation7 + $0x2e0] sm:$0xff]  ;;  %v1900_v33 = vld [vmem:[#allocation7 + $0x2d0] sm:$0xff] }
  0x3a   : > { %1990 = vmatpush.msra.mxu2 %v1904_v26  ;;  %1944 = vmatpush.msra.mxu0 %v1840_v29  ;;  %v1872_v34 = vld [vmem:[#allocation7 + $0x1f0] sm:$0xff]  ;;  %v1898_v36 = vld [vmem:[#allocation7 + $0x2c0] sm:$0xff] }
  0x3b   : > { %v1936_v35 = vld [vmem:[#allocation7 + $0x3f0] sm:$0xff]  ;;  %1967 = vmatpush.msra.mxu1 %v1872_v34  ;;  %v1838_v37 = vld [vmem:[#allocation7 + $0xe0] sm:$0xff] }
  0x3c   : > { %1991 = vmatpush.msra.mxu2 %v1902_v27  ;;  %v1870_v38 = vld [vmem:[#allocation7 + $0x1e0] sm:$0xff]  ;;  %2013 = vmatpush.msra.mxu3 %v1936_v35  ;;  %v1836_v42 = vld [vmem:[#allocation7 + $0xd0] sm:$0xff] }
  0x3d   : > { %1945 = vmatpush.msra.mxu0 %v1838_v37  ;;  %v1934_v41 = vld [vmem:[#allocation7 + $0x3e0] sm:$0xff]  ;;  %v1868_v43 = vld [vmem:[#allocation7 + $0x1d0] sm:$0xff]  ;;  %1968 = vmatpush.msra.mxu1 %v1870_v38 }
  0x3e   : > { %1992 = vmatpush.msra.mxu2 %v1900_v33  ;;  %v1932_v45 = vld [vmem:[#allocation7 + $0x3d0] sm:$0xff]  ;;  %v1834_v46 = vld [vmem:[#allocation7 + $0xc0] sm:$0xff]  ;;  %2014 = vmatpush.msra.mxu3 %v1934_v41 }
  0x3f   : > { %v1896_v50 = vld [vmem:[#allocation7 + $0x2b0] sm:$0xff]  ;;  %1946 = vmatpush.msra.mxu0 %v1836_v42  ;;  %v1866_v51 = vld [vmem:[#allocation7 + $0x1c0] sm:$0xff]  ;;  %1969 = vmatpush.msra.mxu1 %v1868_v43  ;;  %v3126_v42 = vmov 683565275   ;;  %v3127_v43 = vmov 2131351028  }
  0x40   : > { %2891 = vset.pattern.permute.xlu2 %v3123_v4  ;;  %1993 = vmatpush.msra.mxu2 %v1898_v36  ;;  %v1930_v55 = vld [vmem:[#allocation7 + $0x3c0] sm:$0xff]  ;;  %v1832_v56 = vld [vmem:[#allocation7 + $0xb0] sm:$0xff]  ;;  %v3125_v36 = vmov 2475754826  }
  0x41   : > { %2889 = vset.pattern.permute.xlu1 %v3124_v5  ;;  %2887 = vset.pattern.permute.xlu0 %v3123_v4  ;;  %v1894_v59 = vld [vmem:[#allocation7 + $0x2a0] sm:$0xff]  ;;  %v1864_v60 = vld [vmem:[#allocation7 + $0x1b0] sm:$0xff] }
  0x42   : > { %521 = vperm.xlu2 %2891, %v511_v0   ;;  %845 = vperm.xlu1 %2889, %v510_v1   ;;  %v1928_v62 = vld [vmem:[#allocation7 + $0x3b0] sm:$0xff]  ;;  %v1830_v63 = vld [vmem:[#allocation7 + $0xa0] sm:$0xff] }
  0x43   : > { %516 = vperm.xlu0 %2887, %v510_v1   ;;  %2015 = vmatpush.msra.mxu3 %v1932_v45  ;;  %v1892_v3 = vld [vmem:[#allocation7 + $0x290] sm:$0xff]  ;;  %v1862_v4 = vld [vmem:[#allocation7 + $0x1a0] sm:$0xff] }
  0x44   : > { %1947 = vmatpush.msra.mxu0 %v1834_v46  ;;  %1994 = vmatpush.msra.mxu2 %v1896_v50  ;;  %v1858_v26 = vld [vmem:[#allocation7 + $0x180] sm:$0xff]  ;;  %v1856_v35 = vld [vmem:[#allocation7 + $0x170] sm:$0xff] }
  0x45   : > { %1970 = vmatpush.msra.mxu1 %v1866_v51  ;;  %2016 = vmatpush.msra.mxu3 %v1930_v55  ;;  %v1922_v29 = vld [vmem:[#allocation7 + $0x380] sm:$0xff]  ;;  %v3129_v51 = vmov 920167782  }
  0x46   : > { %1948 = vmatpush.msra.mxu0 %v1832_v56  ;;  %1995 = vmatpush.msra.mxu2 %v1894_v59  ;;  %v1886_v34 = vld [vmem:[#allocation7 + $0x260] sm:$0xff] }
  0x47   : > { %1971 = vmatpush.msra.mxu1 %v1864_v60  ;;  %2017 = vmatpush.msra.mxu3 %v1928_v62  ;;  %v1822_v41 = vld [vmem:[#allocation7 + $0x60] sm:$0xff]  ;;  %v1852_v60 = vld [vmem:[#allocation7 + $0x150] sm:$0xff] }
  0x48   : > { %1949 = vmatpush.msra.mxu0 %v1830_v63  ;;  %1996 = vmatpush.msra.mxu2 %v1892_v3  ;;  %v1918_v55 = vld [vmem:[#allocation7 + $0x360] sm:$0xff]  ;;  %v1916_v3 = vld [vmem:[#allocation7 + $0x350] sm:$0xff] }
  0x49   : > { %1972 = vmatpush.msra.mxu1 %v1862_v4  ;;  %v1882_v59 = vld [vmem:[#allocation7 + $0x240] sm:$0xff] }
  0x4a   : > { %2893 = vset.pattern.permute.xlu2 %v3124_v5  ;;  %2892 = vset.pattern.permute.xlu1 %v3121_v2  ;;  %v1818_v4 = vld [vmem:[#allocation7 + $0x40] sm:$0xff] }
  0x4b   : > { %849 = vperm.xlu2 %2893, %v511_v0   ;;  %1493 = vperm.xlu1 %2892, %v511_v0  }
  0x4c   : > { %2894 = vset.pattern.permute.xlu0 %v3121_v2 }
  0x92   : > { %v1172_v6 = vpop.permute.xlu2 %1171 }
  0x93   : > { %v1175_v11 = vmul.f32 %v3321_v7, %v1172_v6 }
  0x95   : > { %v3334_v13 = vadd.f32 %v3326_v9, %v1175_v11  ;;  %v1828_v11 = vld [vmem:[#allocation7 + $0x90] sm:$0xff] }
  0x96   : > { %1950 = vmatpush.msra.mxu0 %v1828_v11 }
  0x97   : > { %v1336_v16 = vand.u32 2139095040, %v3334_v13 }
  0x99   : > { %v1337_v18 = vshrl.u32 %v1336_v16, 23  ;;  %v1890_v16 = vld [vmem:[#allocation7 + $0x280] sm:$0xff] }
  0x9a   : > { %1997 = vmatpush.msra.mxu2 %v1890_v16 }
  0x9b   : > { %v2756_v28 = vadd.s32 4294967169, %v1337_v18  ;;  %v1860_v18 = vld [vmem:[#allocation7 + $0x190] sm:$0xff] }
  0x9c   : > { %v522_v8 = vpop.permute.xlu2 %521  ;;  %1973 = vmatpush.msra.mxu1 %v1860_v18 }
  0x9d   : > { %v528_v10 = vmul.f32 %v3321_v7, %v522_v8  ;;  %v1343_v44 = vadd.s32 1, %v2756_v28 }
  0x9e   : > { %1974 = vmatpush.msra.mxu1 %v1858_v26 }
  0x9f   : > { %v3331_v12 = vadd.f32 %v3326_v9, %v528_v10  ;;  %vm1344_vm0 = vcmp.gt.s32.totalorder %v1343_v44, 0  ;;  %v1926_v10 = vld [vmem:[#allocation7 + $0x3a0] sm:$0xff] }
  0xa0   : > { %2018 = vmatpush.msra.mxu3 %v1926_v10  ;;  %1975 = vmatpush.msra.mxu1 %v1856_v35  ;;  %v3130_v10 = vmov 1326507024  }
  0xa1   : > { %v692_v21 = vand.u32 2139095040, %v3331_v12 }
  0xa3   : > { %v693_v30 = vshrl.u32 %v692_v21, 23  ;;  %v1345_v21 = vsel %vm1344_vm0, %v1343_v44, 0 }
  0xa4   : > { %v3380_v38 = vand.u32 31, %v1345_v21 }
  0xa5   : > { %v850_v14 = vpop.permute.xlu2 %849  ;;  %v2744_v47 = vadd.s32 4294967169, %v693_v30  ;;  %v1824_v30 = vld [vmem:[#allocation7 + $0x70] sm:$0xff] }
  0xa6   : > { %v853_v15 = vmul.f32 %v3321_v7, %v850_v14  ;;  %v3420_v16 = vsub.s32 32, %v3380_v38 }
  0xa7   : > { %v699_v0 = vadd.s32 1, %v2744_v47  ;;  %v1884_v47 = vld [vmem:[#allocation7 + $0x250] sm:$0xff] }
  0xa8   : > { %v3339_v17 = vadd.f32 %v3326_v9, %v853_v15 }
  0xa9   : > { %vm700_vm2 = vcmp.gt.s32.totalorder %v699_v0, 0 }
  0xaa   : > { %v1014_v1 = vand.u32 2139095040, %v3339_v17 }
  0xab   : > { %v1490_v19 = vpop.permute.xlu1 %1489  ;;  %v1168_v20 = vpop.permute.xlu0 %1167 }
  0xac   : > { %v1496_v22 = vmul.f32 %v3321_v7, %v1490_v19  ;;  %v1174_v23 = vmul.f32 %v3321_v7, %v1168_v20  ;;  %v1924_v19 = vld [vmem:[#allocation7 + $0x390] sm:$0xff]  ;;  %v1826_v20 = vld [vmem:[#allocation7 + $0x80] sm:$0xff]  ;;  %v1015_v27 = vshrl.u32 %v1014_v1, 23 }
  0xad   : > { %2019 = vmatpush.msra.mxu3 %v1924_v19  ;;  %1951 = vmatpush.msra.mxu0 %v1826_v20  ;;  %v1880_v19 = vld [vmem:[#allocation7 + $0x230] sm:$0xff]  ;;  %v1850_v20 = vld [vmem:[#allocation7 + $0x140] sm:$0xff] }
  0xae   : > { %v3345_v24 = vadd.f32 %v3326_v9, %v1496_v22  ;;  %v3348_v25 = vadd.f32 %v3326_v9, %v1174_v23  ;;  %v1888_v23 = vld [vmem:[#allocation7 + $0x270] sm:$0xff] }
  0xaf   : > { %1998 = vmatpush.msra.mxu2 %v1888_v23  ;;  %2020 = vmatpush.msra.mxu3 %v1922_v29  ;;  %v1816_v29 = vld [vmem:[#allocation7 + $0x30] sm:$0xff] }
  0xb0   : > { %v1503_v31 = vand.u32 2139095040, %v3345_v24  ;;  %v1181_v32 = vand.u32 2139095040, %v3348_v25  ;;  %v1178_v14 = vand.u32 2147483647, %v3348_v25  ;;  %1952 = vmatpush.msra.mxu0 %v1824_v30  ;;  %v1500_v35 = vand.u32 2147483647, %v3345_v24 }
  0xb1   : > { %1999 = vmatpush.msra.mxu2 %v1886_v34 }
  0xb2   : > { %v1504_v39 = vshrl.u32 %v1503_v31, 23  ;;  %v1182_v40 = vshrl.u32 %v1181_v32, 23  ;;  %v3373_v31 = vand.u32 8388607, %v1178_v14  ;;  %v3375_v32 = vshrl.u32 %v1345_v21, 5  ;;  %1953 = vmatpush.msra.mxu0 %v1822_v41  ;;  %v1814_v41 = vld [vmem:[#allocation7 + $0x20] sm:$0xff] }
  0xb3   : > { %2000 = vmatpush.msra.mxu2 %v1884_v47  ;;  %v1846_v47 = vld [vmem:[#allocation7 + $0x120] sm:$0xff] }
  0xb4   : > { %v2753_v48 = vadd.s32 4294967169, %v1182_v40  ;;  %v846_v49 = vpop.permute.xlu1 %845  ;;  %v2759_v52 = vadd.s32 4294967169, %v1504_v39  ;;  %v701_v39 = vsel %vm700_vm2, %v699_v0, 0  ;;  %v1920_v40 = vld [vmem:[#allocation7 + $0x370] sm:$0xff]  ;;  %v1186_v56 = vor.u32 8388608, %v3373_v31  ;;  %v1878_v31 = vld [vmem:[#allocation7 + $0x220] sm:$0xff] }
  0xb5   : > { %v852_v53 = vmul.f32 %v3321_v7, %v846_v49  ;;  %v517_v54 = vpop.permute.xlu0 %516  ;;  %v3128_v49 = vmov 2102212464   ;;  %2021 = vmatpush.msra.mxu3 %v1920_v40  ;;  %v3422_v18 = vshrl.u32 %v701_v39, 5  ;;  %v3424_v26 = vand.u32 31, %v701_v39  ;;  %2001 = vmatpush.msra.mxu2 %v1882_v59  ;;  %v1912_v40 = vld [vmem:[#allocation7 + $0x330] sm:$0xff] }
  0xb6   : > { %v1188_v57 = vadd.s32 1, %v2753_v48  ;;  %v527_v58 = vmul.f32 %v3321_v7, %v517_v54  ;;  %v1510_v6 = vadd.s32 1, %v2759_v52  ;;  %v1854_v48 = vld [vmem:[#allocation7 + $0x160] sm:$0xff]  ;;  %v3429_v34 = vshll.u32 %v1186_v56, 8 }
  0xb7   : > { %v3355_v61 = vadd.f32 %v3326_v9, %v852_v53  ;;  %v2750_v53 = vadd.s32 4294967169, %v1015_v27  ;;  %1976 = vmatpush.msra.mxu1 %v1854_v48  ;;  %2022 = vmatpush.msra.mxu3 %v1918_v55  ;;  %v1812_v55 = vld [vmem:[#allocation7 + $0x10] sm:$0xff]  ;;  %v1874_v56 = vld [vmem:[#allocation7 + $0x200] sm:$0xff] }
  0xb8   : > { %vm1189_vm1 = vcmp.gt.s32.totalorder %v1188_v57, 0  ;;  %v3359_v2 = vadd.f32 %v3326_v9, %v527_v58  ;;  %vm1511_vm3 = vcmp.gt.s32.totalorder %v1510_v6, 0  ;;  %2002 = vmatpush.msra.mxu2 %v1880_v19 }
  0xb9   : > { %v3361_v8 = vsel %vm1189_vm1, %v1188_v57, 0  ;;  %v3388_v45 = vsel %vm1511_vm3, %v1510_v6, 0  ;;  %v3426_v27 = vadd.s32 1, %v2750_v53  ;;  %1977 = vmatpush.msra.mxu1 %v1852_v60  ;;  %2023 = vmatpush.msra.mxu3 %v1916_v3  ;;  %v859_v39 = vand.u32 2139095040, %v3355_v61  ;;  %v1905_v3 = vld [vmem:[#allocation7 + $0x2f8] sm:$0xff] }
  0xba   : > { %v3365_v15 = vand.u32 31, %v3361_v8  ;;  %v537_v54 = vand.u32 2139095040, %v3359_v2  ;;  %v3402_v58 = vshrl.u32 %v3361_v8, 5  ;;  %v3411_v1 = vand.u32 31, %v3388_v45  ;;  %2003 = vmatpush.msra.mxu2 %v1878_v31 }
  0xbb   : > { %1978 = vmatpush.msra.mxu1 %v1850_v20  ;;  %v3472_v31 = vshrl.u32 %v859_v39, 23  ;;  %vm1022_vm1 = vcmp.gt.s32.totalorder %v3426_v27, 0  ;;  %vm1180_vm3 = vcmp.lt.s32.totalorder %v3348_v25, 0 }
  0xbc   : > { %v3369_v22 = vsub.s32 32, %v3365_v15  ;;  %v1198_v57 = vshll.u32 %v3125_v36, %v3365_v15  ;;  %v1201_v63 = vshll.u32 %v3127_v43, %v3365_v15  ;;  %v1204_v0 = vshll.u32 %v3128_v49, %v3365_v15 }
  0xbd   : > { %v1494_v28 = vpop.permute.xlu1 %1493  ;;  %v1207_v8 = vshll.u32 %v3129_v51, %v3365_v15  ;;  %vm1210_vm4 = vcmp.lt.s32.totalorder %v3402_v58, 1  ;;  %vm1213_vm5 = vcmp.lt.s32.totalorder %v3402_v58, 4  ;;  %vm1212_vm6 = vcmp.lt.s32.totalorder %v3402_v58, 3 }
  0xbe   : > { %v1497_v33 = vmul.f32 %v3321_v7, %v1494_v28  ;;  %v1196_v37 = vshrl.u32 %v3125_v36, %v3369_v22  ;;  %v1195_v7 = vshll.u32 %v3126_v42, %v3365_v15  ;;  %v1199_v44 = vshrl.u32 %v3127_v43, %v3369_v22  ;;  %v1914_v28 = vld [vmem:[#allocation7 + $0x340] sm:$0xff] }
  0xbf   : > { %v1202_v50 = vshrl.u32 %v3128_v49, %v3369_v22  ;;  %v1205_v52 = vshrl.u32 %v3129_v51, %v3369_v22  ;;  %v1208_v11 = vshrl.u32 %v3130_v10, %v3369_v22  ;;  %v538_v15 = vshrl.u32 %v537_v54, 23  ;;  %2024 = vmatpush.msra.mxu3 %v1914_v28  ;;  %v1910_v54 = vld [vmem:[#allocation7 + $0x320] sm:$0xff] }
  0xc0   : > { %v3391_v46 = vadd.f32 %v3326_v9, %v1497_v33  ;;  %v1820_v9 = vld [vmem:[#allocation7 + $0x50] sm:$0xff]  ;;  %v3404_v62 = vor.u32 %v1196_v37, %v1195_v7  ;;  %v3413_v6 = vor.u32 %v1199_v44, %v1198_v57  ;;  %v3433_v37 = vsub.s32 32, %v3411_v1 }
  0xc1   : > { %1954 = vmatpush.msra.mxu0 %v1820_v9  ;;  %v1203_v21 = vor.u32 %v1202_v50, %v1201_v63  ;;  %v1206_v23 = vor.u32 %v1205_v52, %v1204_v0  ;;  %v1209_v30 = vor.u32 %v1208_v11, %v1207_v8  ;;  %v1848_v33 = vld [vmem:[#allocation7 + $0x130] sm:$0xff]  ;;  %v1194_v48 = vshrl.u32 %v3126_v42, %v3369_v22 }
  0xc2   : > { %v1218_v7 = vsel %vm1210_vm4, %v3404_v62, %v3413_v6  ;;  %v1876_v44 = vld [vmem:[#allocation7 + $0x210] sm:$0xff]  ;;  %v2741_v53 = vadd.s32 4294967169, %v538_v15  ;;  %1979 = vmatpush.msra.mxu1 %v1848_v33  ;;  %vm1211_vm7 = vcmp.lt.s32.totalorder %v3402_v58, 2  ;;  %2025 = vmatpush.msra.mxu3 %v1912_v40  ;;  %v1227_v0 = vand.u32 65535, %v3429_v34  ;;  %v1810_v15 = vld [vmem:[#allocation7] sm:$0xff]  ;;  %v1903_v33 = vld [vmem:[#allocation7 + $0x2e8] sm:$0xff] }
  0xc3   : > { %1955 = vmatpush.msra.mxu0 %v1818_v4  ;;  %v1219_v50 = vsel %vm1213_vm5, %v1206_v23, 920167782  ;;  %v1222_v52 = vsel %vm1210_vm4, %v3413_v6, %v1203_v21  ;;  %v1223_v22 = vsel %vm1213_vm5, %v1209_v30, 1326507024  ;;  %v1844_v57 = vld [vmem:[#allocation7 + $0x110] sm:$0xff]  ;;  %2004 = vmatpush.msra.mxu2 %v1876_v44  ;;  %v1228_v11 = vshrl.u32 %v3429_v34, 16 }
  0xc4   : > { %v1220_v9 = vsel %vm1212_vm6, %v1203_v21, %v1219_v50  ;;  %v1215_v59 = vsel %vm1213_vm5, %v1203_v21, 2102212464  ;;  %v1224_v63 = vsel %vm1212_vm6, %v1206_v23, %v1223_v22  ;;  %1980 = vmatpush.msra.mxu1 %v1846_v47  ;;  %v1908_v4 = vld [vmem:[#allocation7 + $0x310] sm:$0xff]  ;;  %v3465_v21 = vshrl.u32 %v3388_v45, 5  ;;  %2026 = vmatpush.msra.mxu3 %v1910_v54  ;;  %v1842_v23 = vld [vmem:[#allocation7 + $0x100] sm:$0xff]  ;;  %v1873_v47 = vld [vmem:[#allocation7 + $0x1f8] sm:$0xff] }
  0xc5   : > { %1956 = vmatpush.msra.mxu0 %v1816_v29  ;;  %v1221_v60 = vsel %vm1211_vm7, %v1218_v7, %v1220_v9  ;;  %v1225_v8 = vsel %vm1211_vm7, %v1222_v52, %v1224_v63  ;;  %v3470_v28 = vsel %vm1210_vm4, %v1194_v48, %v3404_v62  ;;  %2005 = vmatpush.msra.mxu2 %v1874_v56  ;;  %v1906_v40 = vld [vmem:[#allocation7 + $0x300] sm:$0xff]  ;;  %v3480_v44 = vadd.s32 1, %v2741_v53  ;;  %v1841_v62 = vld [vmem:[#allocation7 + $0xf8] sm:$0xff]  ;;  %v1839_v56 = vld [vmem:[#allocation7 + $0xe8] sm:$0xff] }
  0xc6   : > { %v1251_v19 = vand.u32 65535, %v1221_v60  ;;  %v1252_v20 = vshrl.u32 %v1221_v60, 16  ;;  %v1229_v29 = vand.u32 65535, %v1225_v8  ;;  %v1230_v30 = vshrl.u32 %v1225_v8, 16  ;;  %1981 = vmatpush.msra.mxu1 %v1844_v57  ;;  %2027 = vmatpush.msra.mxu3 %v1908_v4  ;;  %v1901_v52 = vld [vmem:[#allocation7 + $0x2d8] sm:$0xff]  ;;  %v1935_v4 = vld [vmem:[#allocation7 + $0x3e8] sm:$0xff] }
  0xc7   : > { %1957 = vmatpush.msra.mxu0 %v1814_v41  ;;  %v1517_v7 = vshll.u32 %v3126_v42, %v3411_v1  ;;  %2082 = vmatpush.msrb.mxu2 %v1905_v3  ;;  %v3485_v39 = vsel %vm1212_vm6, %v3413_v6, %v1215_v59  ;;  %v1937_v54 = vld [vmem:[#allocation7 + $0x3f8] sm:$0xff]  ;;  %v1518_v22 = vshrl.u32 %v3125_v36, %v3433_v37  ;;  %v1871_v6 = vld [vmem:[#allocation7 + $0x1e8] sm:$0xff]  ;;  %vm1532_vm12 = vcmp.lt.s32.totalorder %v3465_v21, 1 }
  0xc8   : > { %v3474_v41 = vmul.u32 %v1252_v20, %v1227_v0  ;;  %v3476_v45 = vmul.u32 %v1251_v19, %v1228_v11  ;;  %v3487_v48 = vmul.u32 %v1230_v30, %v1227_v0  ;;  %v3489_v50 = vmul.u32 %v1229_v29, %v1228_v11  ;;  %1982 = vmatpush.msra.mxu1 %v1842_v23  ;;  %v1899_v3 = vld [vmem:[#allocation7 + $0x2c8] sm:$0xff]  ;;  %v1869_v23 = vld [vmem:[#allocation7 + $0x1d8] sm:$0xff] }
  0xc9   : > { %1958 = vmatpush.msra.mxu0 %v1812_v55  ;;  %v1231_v55 = vmul.u32 %v1229_v29, %v1227_v0  ;;  %v1253_v53 = vmul.u32 %v1251_v19, %v1227_v0  ;;  %2083 = vmatpush.msrb.mxu2 %v1903_v33  ;;  %v1234_v57 = vmul.u32 %v1230_v30, %v1228_v11  ;;  %v1897_v30 = vld [vmem:[#allocation7 + $0x2b8] sm:$0xff]  ;;  %vm1535_vm13 = vcmp.lt.s32.totalorder %v3465_v21, 4 }
  0xca   : > { %v1257_v9 = vshll.u32 %v3474_v41, 16  ;;  %2028 = vmatpush.msra.mxu3 %v1906_v40  ;;  %v1235_v59 = vshll.u32 %v3487_v48, 16  ;;  %v1256_v60 = vmul.u32 %v1252_v20, %v1228_v11  ;;  %v1258_v63 = vshrl.u32 %v3474_v41, 16  ;;  %2059 = vmatpush.msrb.mxu1 %v1873_v47  ;;  %v1933_v33 = vld [vmem:[#allocation7 + $0x3d8] sm:$0xff] }
  0xcb   : > { %1959 = vmatpush.msra.mxu0 %v1810_v15  ;;  %v1236_v0 = vshrl.u32 %v3487_v48, 16  ;;  %v1259_v8 = vshll.u32 %v3476_v45, 16  ;;  %2084 = vmatpush.msrb.mxu2 %v1901_v52  ;;  %v1837_v15 = vld [vmem:[#allocation7 + $0xd8] sm:$0xff]  ;;  %v1237_v29 = vshll.u32 %v3489_v50, 16  ;;  %v1238_v40 = vshrl.u32 %v3489_v50, 16 }
  0xcc   : > { %vm1261_vm8 = vc.u32 %v1253_v53, %v1257_v9  ;;  %v1263_v19 = vadd.s32 %v1257_v9, %v1253_v53  ;;  %2105 = vmatpush.msrb.mxu3 %v1937_v54  ;;  %vm1239_vm9 = vc.u32 %v1231_v55, %v1235_v59  ;;  %v1241_v11 = vadd.s32 %v1235_v59, %v1231_v55  ;;  %v1895_v54 = vld [vmem:[#allocation7 + $0x2a8] sm:$0xff]  ;;  %v1893_v59 = vld [vmem:[#allocation7 + $0x298] sm:$0xff] }
  0xcd   : > { %2036 = vmatpush.msrb.mxu0 %v1841_v62  ;;  %v1262_v20 = vsel %vm1261_vm8, 1, %v3124_v5  ;;  %2060 = vmatpush.msrb.mxu1 %v1871_v6  ;;  %v1240_v41 = vsel %vm1239_vm9, 1, %v3124_v5  ;;  %v1260_v48 = vshrl.u32 %v3476_v45, 16  ;;  %v3505_v9 = vor.u32 %v1518_v22, %v1517_v7 }
  0xce   : > { %v1264_v62 = vadd.s32 %v1262_v20, %v1256_v60  ;;  %vm1265_vm10 = vc.u32 %v1263_v19, %v1259_v8  ;;  %2085 = vmatpush.msrb.mxu2 %v1899_v3  ;;  %2106 = vmatpush.msrb.mxu3 %v1935_v4  ;;  %v1242_v47 = vadd.s32 %v1240_v41, %v1234_v57  ;;  %v1507_v6 = vand.u32 8388607, %v1500_v35 }
  0xcf   : > { %2037 = vmatpush.msrb.mxu0 %v1839_v56  ;;  %vm1243_vm11 = vc.u32 %v1241_v11, %v1237_v29  ;;  %v1266_v52 = vsel %vm1265_vm10, 1, %v3124_v5  ;;  %2061 = vmatpush.msrb.mxu1 %v1869_v23  ;;  %v1520_v50 = vshll.u32 %v3125_v36, %v3411_v1  ;;  %v1521_v45 = vshrl.u32 %v3127_v43, %v3433_v37  ;;  %v1891_v11 = vld [vmem:[#allocation7 + $0x288] sm:$0xff] }
  0xd0   : > { %v1244_v55 = vsel %vm1243_vm11, 1, %v3124_v5  ;;  %v1268_v53 = vadd.s32 %v1266_v52, %v1264_v62  ;;  %2086 = vmatpush.msrb.mxu2 %v1897_v30  ;;  %2107 = vmatpush.msrb.mxu3 %v1933_v33  ;;  %v1523_v57 = vshll.u32 %v3127_v43, %v3411_v1  ;;  %v1524_v7 = vshrl.u32 %v3128_v49, %v3433_v37 }
  0xd1   : > { %2038 = vmatpush.msrb.mxu0 %v1837_v15  ;;  %v1246_v56 = vadd.s32 %v1244_v55, %v1242_v47  ;;  %v1526_v22 = vshll.u32 %v3128_v49, %v3411_v1  ;;  %v1527_v3 = vshrl.u32 %v3129_v51, %v3433_v37  ;;  %v1522_v15 = vor.u32 %v1521_v45, %v1520_v50 }
  0xd2   : > { %v1269_v60 = vadd.s32 %v1268_v53, %v1258_v63  ;;  %2087 = vmatpush.msrb.mxu2 %v1895_v54  ;;  %v1529_v23 = vshll.u32 %v3129_v51, %v3411_v1  ;;  %v1530_v29 = vshrl.u32 %v3130_v10, %v3433_v37  ;;  %v1217_v63 = vsel %vm1211_vm7, %v3470_v28, %v3485_v39 }
  0xd3   : > { %v1247_v4 = vadd.s32 %v1246_v56, %v1236_v0  ;;  %v1525_v30 = vor.u32 %v1524_v7, %v1523_v57  ;;  %v1528_v33 = vor.u32 %v1527_v3, %v1526_v22  ;;  %v1267_v62 = vadd.s32 %v1263_v19, %v1259_v8 }
  0xd4   : > { %v1270_v20 = vadd.s32 %v1269_v60, %v1260_v48  ;;  %2088 = vmatpush.msrb.mxu2 %v1893_v59  ;;  %v1531_v0 = vor.u32 %v1530_v29, %v1529_v23  ;;  %v1508_v1 = vor.u32 8388608, %v1507_v6  ;;  %v1540_v52 = vsel %vm1532_vm12, %v3505_v9, %v1522_v15 }
  0xd5   : > { %v1248_v41 = vadd.s32 %v1247_v4, %v1238_v40  ;;  %v1271_v58 = vmul.u32 %v3429_v34, %v1217_v63  ;;  %vm1534_vm15 = vcmp.lt.s32.totalorder %v3465_v21, 3  ;;  %v1541_v28 = vsel %vm1535_vm13, %v1528_v33, 920167782 }
  0xd6   : > { %v1274_v47 = vadd.s32 1, %v1270_v20  ;;  %2089 = vmatpush.msrb.mxu2 %v1891_v11  ;;  %vm1533_vm0 = vcmp.lt.s32.totalorder %v3465_v21, 2  ;;  %v1542_v8 = vsel %vm1534_vm15, %v1525_v30, %v1541_v28  ;;  %v1544_v19 = vsel %vm1532_vm12, %v1522_v15, %v1525_v30 }
  0xd7   : > { %vm1273_vm14 = vc.u32 %v1248_v41, %v1267_v62  ;;  %v3544_v40 = vsub.s32 32, %v3424_v26  ;;  %v1543_v34 = vsel %vm1533_vm0, %v1540_v52, %v1542_v8  ;;  %v1545_v54 = vsel %vm1535_vm13, %v1531_v0, 1326507024 }
  0xd8   : > { %v1275_v39 = vsel %vm1273_vm14, %v1274_v47, %v1270_v20  ;;  %v2747_v55 = vadd.s32 4294967169, %v3472_v31  ;;  %v1546_v53 = vsel %vm1534_vm15, %v1528_v33, %v1545_v54  ;;  %v3554_v50 = vshll.u32 %v1508_v1, 8 }
  0xd9   : > { %v1276_v48 = vadd.s32 %v1275_v39, %v1271_v58  ;;  %vm545_vm2 = vcmp.gt.s32.totalorder %v3480_v44, 0  ;;  %v1547_v6 = vsel %vm1533_vm0, %v1544_v19, %v1546_v53  ;;  %v1574_v45 = vshrl.u32 %v1543_v34, 16 }
  0xda   : > { %v1549_v57 = vand.u32 65535, %v3554_v50  ;;  %v1550_v59 = vshrl.u32 %v3554_v50, 16  ;;  %v1551_v60 = vand.u32 65535, %v1547_v6  ;;  %v1552_v7 = vshrl.u32 %v1547_v6, 16 }
  0xdb   : > { %v1277_v56 = vadd.s32 536870912, %v1276_v48  ;;  %v3562_v31 = vsel %vm1022_vm1, %v3426_v27, 0  ;;  %v1573_v3 = vand.u32 65535, %v1543_v34  ;;  %v1333_v4 = vand.u32 2147483647, %v3334_v13 }
  0xdc   : > { %v1516_v23 = vshrl.u32 %v3126_v42, %v3433_v37  ;;  %v1537_v29 = vsel %vm1535_vm13, %v1525_v30, 2102212464  ;;  %v1554_v11 = vmul.u32 %v1552_v7, %v1549_v57  ;;  %v1555_v63 = vmul.u32 %v1551_v60, %v1550_v59 }
  0xdd   : > { %v1278_v22 = vshrl.u32 %v1277_v56, 30  ;;  %v3569_v20 = vadd.s32 1, %v2747_v55  ;;  %v3574_v33 = vsel %vm545_vm2, %v3480_v44, 0  ;;  %v1576_v0 = vmul.u32 %v1574_v45, %v1549_v57 }
  0xde   : > { %v1272_v47 = vadd.s32 %v1267_v62, %v1248_v41  ;;  %v1536_v37 = vsel %vm1532_vm12, %v1516_v23, %v3505_v9  ;;  %v1553_v1 = vmul.u32 %v1551_v60, %v1549_v57  ;;  %v1557_v30 = vshll.u32 %v1554_v11, 16 }
  0xdf   : > { %v1279_v27 = vshll.u32 %v1278_v22, 30  ;;  %v1538_v58 = vsel %vm1534_vm15, %v1522_v15, %v1537_v29  ;;  %v1556_v28 = vmul.u32 %v1552_v7, %v1550_v59  ;;  %v1577_v39 = vmul.u32 %v1573_v3, %v1550_v59 }
  0xe0   : > { %v1559_v8 = vshll.u32 %v1555_v63, 16  ;;  %vm1561_vm4 = vc.u32 %v1553_v1, %v1557_v30  ;;  %v1563_v44 = vadd.s32 %v1557_v30, %v1553_v1  ;;  %v1579_v19 = vshll.u32 %v1576_v0, 16 }
  0xe1   : > { %v1280_v52 = vsub.s32 %v1276_v48, %v1279_v27  ;;  %v1302_v54 = vsub.s32 4, %v1278_v22  ;;  %v1562_v41 = vsel %vm1561_vm4, 1, %v3124_v5  ;;  %v1558_v62 = vshrl.u32 %v1554_v11, 16 }
  0xe2   : > { %v1564_v55 = vadd.s32 %v1562_v41, %v1556_v28  ;;  %vm1565_vm6 = vc.u32 %v1563_v44, %v1559_v8  ;;  %v1575_v9 = vmul.u32 %v1573_v3, %v1549_v57  ;;  %v1578_v56 = vmul.u32 %v1574_v45, %v1550_v59 }
  0xe3   : > { %vm1281_vm5 = vcmp.lt.s32.totalorder %v1280_v52, 0  ;;  %v1282_v34 = vsub.s32 0, %v1280_v52  ;;  %v1566_v48 = vsel %vm1565_vm6, 1, %v3124_v5  ;;  %v1581_v15 = vshll.u32 %v1577_v39, 16 }
  0xe4   : > { %v1568_v60 = vadd.s32 %v1566_v48, %v1564_v55  ;;  %vm1583_vm7 = vc.u32 %v1575_v9, %v1579_v19  ;;  %v1585_v7 = vadd.s32 %v1579_v19, %v1575_v9  ;;  %v1539_v23 = vsel %vm1533_vm0, %v1536_v37, %v1538_v58 }
  0xe5   : > { %v1283_v53 = vsel %vm1281_vm5, %v1282_v34, %v1280_v52  ;;  %v1560_v29 = vshrl.u32 %v1555_v63, 16  ;;  %v1584_v27 = vsel %vm1583_vm7, 1, %v3124_v5  ;;  %v3589_v11 = vand.u32 8388607, %v1333_v4 }
  0xe6   : > { %v1284_v6 = vclz %v1283_v53  ;;  %v1569_v3 = vadd.s32 %v1568_v60, %v1558_v62  ;;  %v1586_v1 = vadd.s32 %v1584_v27, %v1578_v56  ;;  %vm1587_vm8 = vc.u32 %v1585_v7, %v1581_v15 }
  0xe7   : > { %vm3593_vm9 = vcmp.le.f32.partialorder %v1178_v14, 0.7853982  ;;  %v1303_v21 = vsel %vm1180_vm3, %v1302_v54, %v1278_v22  ;;  %v1580_v59 = vshrl.u32 %v1576_v0, 16  ;;  %v1582_v63 = vshrl.u32 %v1577_v39, 16 }
  0xe8   : > { %v2754_v57 = vadd.s32 4294967294, %v1284_v6  ;;  %v1588_v37 = vsel %vm1587_vm8, 1, %v3124_v5  ;;  %v3600_v30 = vadd.s32 %v1569_v3, %v1560_v29  ;;  %v3602_v58 = vadd.s32 %v1585_v7, %v1581_v15 }
  0xe9   : > { %v1590_v28 = vadd.s32 %v1588_v37, %v1586_v1  ;;  %v1350_v14 = vshll.u32 %v3126_v42, %v3380_v38  ;;  %v1353_v44 = vshll.u32 %v3125_v36, %v3380_v38  ;;  %v1354_v22 = vshrl.u32 %v3127_v43, %v3420_v16 }
  0xea   : > { %vm2755_vm10 = vcmp.lt.s32.totalorder %v2754_v57, 0  ;;  %v1356_v34 = vshll.u32 %v3127_v43, %v3380_v38  ;;  %vm1595_vm11 = vc.u32 %v3600_v30, %v3602_v58  ;;  %v1351_v41 = vshrl.u32 %v3125_v36, %v3420_v16 }
  0xeb   : > { %v1287_v8 = vsel %vm2755_vm10, 0, %v2754_v57  ;;  %v1591_v19 = vadd.s32 %v1590_v28, %v1580_v59  ;;  %v3616_v62 = vor.u32 %v1354_v22, %v1353_v44  ;;  %v1357_v48 = vshrl.u32 %v3128_v49, %v3420_v16 }
  0xec   : > { %v1288_v0 = vsub.s32 32, %v1287_v8  ;;  %v1292_v39 = vsub.s32 4294967266, %v1287_v8  ;;  %v1289_v54 = vshll.u32 %v1280_v52, %v1287_v8  ;;  %v1359_v56 = vshll.u32 %v3128_v49, %v3380_v38 }
  0xed   : > { %v1592_v53 = vadd.s32 %v1591_v19, %v1582_v63  ;;  %v1360_v52 = vshrl.u32 %v3129_v51, %v3420_v16  ;;  %v1362_v15 = vshll.u32 %v3129_v51, %v3380_v38  ;;  %v1363_v6 = vshrl.u32 %v3130_v10, %v3420_v16 }
  0xee   : > { %v1290_v55 = vshrl.u32 %v1272_v47, %v1288_v0  ;;  %v1293_v9 = vadd.s32 127, %v1292_v39  ;;  %v1358_v29 = vor.u32 %v1357_v48, %v1356_v34  ;;  %v1593_v27 = vmul.u32 %v3554_v50, %v1539_v23 }
  0xef   : > { %v1596_v47 = vadd.s32 1, %v1592_v53  ;;  %v1361_v57 = vor.u32 %v1360_v52, %v1359_v56  ;;  %v1364_v3 = vor.u32 %v1363_v6, %v1362_v15  ;;  %vm1365_vm12 = vcmp.lt.s32.totalorder %v3375_v32, 1 }
  0xf0   : > { %v1291_v60 = vor.u32 %v1290_v55, %v1289_v54  ;;  %v1294_v7 = vshll.u32 %v1293_v9, 23  ;;  %v1305_v59 = vsel %vm3593_vm9, 0, %v1303_v21  ;;  %v1341_v63 = vor.u32 8388608, %v3589_v11 }
  0xf1   : > { %v1597_v38 = vsel %vm1595_vm11, %v1596_v47, %v1592_v53  ;;  %v1352_v28 = vor.u32 %v1351_v41, %v1350_v14  ;;  %vm1367_vm13 = vcmp.lt.s32.totalorder %v3375_v32, 3  ;;  %vm1368_vm14 = vcmp.lt.s32.totalorder %v3375_v32, 4 }
  0xf2   : > { %v1295_v1 = vor.u32 4788187, %v1294_v7  ;;  %v1598_v37 = vadd.s32 %v1597_v38, %v1593_v27  ;;  %v1298_v23 = vcvt.s32.f32 %v1291_v60  ;;  %vm1366_vm15 = vcmp.lt.s32.totalorder %v3375_v32, 2 }
  0xf3   : > { %v1377_v21 = vsel %vm1365_vm12, %v3616_v62, %v1358_v29  ;;  %vm867_vm0 = vcmp.gt.s32.totalorder %v3569_v20, 0  ;;  %v1374_v11 = vsel %vm1368_vm14, %v1361_v57, 920167782  ;;  %v1378_v14 = vsel %vm1368_vm14, %v1364_v3, 1326507024 }
  0xf4   : > { %v1296_v50 = vand.u32 2147483647, %v1295_v1  ;;  %v1599_v8 = vadd.s32 536870912, %v1598_v37  ;;  %v3648_v44 = vand.u32 31, %v3574_v33  ;;  %v1322_v0 = vadd.s32 3, %v1305_v59 }
  0xf5   : > { %v1379_v39 = vsel %vm1367_vm13, %v1361_v57, %v1378_v14  ;;  %v1373_v34 = vsel %vm1365_vm12, %v1352_v28, %v3616_v62  ;;  %v3657_v41 = vshll.u32 %v1341_v63, 8  ;;  %vm1502_vm1 = vcmp.lt.s32.totalorder %v3345_v24, 0 }
  0xf6   : > { %v1299_v22 = vmul.f32 %v1298_v23, %v1296_v50  ;;  %v1600_v19 = vshrl.u32 %v1599_v8, 30  ;;  %v1380_v54 = vsel %vm1366_vm15, %v1377_v21, %v1379_v39  ;;  %v1375_v9 = vsel %vm1367_vm13, %v1358_v29, %v1374_v11 }
  0xf7   : > { %v1384_v53 = vand.u32 65535, %v1380_v54  ;;  %v1385_v48 = vshrl.u32 %v1380_v54, 16  ;;  %v3665_v56 = vsel %vm867_vm0, %v3569_v20, 0  ;;  %v1382_v15 = vand.u32 65535, %v3657_v41 }
  0xf8   : > { %v1300_v55 = vxor.u32 2147483648, %v1299_v22  ;;  %v1601_v52 = vshll.u32 %v1600_v19, 30  ;;  %v1383_v6 = vshrl.u32 %v3657_v41, 16  ;;  %v3670_v60 = vsub.s32 32, %v3648_v44 }
  0xf9   : > { %v3674_v47 = vand.u32 3, %v1322_v0  ;;  %v1349_v27 = vshrl.u32 %v3126_v42, %v3420_v16  ;;  %v1594_v57 = vadd.s32 %v3602_v58, %v3600_v30  ;;  %v1376_v1 = vsel %vm1366_vm15, %v1373_v34, %v1375_v9 }
  0xfa   : > { %v1301_v7 = vsel %vm1180_vm3, %v1300_v55, %v1299_v22  ;;  %v3685_v3 = vsub.s32 %v1598_v37, %v1601_v52  ;;  %v1386_v38 = vmul.u32 %v1384_v53, %v1382_v15  ;;  %v1387_v63 = vmul.u32 %v1385_v48, %v1382_v15 }
  0xfb   : > { %v3681_v20 = vsel %vm3593_vm9, %v3348_v25, %v1301_v7  ;;  %v3691_v50 = vmul.u32 %v1384_v53, %v1383_v6  ;;  %v1624_v45 = vsub.s32 4, %v1600_v19  ;;  %v1370_v30 = vsel %vm1368_vm14, %v1358_v29, 2102212464 }
  0xfc   : > { %v1306_v59 = vmul.f32 %v3681_v20, %v3681_v20  ;;  %vm1603_vm2 = vcmp.lt.s32.totalorder %v3685_v3, 0  ;;  %v1604_v16 = vsub.s32 0, %v3685_v3  ;;  %v1390_v23 = vshll.u32 %v1387_v63, 16 }
  0xfd   : > { %v1406_v21 = vand.u32 65535, %v1376_v1  ;;  %v1389_v11 = vmul.u32 %v1385_v48, %v1383_v6  ;;  %v1392_v14 = vshll.u32 %v3691_v50, 16  ;;  %v1407_v22 = vshrl.u32 %v1376_v1, 16 }
  0xfe   : > { %v1307_v58 = vmul.f32 -0.001358992, %v1306_v59  ;;  %v1314_v37 = vmul.f32 -0.00019511016, %v1306_v59  ;;  %v1605_v8 = vsel %vm1603_vm2, %v1604_v16, %v3685_v3  ;;  %vm1394_vm3 = vc.u32 %v1386_v38, %v1390_v23 }
  0xff   : > { %v1606_v34 = vclz %v1605_v8  ;;  %v3701_v54 = vsel %vm1502_vm1, %v1624_v45, %v1600_v19  ;;  %v1369_v29 = vsel %vm1365_vm12, %v1349_v27, %v1352_v28  ;;  %v1371_v55 = vsel %vm1367_vm13, %v3616_v62, %v1370_v30 }
 0x100   : > { %v1308_v0 = vadd.f32 0.041655596, %v1307_v58  ;;  %v1315_v39 = vadd.f32 0.008332121, %v1314_v37  ;;  %v1395_v9 = vsel %vm1394_vm3, 1, %v3124_v5  ;;  %v1396_v7 = vadd.s32 %v1390_v23, %v1386_v38 }
 0x101   : > { %v2760_v52 = vadd.s32 4294967294, %v1606_v34  ;;  %v1391_v1 = vshrl.u32 %v1387_v63, 16  ;;  %v1397_v16 = vadd.s32 %v1395_v9, %v1389_v11  ;;  %v3709_v58 = vmul.u32 %v1407_v22, %v1382_v15 }
 0x102   : > { %v1309_v53 = vmul.f32 %v1308_v0, %v1306_v59  ;;  %v1316_v48 = vmul.f32 %v1315_v39, %v1306_v59  ;;  %v3711_v37 = vmul.u32 %v1406_v21, %v1383_v6  ;;  %vm1398_vm5 = vc.u32 %v1396_v7, %v1392_v14 }
 0x103   : > { %vm2761_vm4 = vcmp.lt.s32.totalorder %v2760_v52, 0  ;;  %vm1325_vm6 = vcmp.eq.s32.totalorder %v3674_v47, 0  ;;  %vm1328_vm7 = vcmp.eq.s32.totalorder %v3674_v47, 2  ;;  %vm3717_vm8 = vcmp.le.f32.partialorder %v1500_v35, 0.7853982 }
 0x104   : > { %v1310_v19 = vadd.f32 -0.4999988, %v1309_v53  ;;  %v1317_v45 = vadd.f32 -0.16666654, %v1316_v48  ;;  %v1609_v28 = vsel %vm2761_vm4, 0, %v2760_v52  ;;  %v1399_v27 = vsel %vm1398_vm5, 1, %v3124_v5 }
 0x105   : > { %v1408_v38 = vmul.u32 %v1406_v21, %v1382_v15  ;;  %v1412_v63 = vshll.u32 %v3709_v58, 16  ;;  %v1610_v8 = vsub.s32 32, %v1609_v28  ;;  %v1393_v11 = vshrl.u32 %v3691_v50, 16 }
 0x106   : > { %v1311_v30 = vmul.f32 %v1310_v19, %v1306_v59  ;;  %v1318_v23 = vmul.f32 %v1317_v45, %v1306_v59  ;;  %vm1321_vm9 = vweird.f32 %v3348_v25  ;;  %v1614_v14 = vsub.s32 4294967266, %v1609_v28  ;;  %v1883_v25 = vld [vmem:[#allocation7 + $0x248] sm:$0xff] }
 0x107   : > { %v1401_v0 = vadd.s32 %v1399_v27, %v1397_v16  ;;  %v1411_v39 = vmul.u32 %v1407_v22, %v1383_v6  ;;  %v1414_v35 = vshll.u32 %v3711_v37, 16  ;;  %v1611_v53 = vshll.u32 %v3685_v3, %v1609_v28  ;;  %v1835_v27 = vld [vmem:[#allocation7 + $0xc8] sm:$0xff]  ;;  %v1889_v3 = vld [vmem:[#allocation7 + $0x278] sm:$0xff] }
 0x108   : > { %v1312_v34 = vadd.f32 1.0, %v1311_v30  ;;  %v1319_v9 = vadd.f32 1.0, %v1318_v23  ;;  %v1612_v48 = vshrl.u32 %v1594_v57, %v1610_v8  ;;  %v1615_v15 = vadd.s32 127, %v1614_v14  ;;  %v1867_v30 = vld [vmem:[#allocation7 + $0x1c8] sm:$0xff]  ;;  %2039 = vmatpush.msrb.mxu0 %v1835_v27  ;;  %2090 = vmatpush.msrb.mxu2 %v1889_v3 }
 0x109   : > { %v1402_v21 = vadd.s32 %v1401_v0, %v1391_v1  ;;  %vm1416_vm10 = vc.u32 %v1408_v38, %v1412_v63  ;;  %v1418_v52 = vadd.s32 %v1412_v63, %v1408_v38  ;;  %v1413_v50 = vshrl.u32 %v3709_v58, 16  ;;  %2062 = vmatpush.msrb.mxu1 %v1867_v30  ;;  %v1931_v58 = vld [vmem:[#allocation7 + $0x3c8] sm:$0xff]  ;;  %v1833_v38 = vld [vmem:[#allocation7 + $0xb8] sm:$0xff] }
 0x10a   : > { %v1320_v59 = vmul.f32 %v1319_v9, %v3681_v20  ;;  %v1329_v7 = vxor.u32 2147483648, %v1312_v34  ;;  %v1417_v19 = vsel %vm1416_vm10, 1, %v3124_v5  ;;  %v1613_v16 = vor.u32 %v1612_v48, %v1611_v53  ;;  %v1865_v63 = vld [vmem:[#allocation7 + $0x1b8] sm:$0xff]  ;;  %2108 = vmatpush.msrb.mxu3 %v1931_v58  ;;  %v1831_v0 = vld [vmem:[#allocation7 + $0xa8] sm:$0xff]  ;;  %2040 = vmatpush.msrb.mxu0 %v1833_v38 }
 0x10b   : > { %v1616_v6 = vshll.u32 %v1615_v15, 23  ;;  %v1419_v22 = vadd.s32 %v1417_v19, %v1411_v39  ;;  %vm1420_vm11 = vc.u32 %v1418_v52, %v1414_v35  ;;  %v3732_v57 = vsel %vm1366_vm15, %v1369_v29, %v1371_v55  ;;  %2063 = vmatpush.msrb.mxu1 %v1865_v63  ;;  %v1863_v53 = vld [vmem:[#allocation7 + $0x1a8] sm:$0xff]  ;;  %v1885_v48 = vld [vmem:[#allocation7 + $0x258] sm:$0xff] }
 0x10c   : > { %v1326_v45 = vxor.u32 2147483648, %v1320_v59  ;;  %v1415_v1 = vshrl.u32 %v3711_v37, 16  ;;  %v1421_v20 = vsel %vm1420_vm11, 1, %v3124_v5  ;;  %v3736_v23 = vadd.s32 %v1402_v21, %v1393_v11  ;;  %v1887_v37 = vld [vmem:[#allocation7 + $0x268] sm:$0xff]  ;;  %v1929_v11 = vld [vmem:[#allocation7 + $0x3b8] sm:$0xff]  ;;  %2041 = vmatpush.msrb.mxu0 %v1831_v0 }
 0x10d   : > { %v1617_v28 = vor.u32 4788187, %v1616_v6  ;;  %v3738_v8 = vadd.s32 %v1418_v52, %v1414_v35  ;;  %v1423_v14 = vadd.s32 %v1421_v20, %v1419_v22  ;;  %vm1324_vm12 = vcmp.lt.s32.totalorder %v3674_v47, 2  ;;  %2091 = vmatpush.msrb.mxu2 %v1887_v37  ;;  %2109 = vmatpush.msrb.mxu3 %v1929_v11  ;;  %v1829_v21 = vld [vmem:[#allocation7 + $0x98] sm:$0xff] }
 0x10e   : > { %v1327_v32 = vsel %vm1325_vm6, %v1312_v34, %v1326_v45  ;;  %v1330_v29 = vsel %vm1328_vm7, %v1329_v7, %v1320_v59  ;;  %v1627_v55 = vsel %vm3717_vm8, 0, %v3701_v54  ;;  %v1620_v9 = vcvt.s32.f32 %v1613_v16  ;;  %v1927_v54 = vld [vmem:[#allocation7 + $0x3a8] sm:$0xff]  ;;  %v1861_v19 = vld [vmem:[#allocation7 + $0x198] sm:$0xff]  ;;  %2064 = vmatpush.msrb.mxu1 %v1863_v53  ;;  %2042 = vmatpush.msrb.mxu0 %v1829_v21 }
 0x10f   : > { %v1331_v39 = vsel %vm1324_vm12, %v1327_v32, %v1330_v29  ;;  %v1618_v35 = vand.u32 2147483647, %v1617_v28  ;;  %v1424_v34 = vadd.s32 %v1423_v14, %v1413_v50  ;;  %v1658_v47 = vand.u32 2139095040, %v3391_v46  ;;  %2092 = vmatpush.msrb.mxu2 %v1885_v48  ;;  %v1925_v22 = vld [vmem:[#allocation7 + $0x398] sm:$0xff]  ;;  %2110 = vmatpush.msrb.mxu3 %v1927_v54 }
 0x110   : > { %v3751_v15 = vsel %vm1321_vm9, nan, %v1331_v39  ;;  %v1426_v52 = vmul.u32 %v3657_v41, %v3732_v57  ;;  %v534_v59 = vand.u32 2147483647, %v3359_v2  ;;  %v3757_v7 = vshrl.u32 %v3574_v33, 5  ;;  %2065 = vmatpush.msrb.mxu1 %v1861_v19 }
 0x111   : > { %2006 = vmatmul.f32.vlgmr.msra.gmra.mxu2 %v3751_v15  ;;  %v1621_v50 = vmul.f32 %v1620_v9, %v1618_v35  ;;  %v1425_v16 = vadd.s32 %v1424_v34, %v1415_v1  ;;  %vm1428_vm13 = vc.u32 %v3736_v23, %v3738_v8  ;;  %v1644_v6 = vadd.s32 3, %v1627_v55  ;;  %2111 = vmatpush.msrb.mxu3 %v1925_v22 }
 0x112   : > { %v552_v41 = vshrl.u32 %v3125_v36, %v3670_v60  ;;  %v554_v33 = vshll.u32 %v3125_v36, %v3648_v44  ;;  %v555_v45 = vshrl.u32 %v3127_v43, %v3670_v60  ;;  %v557_v3 = vshll.u32 %v3127_v43, %v3648_v44  ;;  %2093 = vmatpush.msrb.mxu2 %v1883_v25 }
 0x113   : > { %v1622_v27 = vxor.u32 2147483648, %v1621_v50  ;;  %v1429_v30 = vadd.s32 1, %v1425_v16  ;;  %v558_v57 = vshrl.u32 %v3128_v49, %v3670_v60  ;;  %v541_v1 = vand.u32 8388607, %v534_v59 }
 0x114   : > { %v3774_v20 = vor.u32 %v555_v45, %v554_v33  ;;  %v560_v28 = vshll.u32 %v3128_v49, %v3648_v44  ;;  %v561_v58 = vshrl.u32 %v3129_v51, %v3670_v60  ;;  %v563_v14 = vshll.u32 %v3129_v51, %v3648_v44 }
 0x115   : > { %v1623_v38 = vsel %vm1502_vm1, %v1622_v27, %v1621_v50  ;;  %v1430_v63 = vsel %vm1428_vm13, %v1429_v30, %v1425_v16  ;;  %v564_v32 = vshrl.u32 %v3130_v10, %v3670_v60  ;;  %v3794_v37 = vor.u32 %v558_v57, %v557_v3 }
 0x116   : > { %v3792_v29 = vsel %vm3717_vm8, %v3345_v24, %v1623_v38  ;;  %v1431_v55 = vadd.s32 %v1430_v63, %v1426_v52  ;;  %v562_v11 = vor.u32 %v561_v58, %v560_v28  ;;  %v3797_v0 = vand.u32 31, %v3665_v56 }
 0x117   : > { %v1628_v39 = vmul.f32 %v3792_v29, %v3792_v29  ;;  %v551_v35 = vshll.u32 %v3126_v42, %v3648_v44  ;;  %v565_v9 = vor.u32 %v564_v32, %v563_v14  ;;  %v3803_v53 = vand.u32 3, %v1644_v6 }
 0x118   : > { %v1432_v48 = vadd.s32 536870912, %v1431_v55  ;;  %v542_v62 = vor.u32 8388608, %v541_v1  ;;  %vm566_vm14 = vcmp.lt.s32.totalorder %v3757_v7, 1  ;;  %vm569_vm15 = vcmp.lt.s32.totalorder %v3757_v7, 4 }
 0x119   : > { %v1629_v34 = vmul.f32 -0.001358992, %v1628_v39  ;;  %v1636_v54 = vmul.f32 -0.00019511016, %v1628_v39  ;;  %v553_v21 = vor.u32 %v552_v41, %v551_v35  ;;  %vm568_vm0 = vcmp.lt.s32.totalorder %v3757_v7, 3 }
 0x11a   : > { %v3807_v52 = vshrl.u32 %v1432_v48, 30  ;;  %v575_v50 = vsel %vm569_vm15, %v562_v11, 920167782  ;;  %v578_v44 = vsel %vm566_vm14, %v3774_v20, %v3794_v37  ;;  %v579_v16 = vsel %vm569_vm15, %v565_v9, 1326507024 }
 0x11b   : > { %v1630_v19 = vadd.f32 0.041655596, %v1629_v34  ;;  %v1637_v25 = vadd.f32 0.008332121, %v1636_v54  ;;  %vm567_vm1 = vcmp.lt.s32.totalorder %v3757_v7, 2  ;;  %v580_v22 = vsel %vm568_vm0, %v562_v11, %v579_v16 }
 0x11c   : > { %v1434_v6 = vshll.u32 %v3807_v52, 30  ;;  %v3822_v41 = vshll.u32 %v542_v62, 8  ;;  %v3826_v33 = vshrl.u32 %v1658_v47, 23  ;;  %v581_v30 = vsel %vm567_vm1, %v578_v44, %v580_v22 }
 0x11d   : > { %v1631_v45 = vmul.f32 %v1630_v19, %v1628_v39  ;;  %v1638_v27 = vmul.f32 %v1637_v25, %v1628_v39  ;;  %v3831_v3 = vsub.s32 32, %v3797_v0  ;;  %v574_v1 = vsel %vm566_vm14, %v553_v21, %v3774_v20 }
 0x11e   : > { %v3833_v57 = vsub.s32 %v1431_v55, %v1434_v6  ;;  %v576_v28 = vsel %vm568_vm0, %v3794_v37, %v575_v50  ;;  %vm1650_vm2 = vcmp.eq.s32.totalorder %v3803_v53, 2  ;;  %v583_v38 = vand.u32 65535, %v3822_v41 }
 0x11f   : > { %v1632_v47 = vadd.f32 -0.4999988, %v1631_v45  ;;  %v1639_v58 = vadd.f32 -0.16666654, %v1638_v27  ;;  %v585_v63 = vand.u32 65535, %v581_v30  ;;  %vm1647_vm3 = vcmp.eq.s32.totalorder %v3803_v53, 0 }
 0x120   : > { %vm1436_vm4 = vcmp.lt.s32.totalorder %v3833_v57, 0  ;;  %v1437_v14 = vsub.s32 0, %v3833_v57  ;;  %v584_v32 = vshrl.u32 %v3822_v41, 16  ;;  %v586_v55 = vshrl.u32 %v581_v30, 16 }
 0x121   : > { %v1633_v11 = vmul.f32 %v1632_v47, %v1628_v39  ;;  %v1640_v35 = vmul.f32 %v1639_v58, %v1628_v39  ;;  %vm1646_vm5 = vcmp.lt.s32.totalorder %v3803_v53, 2  ;;  %v550_v9 = vshrl.u32 %v3126_v42, %v3670_v60 }
 0x122   : > { %v577_v48 = vsel %vm567_vm1, %v574_v1, %v576_v28  ;;  %vm1643_vm6 = vweird.f32 %v3345_v24  ;;  %v1427_v62 = vadd.s32 %v3738_v8, %v3736_v23  ;;  %v1438_v34 = vsel %vm1436_vm4, %v1437_v14, %v3833_v57 }
 0x123   : > { %v588_v54 = vmul.u32 %v586_v55, %v583_v38  ;;  %v589_v50 = vmul.u32 %v585_v63, %v584_v32  ;;  %v1634_v44 = vadd.f32 1.0, %v1633_v11  ;;  %v1641_v19 = vadd.f32 1.0, %v1640_v35 }
 0x124   : > { %vm1335_vm7 = vcmp.lt.s32.totalorder %v3334_v13, 0  ;;  %v1439_v39 = vclz %v1438_v34  ;;  %v3859_v60 = vsel %vm566_vm14, %v550_v9, %v553_v21  ;;  %v1457_v25 = vsub.s32 4, %v3807_v52 }
 0x125   : > { %v587_v16 = vmul.u32 %v585_v63, %v583_v38  ;;  %v591_v6 = vshll.u32 %v588_v54, 16  ;;  %v607_v22 = vand.u32 65535, %v577_v48  ;;  %v1642_v23 = vmul.f32 %v1641_v19, %v3792_v29 }
 0x126   : > { %v1651_v8 = vxor.u32 2147483648, %v1634_v44  ;;  %v2757_v45 = vadd.s32 4294967294, %v1439_v39  ;;  %v590_v27 = vmul.u32 %v586_v55, %v584_v32  ;;  %vm3865_vm8 = vcmp.le.f32.partialorder %v1333_v4, 0.7853982 }
 0x127   : > { %v593_v1 = vshll.u32 %v589_v50, 16  ;;  %vm595_vm9 = vc.u32 %v587_v16, %v591_v6  ;;  %v597_v21 = vadd.s32 %v591_v6, %v587_v16  ;;  %v608_v28 = vshrl.u32 %v577_v48, 16 }
 0x128   : > { %v1648_v47 = vxor.u32 2147483648, %v1642_v23  ;;  %vm2758_vm10 = vcmp.lt.s32.totalorder %v2757_v45, 0  ;;  %v592_v58 = vshrl.u32 %v588_v54, 16  ;;  %v596_v63 = vsel %vm595_vm9, 1, %v3124_v5 }
 0x129   : > { %v1652_v29 = vsel %vm1650_vm2, %v1651_v8, %v1642_v23  ;;  %v1442_v14 = vsel %vm2758_vm10, 0, %v2757_v45  ;;  %v598_v55 = vadd.s32 %v596_v63, %v590_v27  ;;  %vm599_vm11 = vc.u32 %v597_v21, %v593_v1  ;;  %v1827_v21 = vld [vmem:[#allocation7 + $0x88] sm:$0xff] }
 0x12a   : > { %v1649_v4 = vsel %vm1647_vm3, %v1634_v44, %v1648_v47  ;;  %v1443_v11 = vsub.s32 32, %v1442_v14  ;;  %v1444_v35 = vshll.u32 %v3833_v57, %v1442_v14  ;;  %v1447_v9 = vsub.s32 4294967266, %v1442_v14  ;;  %2043 = vmatpush.msrb.mxu0 %v1827_v21 }
 0x12b   : > { %v1653_v48 = vsel %vm1646_vm5, %v1649_v4, %v1652_v29  ;;  %v600_v34 = vsel %vm599_vm11, 1, %v3124_v5  ;;  %v610_v54 = vmul.u32 %v608_v28, %v583_v38  ;;  %v611_v19 = vmul.u32 %v607_v22, %v584_v32 }
 0x12c   : > { %v3880_v39 = vsel %vm1643_vm6, nan, %v1653_v48  ;;  %v1445_v16 = vshrl.u32 %v1427_v62, %v1443_v11  ;;  %v1448_v6 = vadd.s32 127, %v1447_v9  ;;  %v602_v23 = vadd.s32 %v600_v34, %v598_v55  ;;  %v1859_v62 = vld [vmem:[#allocation7 + $0x188] sm:$0xff] }
 0x12d   : > { %2029 = vmatmul.f32.vlgmr.msra.gmra.mxu3 %v3880_v39  ;;  %v1458_v57 = vsel %vm1335_vm7, %v1457_v25, %v3807_v52  ;;  %v571_v53 = vsel %vm569_vm15, %v3794_v37, 2102212464  ;;  %v609_v44 = vmul.u32 %v607_v22, %v583_v38  ;;  %v613_v8 = vshll.u32 %v610_v54, 16  ;;  %2066 = vmatpush.msrb.mxu1 %v1859_v62 }
 0x12e   : > { %v1446_v45 = vor.u32 %v1445_v16, %v1444_v35  ;;  %v1449_v27 = vshll.u32 %v1448_v6, 23  ;;  %v594_v24 = vshrl.u32 %v589_v50, 16  ;;  %v603_v1 = vadd.s32 %v602_v23, %v592_v58 }
 0x12f   : > { %v612_v47 = vmul.u32 %v608_v28, %v584_v32  ;;  %v615_v63 = vshll.u32 %v611_v19, 16  ;;  %vm617_vm12 = vc.u32 %v609_v44, %v613_v8  ;;  %v619_v29 = vadd.s32 %v613_v8, %v609_v44 }
 0x130   : > { %v1450_v14 = vor.u32 4788187, %v1449_v27  ;;  %v1460_v52 = vsel %vm3865_vm8, 0, %v1458_v57  ;;  %v572_v37 = vsel %vm568_vm0, %v3774_v20, %v571_v53  ;;  %v618_v38 = vsel %vm617_vm12, 1, %v3124_v5 }
 0x131   : > { %v3895_v50 = vadd.s32 %v603_v1, %v594_v24  ;;  %v620_v25 = vadd.s32 %v618_v38, %v612_v47  ;;  %vm621_vm13 = vc.u32 %v619_v29, %v615_v63  ;;  %v856_v32 = vand.u32 2147483647, %v3355_v61 }
 0x132   : > { %v3899_v22 = vshrl.u32 %v3665_v56, 5  ;;  %v1451_v28 = vand.u32 2147483647, %v1450_v14  ;;  %v1453_v58 = vcvt.s32.f32 %v1446_v45  ;;  %v622_v55 = vsel %vm621_vm13, 1, %v3124_v5 }
 0x133   : > { %v3903_v4 = vadd.s32 4294967169, %v3826_v33  ;;  %v614_v11 = vshrl.u32 %v610_v54, 16  ;;  %v3905_v20 = vadd.s32 %v619_v29, %v615_v63  ;;  %v624_v35 = vadd.s32 %v622_v55, %v620_v25 }
 0x134   : > { %v1454_v9 = vmul.f32 %v1453_v58, %v1451_v28  ;;  %v1477_v48 = vadd.s32 3, %v1460_v52  ;;  %v573_v34 = vsel %vm567_vm1, %v3859_v60, %v572_v37  ;;  %v616_v16 = vshrl.u32 %v611_v19, 16 }
 0x135   : > { %v625_v56 = vadd.s32 %v624_v35, %v614_v11  ;;  %vm629_vm14 = vc.u32 %v3895_v50, %v3905_v20  ;;  %v863_v6 = vand.u32 8388607, %v856_v32  ;;  %v877_v33 = vshrl.u32 %v3127_v43, %v3831_v3 }
 0x136   : > { %v1455_v54 = vxor.u32 2147483648, %v1454_v9  ;;  %v873_v23 = vshll.u32 %v3126_v42, %v3797_v0  ;;  %v874_v57 = vshrl.u32 %v3125_v36, %v3831_v3  ;;  %v880_v7 = vshrl.u32 %v3128_v49, %v3831_v3 }
 0x137   : > { %v626_v60 = vadd.s32 %v625_v56, %v616_v16  ;;  %v876_v19 = vshll.u32 %v3125_v36, %v3797_v0  ;;  %v879_v53 = vshll.u32 %v3127_v43, %v3797_v0  ;;  %v883_v44 = vshrl.u32 %v3129_v51, %v3831_v3 }
 0x138   : > { %v1456_v8 = vsel %vm1335_vm7, %v1455_v54, %v1454_v9  ;;  %v882_v45 = vshll.u32 %v3128_v49, %v3797_v0  ;;  %v885_v27 = vshll.u32 %v3129_v51, %v3797_v0  ;;  %v886_v24 = vshrl.u32 %v3130_v10, %v3831_v3 }
 0x139   : > { %v1459_v1 = vsel %vm3865_vm8, %v3334_v13, %v1456_v8  ;;  %v630_v21 = vadd.s32 1, %v626_v60  ;;  %v3939_v62 = vor.u32 %v877_v33, %v876_v19  ;;  %v881_v47 = vor.u32 %v880_v7, %v879_v53 }
 0x13a   : > { %v1461_v63 = vmul.f32 %v1459_v1, %v1459_v1  ;;  %v627_v29 = vmul.u32 %v3822_v41, %v573_v34  ;;  %v864_v14 = vor.u32 8388608, %v863_v6  ;;  %v887_v52 = vor.u32 %v886_v24, %v885_v27 }
 0x13b   : > { %v631_v0 = vsel %vm629_vm14, %v630_v21, %v626_v60  ;;  %v3945_v37 = vor.u32 %v874_v57, %v873_v23  ;;  %v884_v38 = vor.u32 %v883_v44, %v882_v45  ;;  %vm888_vm15 = vcmp.lt.s32.totalorder %v3899_v22, 1 }
 0x13c   : > { %v1462_v30 = vmul.f32 -0.001358992, %v1461_v63  ;;  %v1469_v25 = vmul.f32 -0.00019511016, %v1461_v63  ;;  %v632_v28 = vadd.s32 %v631_v0, %v627_v29  ;;  %vm891_vm0 = vcmp.lt.s32.totalorder %v3899_v22, 4 }
 0x13d   : > { %v3949_v58 = vand.u32 3, %v1477_v48  ;;  %vm889_vm1 = vcmp.lt.s32.totalorder %v3899_v22, 2  ;;  %v900_v41 = vsel %vm888_vm15, %v3939_v62, %v881_v47  ;;  %v901_v55 = vsel %vm891_vm0, %v887_v52, 1326507024 }
 0x13e   : > { %v1463_v11 = vadd.f32 0.041655596, %v1462_v30  ;;  %v1470_v35 = vadd.f32 0.008332121, %v1469_v25  ;;  %v633_v9 = vadd.s32 536870912, %v632_v28  ;;  %vm890_vm2 = vcmp.lt.s32.totalorder %v3899_v22, 3 }
 0x13f   : > { %v896_v48 = vsel %vm888_vm15, %v3945_v37, %v3939_v62  ;;  %v897_v34 = vsel %vm891_vm0, %v884_v38, 920167782  ;;  %v902_v16 = vsel %vm890_vm2, %v884_v38, %v901_v55  ;;  %v3966_v56 = vshll.u32 %v864_v14, 8 }
 0x140   : > { %v1464_v6 = vmul.f32 %v1463_v11, %v1461_v63  ;;  %v1471_v33 = vmul.f32 %v1470_v35, %v1461_v63  ;;  %v3968_v54 = vshrl.u32 %v633_v9, 30  ;;  %v903_v23 = vsel %vm889_vm1, %v900_v41, %v902_v16 }
 0x141   : > { %v3973_v57 = vand.u32 65535, %v3966_v56  ;;  %v3976_v7 = vshrl.u32 %v3966_v56, 16  ;;  %v907_v60 = vand.u32 65535, %v903_v23  ;;  %v908_v19 = vshrl.u32 %v903_v23, 16 }
 0x142   : > { %v1465_v53 = vadd.f32 -0.4999988, %v1464_v6  ;;  %v1472_v44 = vadd.f32 -0.16666654, %v1471_v33  ;;  %v635_v8 = vshll.u32 %v3968_v54, 30  ;;  %v898_v45 = vsel %vm890_vm2, %v881_v47, %v897_v34 }
 0x143   : > { %v3982_v27 = vand.u32 31, %v3562_v31  ;;  %v3985_v24 = vadd.s32 1, %v3903_v4  ;;  %v910_v21 = vmul.u32 %v908_v19, %v3973_v57  ;;  %v3989_v29 = vmul.u32 %v907_v60, %v3976_v7 }
 0x144   : > { %v1466_v14 = vmul.f32 %v1465_v53, %v1461_v63  ;;  %v1473_v52 = vmul.f32 %v1472_v44, %v1461_v63  ;;  %vm1479_vm3 = vcmp.lt.s32.totalorder %v3949_v58, 2  ;;  %v636_v0 = vsub.s32 %v632_v28, %v635_v8 }
 0x145   : > { %vm1476_vm4 = vweird.f32 %v3334_v13  ;;  %v893_v38 = vsel %vm891_vm0, %v881_v47, 2102212464  ;;  %v899_v30 = vsel %vm889_vm1, %v896_v48, %v898_v45  ;;  %v909_v4 = vmul.u32 %v907_v60, %v3973_v57 }
 0x146   : > { %v913_v25 = vshll.u32 %v910_v21, 16  ;;  %v1467_v41 = vadd.f32 1.0, %v1466_v14  ;;  %v1474_v55 = vadd.f32 1.0, %v1473_v52  ;;  %vm637_vm5 = vcmp.lt.s32.totalorder %v636_v0, 0 }
 0x147   : > { %v638_v11 = vsub.s32 0, %v636_v0  ;;  %v912_v63 = vmul.u32 %v908_v19, %v3976_v7  ;;  %v915_v35 = vshll.u32 %v3989_v29, 16  ;;  %v872_v48 = vshrl.u32 %v3126_v42, %v3831_v3 }
 0x148   : > { %vm917_vm6 = vc.u32 %v909_v4, %v913_v25  ;;  %v919_v28 = vadd.s32 %v913_v25, %v909_v4  ;;  %v1475_v9 = vmul.f32 %v1474_v55, %v1459_v1  ;;  %v1484_v34 = vxor.u32 2147483648, %v1467_v41 }
 0x149   : > { %v639_v16 = vsel %vm637_vm5, %v638_v11, %v636_v0  ;;  %v918_v47 = vsel %vm917_vm6, 1, %v3124_v5  ;;  %vm1480_vm8 = vcmp.eq.s32.totalorder %v3949_v58, 0  ;;  %vm536_vm9 = vcmp.lt.s32.totalorder %v3359_v2, 0 }
 0x14a   : > { %v640_v6 = vclz %v639_v16  ;;  %v920_v33 = vadd.s32 %v918_v47, %v912_v63  ;;  %vm921_vm7 = vc.u32 %v919_v28, %v915_v35  ;;  %v1481_v23 = vxor.u32 2147483648, %v1475_v9 }
 0x14b   : > { %v922_v60 = vsel %vm921_vm7, 1, %v3124_v5  ;;  %v929_v19 = vand.u32 65535, %v899_v30  ;;  %vm1483_vm10 = vcmp.eq.s32.totalorder %v3949_v58, 2  ;;  %v892_v53 = vsel %vm888_vm15, %v872_v48, %v3945_v37 }
 0x14c   : > { %v2742_v1 = vadd.s32 4294967294, %v640_v6  ;;  %v894_v3 = vsel %vm890_vm2, %v3939_v62, %v893_v38  ;;  %v1482_v44 = vsel %vm1480_vm8, %v1467_v41, %v1481_v23  ;;  %v1485_v8 = vsel %vm1483_vm10, %v1484_v34, %v1475_v9 }
 0x14d   : > { %v924_v45 = vadd.s32 %v922_v60, %v920_v33  ;;  %v930_v14 = vshrl.u32 %v899_v30, 16  ;;  %v1486_v52 = vsel %vm1479_vm3, %v1482_v44, %v1485_v8  ;;  %v628_v4 = vadd.s32 %v3905_v20, %v3895_v50 }
 0x14e   : > { %vm2743_vm11 = vcmp.lt.s32.totalorder %v2742_v1, 0  ;;  %v914_v25 = vshrl.u32 %v910_v21, 16  ;;  %v4019_v55 = vsel %vm1476_vm4, nan, %v1486_v52  ;;  %v933_v62 = vmul.u32 %v929_v19, %v3976_v7 }
 0x14f   : > { %v643_v37 = vsel %vm2743_vm11, 0, %v2742_v1  ;;  %v932_v11 = vmul.u32 %v930_v14, %v3973_v57  ;;  %2009 = vmatmul.f32.gmra.mxu2 %v4019_v55  ;;  %v658_v58 = vsub.s32 4, %v3968_v54  ;;  %v4027_v50 = vsel %vm889_vm1, %v892_v53, %v894_v3 }
 0x150   : > { %v644_v38 = vsub.s32 32, %v643_v37  ;;  %v648_v30 = vsub.s32 4294967266, %v643_v37  ;;  %vm4031_vm12 = vcmp.le.f32.partialorder %v534_v59, 0.7853982  ;;  %v916_v20 = vshrl.u32 %v3989_v29, 16 }
 0x151   : > { %v925_v21 = vadd.s32 %v924_v45, %v914_v25  ;;  %v931_v41 = vmul.u32 %v929_v19, %v3973_v57  ;;  %v935_v63 = vshll.u32 %v932_v11, 16  ;;  %v645_v35 = vshll.u32 %v636_v0, %v643_v37 }
 0x152   : > { %v646_v28 = vshrl.u32 %v628_v4, %v644_v38  ;;  %v649_v9 = vadd.s32 127, %v648_v30  ;;  %v934_v34 = vmul.u32 %v930_v14, %v3976_v7  ;;  %v937_v22 = vshll.u32 %v933_v62, 16 }
 0x153   : > { %vm939_vm13 = vc.u32 %v931_v41, %v935_v63  ;;  %v941_v16 = vadd.s32 %v935_v63, %v931_v41  ;;  %v689_v47 = vand.u32 2147483647, %v3331_v12  ;;  %v659_v29 = vsel %vm536_vm9, %v658_v58, %v3968_v54 }
 0x154   : > { %v647_v59 = vor.u32 %v646_v28, %v645_v35  ;;  %v650_v6 = vshll.u32 %v649_v9, 23  ;;  %v940_v48 = vsel %vm939_vm13, 1, %v3124_v5  ;;  %v4043_v57 = vadd.s32 %v925_v21, %v916_v20 }
 0x155   : > { %v936_v0 = vshrl.u32 %v932_v11, 16  ;;  %v942_v33 = vadd.s32 %v940_v48, %v934_v34  ;;  %vm943_vm14 = vc.u32 %v941_v16, %v937_v22  ;;  %v938_v7 = vshrl.u32 %v933_v62, 16 }
 0x156   : > { %v651_v23 = vor.u32 4788187, %v650_v6  ;;  %v944_v60 = vsel %vm943_vm14, 1, %v3124_v5  ;;  %v4046_v19 = vadd.s32 %v941_v16, %v937_v22  ;;  %v654_v1 = vcvt.s32.f32 %v647_v59 }
 0x157   : > { %v946_v53 = vadd.s32 %v944_v60, %v942_v33  ;;  %v696_v3 = vand.u32 8388607, %v689_v47  ;;  %v706_v54 = vshll.u32 %v3126_v42, %v3424_v26  ;;  %v707_v8 = vshrl.u32 %v3125_v36, %v3544_v40 }
 0x158   : > { %v652_v44 = vand.u32 2147483647, %v651_v23  ;;  %v709_v45 = vshll.u32 %v3125_v36, %v3424_v26  ;;  %v710_v14 = vshrl.u32 %v3127_v43, %v3544_v40  ;;  %v712_v4 = vshll.u32 %v3127_v43, %v3424_v26 }
 0x159   : > { %v947_v52 = vadd.s32 %v946_v53, %v936_v0  ;;  %v713_v25 = vshrl.u32 %v3128_v49, %v3544_v40  ;;  %v715_v37 = vshll.u32 %v3128_v49, %v3424_v26  ;;  %v661_v62 = vsel %vm4031_vm12, 0, %v659_v29 }
 0x15a   : > { %v655_v11 = vmul.f32 %v654_v1, %v652_v44  ;;  %vm951_vm15 = vc.u32 %v4043_v57, %v4046_v19  ;;  %v716_v38 = vshrl.u32 %v3129_v51, %v3544_v40  ;;  %v697_v58 = vor.u32 8388608, %v696_v3 }
 0x15b   : > { %v948_v30 = vadd.s32 %v947_v52, %v938_v7  ;;  %v718_v20 = vshll.u32 %v3129_v51, %v3424_v26  ;;  %v719_v21 = vshrl.u32 %v3130_v10, %v3544_v40  ;;  %v4074_v63 = vor.u32 %v707_v8, %v706_v54 }
 0x15c   : > { %v656_v41 = vxor.u32 2147483648, %v655_v11  ;;  %v4076_v35 = vor.u32 %v710_v14, %v709_v45  ;;  %v717_v28 = vor.u32 %v716_v38, %v715_v37  ;;  %v4078_v34 = vor.u32 %v713_v25, %v712_v4 }
 0x15d   : > { %v952_v9 = vadd.s32 1, %v948_v30  ;;  %v720_v22 = vor.u32 %v719_v21, %v718_v20  ;;  %vm724_vm0 = vcmp.lt.s32.totalorder %v3422_v18, 4  ;;  %vm1666_vm1 = vcmp.gt.s32.totalorder %v3985_v24, 0 }
 0x15e   : > { %v657_v26 = vsel %vm536_vm9, %v656_v41, %v655_v11  ;;  %v949_v16 = vmul.u32 %v3966_v56, %v4027_v50  ;;  %vm721_vm2 = vcmp.lt.s32.totalorder %v3422_v18, 1  ;;  %v678_v6 = vadd.s32 3, %v661_v62 }
 0x15f   : > { %v4090_v59 = vsel %vm4031_vm12, %v3359_v2, %v657_v26  ;;  %v953_v29 = vsel %vm951_vm15, %v952_v9, %v948_v30  ;;  %vm723_vm3 = vcmp.lt.s32.totalorder %v3422_v18, 3  ;;  %vm722_vm4 = vcmp.lt.s32.totalorder %v3422_v18, 2  ;;  %v1919_v18 = vld [vmem:[#allocation7 + $0x368] sm:$0xff] }
 0x160   : > { %v662_v48 = vmul.f32 %v4090_v59, %v4090_v59  ;;  %v954_v0 = vadd.s32 %v953_v29, %v949_v16  ;;  %v730_v56 = vsel %vm724_vm0, %v717_v28, 920167782  ;;  %v729_v50 = vsel %vm721_vm2, %v4074_v63, %v4076_v35 }
 0x161   : > { %v733_v13 = vsel %vm721_vm2, %v4076_v35, %v4078_v34  ;;  %v734_v33 = vsel %vm724_vm0, %v720_v22, 1326507024  ;;  %v4111_v23 = vshll.u32 %v697_v58, 8  ;;  %v731_v3 = vsel %vm723_vm3, %v4078_v34, %v730_v56 }
 0x162   : > { %v663_v7 = vmul.f32 -0.001358992, %v662_v48  ;;  %v670_v60 = vmul.f32 -0.00019511016, %v662_v48  ;;  %v955_v1 = vadd.s32 536870912, %v954_v0  ;;  %v735_v53 = vsel %vm723_vm3, %v717_v28, %v734_v33 }
 0x163   : > { %v736_v54 = vsel %vm722_vm4, %v733_v13, %v735_v53  ;;  %v738_v44 = vand.u32 65535, %v4111_v23  ;;  %v4122_v8 = vshrl.u32 %v4111_v23, 16  ;;  %v4127_v25 = vshrl.u32 %v3562_v31, 5 }
 0x164   : > { %v664_v45 = vadd.f32 0.041655596, %v663_v7  ;;  %v671_v14 = vadd.f32 0.008332121, %v670_v60  ;;  %v4124_v52 = vshrl.u32 %v955_v1, 30  ;;  %v740_v4 = vand.u32 65535, %v736_v54 }
 0x165   : > { %v4130_v37 = vsub.s32 32, %v3982_v27  ;;  %v679_v11 = vand.u32 3, %v678_v6  ;;  %v741_v62 = vshrl.u32 %v736_v54, 16  ;;  %v732_v20 = vsel %vm722_vm4, %v729_v50, %v731_v3 }
 0x166   : > { %v665_v38 = vmul.f32 %v664_v45, %v662_v48  ;;  %v672_v30 = vmul.f32 %v671_v14, %v662_v48  ;;  %v957_v58 = vshll.u32 %v4124_v52, 30  ;;  %v4138_v21 = vsel %vm1666_vm1, %v3985_v24, 0 }
 0x167   : > { %v742_v41 = vmul.u32 %v740_v4, %v738_v44  ;;  %v743_v31 = vmul.u32 %v741_v62, %v738_v44  ;;  %v4141_v28 = vmul.u32 %v740_v4, %v4122_v8  ;;  %v762_v16 = vand.u32 65535, %v732_v20 }
 0x168   : > { %v666_v9 = vadd.f32 -0.4999988, %v665_v38  ;;  %v673_v22 = vadd.f32 -0.16666654, %v672_v30  ;;  %v4143_v26 = vsub.s32 %v954_v0, %v957_v58  ;;  %vm681_vm5 = vcmp.eq.s32.totalorder %v679_v11, 0 }
 0x169   : > { %v745_v6 = vmul.u32 %v741_v62, %v4122_v8  ;;  %v746_v29 = vshll.u32 %v743_v31, 16  ;;  %v748_v56 = vshll.u32 %v4141_v28, 16  ;;  %v763_v50 = vshrl.u32 %v732_v20, 16 }
 0x16a   : > { %v667_v13 = vmul.f32 %v666_v9, %v662_v48  ;;  %v674_v24 = vmul.f32 %v673_v22, %v662_v48  ;;  %vm680_vm6 = vcmp.lt.s32.totalorder %v679_v11, 2  ;;  %vm959_vm7 = vcmp.lt.s32.totalorder %v4143_v26, 0 }
 0x16b   : > { %v960_v33 = vsub.s32 0, %v4143_v26  ;;  %vm677_vm8 = vweird.f32 %v3359_v2  ;;  %vm684_vm9 = vcmp.eq.s32.totalorder %v679_v11, 2  ;;  %v705_v0 = vshrl.u32 %v3126_v42, %v3544_v40 }
 0x16c   : > { %vm750_vm10 = vc.u32 %v742_v41, %v746_v29  ;;  %v752_v7 = vadd.s32 %v746_v29, %v742_v41  ;;  %v668_v60 = vadd.f32 1.0, %v667_v13  ;;  %v675_v1 = vadd.f32 1.0, %v674_v24 }
 0x16d   : > { %v961_v53 = vsel %vm959_vm7, %v960_v33, %v4143_v26  ;;  %v751_v3 = vsel %vm750_vm10, 1, %v3124_v5  ;;  %v4155_v45 = vmul.u32 %v762_v16, %v4122_v8  ;;  %vm858_vm12 = vcmp.lt.s32.totalorder %v3355_v61, 0 }
 0x16e   : > { %v962_v48 = vclz %v961_v53  ;;  %v753_v54 = vadd.s32 %v751_v3, %v745_v6  ;;  %vm754_vm11 = vc.u32 %v752_v7, %v748_v56  ;;  %v676_v14 = vmul.f32 %v675_v1, %v4090_v59 }
 0x16f   : > { %v685_v4 = vxor.u32 2147483648, %v668_v60  ;;  %v755_v40 = vsel %vm754_vm11, 1, %v3124_v5  ;;  %v765_v62 = vmul.u32 %v763_v50, %v738_v44  ;;  %v950_v38 = vadd.s32 %v4046_v19, %v4043_v57 }
 0x170   : > { %v2748_v30 = vadd.s32 4294967294, %v962_v48  ;;  %v725_v58 = vsel %vm721_vm2, %v705_v0, %v4074_v63  ;;  %v726_v20 = vsel %vm724_vm0, %v4078_v34, 2102212464  ;;  %v682_v41 = vxor.u32 2147483648, %v676_v14 }
 0x171   : > { %v747_v59 = vshrl.u32 %v743_v31, 16  ;;  %v757_v9 = vadd.s32 %v755_v40, %v753_v54  ;;  %v764_v22 = vmul.u32 %v762_v16, %v738_v44  ;;  %v686_v6 = vsel %vm684_vm9, %v685_v4, %v676_v14  ;;  %v1923_v54 = vld [vmem:[#allocation7 + $0x388] sm:$0xff]  ;;  %v1825_v14 = vld [vmem:[#allocation7 + $0x78] sm:$0xff] }
 0x172   : > { %vm4171_vm13 = vcmp.le.f32.partialorder %v856_v32, 0.7853982  ;;  %vm2749_vm14 = vcmp.lt.s32.totalorder %v2748_v30, 0  ;;  %v980_v57 = vsub.s32 4, %v4124_v52  ;;  %v768_v19 = vshll.u32 %v765_v62, 16  ;;  %2112 = vmatpush.msrb.mxu3 %v1923_v54  ;;  %2044 = vmatpush.msrb.mxu0 %v1825_v14 }
 0x173   : > { %v683_v63 = vsel %vm681_vm5, %v668_v60, %v682_v41  ;;  %v965_v56 = vsel %vm2749_vm14, 0, %v2748_v30  ;;  %v767_v34 = vmul.u32 %v763_v50, %v4122_v8  ;;  %v770_v31 = vshll.u32 %v4155_v45, 16  ;;  %v1879_v30 = vld [vmem:[#allocation7 + $0x228] sm:$0xff] }
 0x174   : > { %v687_v44 = vsel %vm680_vm6, %v683_v63, %v686_v6  ;;  %v966_v16 = vsub.s32 32, %v965_v56  ;;  %v970_v13 = vsub.s32 4294967266, %v965_v56  ;;  %v749_v32 = vshrl.u32 %v4141_v28, 16  ;;  %v1855_v6 = vld [vmem:[#allocation7 + $0x168] sm:$0xff] }
 0x175   : > { %v4183_v24 = vsel %vm677_vm8, nan, %v687_v44  ;;  %v758_v33 = vadd.s32 %v757_v9, %v747_v59  ;;  %vm772_vm15 = vc.u32 %v764_v22, %v768_v19  ;;  %v774_v0 = vadd.s32 %v768_v19, %v764_v22  ;;  %v1823_v22 = vld [vmem:[#allocation7 + $0x68] sm:$0xff] }
 0x176   : > { %1960 = vmatmul.f32.vlgmr.msra.gmra.mxu0 %v4183_v24  ;;  %v967_v7 = vshll.u32 %v4143_v26, %v965_v56  ;;  %v968_v8 = vshrl.u32 %v950_v38, %v966_v16  ;;  %v971_v50 = vadd.s32 127, %v970_v13  ;;  %v773_v11 = vsel %vm772_vm15, 1, %v3124_v5  ;;  %v1881_v26 = vld [vmem:[#allocation7 + $0x238] sm:$0xff]  ;;  %v1875_v13 = vld [vmem:[#allocation7 + $0x208] sm:$0xff] }
 0x177   : > { %v727_v60 = vsel %vm723_vm3, %v4076_v35, %v726_v20  ;;  %v769_v28 = vshrl.u32 %v765_v62, 16  ;;  %v775_v1 = vadd.s32 %v773_v11, %v767_v34  ;;  %vm776_vm0 = vc.u32 %v774_v0, %v770_v31  ;;  %2094 = vmatpush.msrb.mxu2 %v1881_v26  ;;  %v1857_v62 = vld [vmem:[#allocation7 + $0x178] sm:$0xff]  ;;  %2045 = vmatpush.msrb.mxu0 %v1823_v22 }
 0x178   : > { %v969_v2 = vor.u32 %v968_v8, %v967_v7  ;;  %v972_v53 = vshll.u32 %v971_v50, 23  ;;  %v981_v3 = vsel %vm858_vm12, %v980_v57, %v4124_v52  ;;  %v777_v48 = vsel %vm776_vm0, 1, %v3124_v5  ;;  %v1921_v20 = vld [vmem:[#allocation7 + $0x378] sm:$0xff]  ;;  %2067 = vmatpush.msrb.mxu1 %v1857_v62 }
 0x179   : > { %v771_v4 = vshrl.u32 %v4155_v45, 16  ;;  %v779_v40 = vadd.s32 %v777_v48, %v775_v1  ;;  %v1011_v38 = vand.u32 2147483647, %v3339_v17  ;;  %v728_v41 = vsel %vm722_vm4, %v725_v58, %v727_v60  ;;  %v1877_v57 = vld [vmem:[#allocation7 + $0x218] sm:$0xff]  ;;  %2095 = vmatpush.msrb.mxu2 %v1879_v30  ;;  %2113 = vmatpush.msrb.mxu3 %v1921_v20  ;;  %v1819_v60 = vld [vmem:[#allocation7 + $0x48] sm:$0xff] }
 0x17a   : > { %v973_v35 = vor.u32 4788187, %v972_v53  ;;  %v4199_v52 = vadd.s32 %v758_v33, %v749_v32  ;;  %v4201_v59 = vadd.s32 %v774_v0, %v770_v31  ;;  %v976_v9 = vcvt.s32.f32 %v969_v2  ;;  %v1821_v58 = vld [vmem:[#allocation7 + $0x58] sm:$0xff]  ;;  %2068 = vmatpush.msrb.mxu1 %v1855_v6 }
 0x17b   : > { %v983_v45 = vsel %vm4171_vm13, 0, %v981_v3  ;;  %v780_v19 = vadd.s32 %v779_v40, %v769_v28  ;;  %v1031_v63 = vshll.u32 %v3125_v36, %v3982_v27  ;;  %v1853_v34 = vld [vmem:[#allocation7 + $0x158] sm:$0xff]  ;;  %v1032_v31 = vshrl.u32 %v3127_v43, %v4130_v37  ;;  %2096 = vmatpush.msrb.mxu2 %v1877_v57  ;;  %2114 = vmatpush.msrb.mxu3 %v1919_v18  ;;  %v1851_v28 = vld [vmem:[#allocation7 + $0x148] sm:$0xff] }
 0x17c   : > { %v974_v56 = vand.u32 2147483647, %v973_v35  ;;  %v1034_v44 = vshll.u32 %v3127_v43, %v3982_v27  ;;  %v1035_v16 = vshrl.u32 %v3128_v49, %v4130_v37  ;;  %v1917_v32 = vld [vmem:[#allocation7 + $0x358] sm:$0xff]  ;;  %v782_v0 = vmul.u32 %v4111_v23, %v728_v41  ;;  %2046 = vmatpush.msrb.mxu0 %v1821_v58  ;;  %2069 = vmatpush.msrb.mxu1 %v1853_v34 }
 0x17d   : > { %v781_v33 = vadd.s32 %v780_v19, %v771_v4  ;;  %v1018_v7 = vand.u32 8388607, %v1011_v38  ;;  %v1037_v8 = vshll.u32 %v3128_v49, %v3982_v27  ;;  %v1000_v11 = vadd.s32 3, %v983_v45  ;;  %2097 = vmatpush.msrb.mxu2 %v1875_v13  ;;  %2115 = vmatpush.msrb.mxu3 %v1917_v32 }
 0x17e   : > { %v977_v50 = vmul.f32 %v976_v9, %v974_v56  ;;  %vm784_vm1 = vc.u32 %v4199_v52, %v4201_v59  ;;  %v1028_v1 = vshll.u32 %v3126_v42, %v3982_v27  ;;  %v1029_v2 = vshrl.u32 %v3125_v36, %v4130_v37  ;;  %2047 = vmatpush.msrb.mxu0 %v1819_v60 }
 0x17f   : > { %v785_v23 = vadd.s32 1, %v781_v33  ;;  %v1038_v53 = vshrl.u32 %v3129_v51, %v4130_v37  ;;  %v1040_v3 = vshll.u32 %v3129_v51, %v3982_v27  ;;  %v4228_v26 = vor.u32 %v1032_v31, %v1031_v63  ;;  %2070 = vmatpush.msrb.mxu1 %v1851_v28  ;;  %2098 = vmatmul.f32.vlgmr.msrb.gmra.mxu2 %v3751_v15 }
 0x180   : > { %v978_v48 = vxor.u32 2147483648, %v977_v50  ;;  %v4230_v54 = vor.u32 %v1035_v16, %v1034_v44  ;;  %v1041_v14 = vshrl.u32 %v3130_v10, %v4130_v37  ;;  %v1019_v40 = vor.u32 8388608, %v1018_v7 }
 0x181   : > { %v786_v4 = vsel %vm784_vm1, %v785_v23, %v781_v33  ;;  %v1039_v35 = vor.u32 %v1038_v53, %v1037_v8  ;;  %vm1043_vm2 = vcmp.lt.s32.totalorder %v4127_v25, 1  ;;  %vm1046_vm3 = vcmp.lt.s32.totalorder %v4127_v25, 4 }
 0x182   : > { %v979_v27 = vsel %vm858_vm12, %v978_v48, %v977_v50  ;;  %v787_v62 = vadd.s32 %v786_v4, %v782_v0  ;;  %v1042_v30 = vor.u32 %v1041_v14, %v1040_v3  ;;  %v4243_v20 = vand.u32 31, %v4138_v21 }
 0x183   : > { %v4248_v41 = vsel %vm4171_vm13, %v3355_v61, %v979_v27  ;;  %v4250_v9 = vor.u32 %v1029_v2, %v1028_v1  ;;  %vm1045_vm4 = vcmp.lt.s32.totalorder %v4127_v25, 3  ;;  %v4255_v15 = vand.u32 3, %v1000_v11 }
 0x184   : > { %v984_v45 = vmul.f32 %v4248_v41, %v4248_v41  ;;  %v788_v22 = vadd.s32 536870912, %v787_v62  ;;  %vm1044_vm5 = vcmp.lt.s32.totalorder %v4127_v25, 2  ;;  %v1052_v6 = vsel %vm1046_vm3, %v1039_v35, 920167782 }
 0x185   : > { %v1055_v29 = vsel %vm1043_vm2, %v4228_v26, %v4230_v54  ;;  %v1056_v57 = vsel %vm1046_vm3, %v1042_v30, 1326507024  ;;  %v4266_v19 = vshll.u32 %v1019_v40, 8  ;;  %v1051_v34 = vsel %vm1043_vm2, %v4250_v9, %v4228_v26 }
 0x186   : > { %v985_v63 = vmul.f32 -0.001358992, %v984_v45  ;;  %v992_v56 = vmul.f32 -0.00019511016, %v984_v45  ;;  %v4268_v18 = vshrl.u32 %v788_v22, 30  ;;  %v1057_v58 = vsel %vm1045_vm4, %v1039_v35, %v1056_v57 }
 0x187   : > { %v1058_v31 = vsel %vm1044_vm5, %v1055_v29, %v1057_v58  ;;  %v1060_v44 = vand.u32 65535, %v4266_v19  ;;  %v4280_v16 = vshrl.u32 %v4266_v19, 16  ;;  %v1053_v0 = vsel %vm1045_vm4, %v4230_v54, %v1052_v6  ;;  %2101 = vmatmul.f32.gmra.mxu2 %v4019_v55 }
 0x188   : > { %v986_v13 = vadd.f32 0.041655596, %v985_v63  ;;  %v993_v32 = vadd.f32 0.008332121, %v992_v56  ;;  %v790_v33 = vshll.u32 %v4268_v18, 30  ;;  %v1062_v7 = vand.u32 65535, %v1058_v31 }
 0x189   : > { %v1063_v8 = vshrl.u32 %v1058_v31, 16  ;;  %v4287_v50 = vsub.s32 32, %v4243_v20  ;;  %v1054_v1 = vsel %vm1044_vm5, %v1051_v34, %v1053_v0  ;;  %vm1006_vm6 = vcmp.eq.s32.totalorder %v4255_v15, 2 }
 0x18a   : > { %v987_v11 = vmul.f32 %v986_v13, %v984_v45  ;;  %v994_v60 = vmul.f32 %v993_v32, %v984_v45  ;;  %v4289_v28 = vsub.s32 %v787_v62, %v790_v33  ;;  %v1064_v23 = vmul.u32 %v1062_v7, %v1060_v44 }
 0x18b   : > { %v1065_v2 = vmul.u32 %v1063_v8, %v1060_v44  ;;  %v4295_v53 = vmul.u32 %v1062_v7, %v4280_v16  ;;  %vm691_vm7 = vcmp.lt.s32.totalorder %v3331_v12, 0  ;;  %vm1003_vm9 = vcmp.eq.s32.totalorder %v4255_v15, 0 }
 0x18c   : > { %v988_v3 = vadd.f32 -0.4999988, %v987_v11  ;;  %v995_v48 = vadd.f32 -0.16666654, %v994_v60  ;;  %vm792_vm8 = vcmp.lt.s32.totalorder %v4289_v28, 0  ;;  %v793_v14 = vsub.s32 0, %v4289_v28 }
 0x18d   : > { %v783_v55 = vadd.s32 %v4201_v59, %v4199_v52  ;;  %v1067_v4 = vmul.u32 %v1063_v8, %v4280_v16  ;;  %v1068_v40 = vshll.u32 %v1065_v2, 16  ;;  %v1084_v35 = vand.u32 65535, %v1054_v1 }
 0x18e   : > { %v989_v27 = vmul.f32 %v988_v3, %v984_v45  ;;  %v996_v62 = vmul.f32 %v995_v48, %v984_v45  ;;  %vm1002_vm10 = vcmp.lt.s32.totalorder %v4255_v15, 2  ;;  %v794_v30 = vsel %vm792_vm8, %v793_v14, %v4289_v28 }
 0x18f   : > { %v1070_v22 = vshll.u32 %v4295_v53, 16  ;;  %vm999_vm11 = vweird.f32 %v3355_v61  ;;  %v795_v6 = vclz %v794_v30  ;;  %v1027_v29 = vshrl.u32 %v3126_v42, %v4130_v37 }
 0x190   : > { %vm1072_vm12 = vc.u32 %v1064_v23, %v1068_v40  ;;  %v1085_v52 = vshrl.u32 %v1054_v1, 16  ;;  %v990_v59 = vadd.f32 1.0, %v989_v27  ;;  %v997_v57 = vadd.f32 1.0, %v996_v62 }
 0x191   : > { %v1073_v63 = vsel %vm1072_vm12, 1, %v3124_v5  ;;  %v1074_v56 = vadd.s32 %v1068_v40, %v1064_v23  ;;  %vm4314_vm13 = vcmp.le.f32.partialorder %v689_v47, 0.7853982  ;;  %v2745_v58 = vadd.s32 4294967294, %v795_v6 }
 0x192   : > { %v813_v34 = vsub.s32 4, %v4268_v18  ;;  %v1048_v37 = vsel %vm1046_vm3, %v4230_v54, 2102212464  ;;  %v1086_v31 = vmul.u32 %v1084_v35, %v1060_v44  ;;  %v998_v13 = vmul.f32 %v997_v57, %v4248_v41 }
 0x193   : > { %v1007_v32 = vxor.u32 2147483648, %v990_v59  ;;  %v1075_v33 = vadd.s32 %v1073_v63, %v1067_v4  ;;  %vm1076_vm14 = vc.u32 %v1074_v56, %v1070_v22  ;;  %vm2746_vm15 = vcmp.lt.s32.totalorder %v2745_v58, 0 }
 0x194   : > { %v1077_v0 = vsel %vm1076_vm14, 1, %v3124_v5  ;;  %v1087_v47 = vmul.u32 %v1085_v52, %v1060_v44  ;;  %v1088_v7 = vmul.u32 %v1084_v35, %v4280_v16  ;;  %v1004_v8 = vxor.u32 2147483648, %v998_v13 }
 0x195   : > { %v798_v11 = vsel %vm2746_vm15, 0, %v2745_v58  ;;  %v1069_v60 = vshrl.u32 %v1065_v2, 16  ;;  %v1079_v1 = vadd.s32 %v1077_v0, %v1075_v33  ;;  %v1008_v23 = vsel %vm1006_vm6, %v1007_v32, %v998_v13 }
 0x196   : > { %v799_v54 = vsub.s32 32, %v798_v11  ;;  %v803_v3 = vsub.s32 4294967266, %v798_v11  ;;  %v814_v41 = vsel %vm691_vm7, %v813_v34, %v4268_v18  ;;  %v1005_v48 = vsel %vm1003_vm9, %v990_v59, %v1004_v8 }
 0x197   : > { %v800_v44 = vshll.u32 %v4289_v28, %v798_v11  ;;  %v1089_v14 = vmul.u32 %v1085_v52, %v4280_v16  ;;  %v1090_v4 = vshll.u32 %v1087_v47, 16  ;;  %v1009_v2 = vsel %vm1002_vm10, %v1005_v48, %v1008_v23 }
 0x198   : > { %v801_v40 = vshrl.u32 %v783_v55, %v799_v54  ;;  %v804_v35 = vadd.s32 127, %v803_v3  ;;  %v1092_v27 = vshll.u32 %v1088_v7, 16  ;;  %v4338_v62 = vsel %vm999_vm11, nan, %v1009_v2 }
 0x199   : > { %v1071_v18 = vshrl.u32 %v4295_v53, 16  ;;  %v1080_v30 = vadd.s32 %v1079_v1, %v1069_v60  ;;  %vm1094_vm0 = vc.u32 %v1086_v31, %v1090_v4  ;;  %1983 = vmatmul.f32.vlgmr.msra.gmra.mxu1 %v4338_v62  ;;  %v1096_v6 = vadd.s32 %v1090_v4, %v1086_v31 }
 0x19a   : > { %v802_v28 = vor.u32 %v801_v40, %v800_v44  ;;  %v805_v22 = vshll.u32 %v804_v35, 23  ;;  %v1095_v16 = vsel %vm1094_vm0, 1, %v3124_v5  ;;  %v816_v15 = vsel %vm4314_vm13, 0, %v814_v41 }
 0x19b   : > { %v1047_v61 = vsel %vm1043_vm2, %v1027_v29, %v4250_v9  ;;  %v1049_v53 = vsel %vm1045_vm4, %v4228_v26, %v1048_v37  ;;  %v1097_v55 = vadd.s32 %v1095_v16, %v1089_v14  ;;  %v1091_v59 = vshrl.u32 %v1087_v47, 16 }
 0x19c   : > { %v806_v52 = vor.u32 4788187, %v805_v22  ;;  %vm1098_vm1 = vc.u32 %v1096_v6, %v1092_v27  ;;  %v1655_v57 = vand.u32 2147483647, %v3391_v46  ;;  %v4352_v63 = vadd.s32 %v1080_v30, %v1071_v18 }
 0x19d   : > { %v1099_v56 = vsel %vm1098_vm1, 1, %v3124_v5  ;;  %v4355_v58 = vadd.s32 %v1096_v6, %v1092_v27  ;;  %v809_v31 = vcvt.s32.f32 %v802_v28  ;;  %v1093_v13 = vshrl.u32 %v1088_v7, 16 }
 0x19e   : > { %v807_v34 = vand.u32 2147483647, %v806_v52  ;;  %v1101_v9 = vadd.s32 %v1099_v56, %v1097_v55  ;;  %v4358_v29 = vshrl.u32 %v4138_v21, 5  ;;  %v833_v26 = vadd.s32 3, %v816_v15 }
 0x19f   : > { %v1050_v37 = vsel %vm1044_vm5, %v1047_v61, %v1049_v53  ;;  %v1673_v32 = vshrl.u32 %v3125_v36, %v4287_v50  ;;  %v1662_v47 = vand.u32 8388607, %v1655_v57  ;;  %v1676_v8 = vshrl.u32 %v3127_v43, %v4287_v50 }
 0x1a0   : > { %v810_v33 = vmul.f32 %v809_v31, %v807_v34  ;;  %v1102_v0 = vadd.s32 %v1101_v9, %v1091_v59  ;;  %vm1106_vm2 = vc.u32 %v4352_v63, %v4355_v58  ;;  %v1672_v21 = vshll.u32 %v3126_v42, %v4243_v20 }
 0x1a1   : > { %v1675_v25 = vshll.u32 %v3125_v36, %v4243_v20  ;;  %v1679_v7 = vshrl.u32 %v3128_v49, %v4287_v50  ;;  %v1681_v1 = vshll.u32 %v3128_v49, %v4243_v20  ;;  %v1682_v23 = vshrl.u32 %v3129_v51, %v4287_v50 }
 0x1a2   : > { %v811_v11 = vxor.u32 2147483648, %v810_v33  ;;  %v1103_v60 = vadd.s32 %v1102_v0, %v1093_v13  ;;  %v4380_v54 = vor.u32 %v1673_v32, %v1672_v21  ;;  %v1678_v3 = vshll.u32 %v3127_v43, %v4243_v20 }
 0x1a3   : > { %v1684_v41 = vshll.u32 %v3129_v51, %v4243_v20  ;;  %v1685_v36 = vshrl.u32 %v3130_v10, %v4287_v50  ;;  %v4390_v14 = vor.u32 %v1676_v8, %v1675_v25  ;;  %v1683_v49 = vor.u32 %v1682_v23, %v1681_v1 }
 0x1a4   : > { %v812_v48 = vsel %vm691_vm7, %v811_v11, %v810_v33  ;;  %v1107_v44 = vadd.s32 1, %v1103_v60  ;;  %v1104_v2 = vmul.u32 %v4266_v19, %v1050_v37  ;;  %v4396_v43 = vor.u32 %v1679_v7, %v1678_v3 }
 0x1a5   : > { %v815_v4 = vsel %vm4314_vm13, %v3331_v12, %v812_v48  ;;  %v1686_v40 = vor.u32 %v1685_v36, %v1684_v41  ;;  %v1663_v20 = vor.u32 8388608, %v1662_v47  ;;  %vm1690_vm3 = vcmp.lt.s32.totalorder %v4358_v29, 4 }
 0x1a6   : > { %v817_v51 = vmul.f32 %v815_v4, %v815_v4  ;;  %v1108_v10 = vsel %vm1106_vm2, %v1107_v44, %v1103_v60  ;;  %vm1687_vm4 = vcmp.lt.s32.totalorder %v4358_v29, 1  ;;  %vm1688_vm5 = vcmp.lt.s32.totalorder %v4358_v29, 2 }
 0x1a7   : > { %v1109_v35 = vadd.s32 %v1108_v10, %v1104_v2  ;;  %v1696_v45 = vsel %vm1690_vm3, %v1683_v49, 920167782  ;;  %vm1689_vm6 = vcmp.lt.s32.totalorder %v4358_v29, 3  ;;  %v1695_v18 = vsel %vm1687_vm4, %v4380_v54, %v4390_v14 }
 0x1a8   : > { %v818_v19 = vmul.f32 -0.001358992, %v817_v51  ;;  %v825_v27 = vmul.f32 -0.00019511016, %v817_v51  ;;  %v1697_v28 = vsel %vm1689_vm6, %v4396_v43, %v1696_v45  ;;  %v1699_v22 = vsel %vm1687_vm4, %v4390_v14, %v4396_v43 }
 0x1a9   : > { %v1110_v30 = vadd.s32 536870912, %v1109_v35  ;;  %v1700_v16 = vsel %vm1690_vm3, %v1686_v40, 1326507024  ;;  %v4422_v53 = vshll.u32 %v1663_v20, 8  ;;  %v834_v34 = vand.u32 3, %v833_v26 }
 0x1aa   : > { %v819_v6 = vadd.f32 0.041655596, %v818_v19  ;;  %v826_v15 = vadd.f32 0.008332121, %v825_v27  ;;  %v1701_v61 = vsel %vm1689_vm6, %v1683_v49, %v1700_v16  ;;  %v1698_v31 = vsel %vm1688_vm5, %v1695_v18, %v1697_v28 }
 0x1ab   : > { %v4424_v55 = vshrl.u32 %v1110_v30, 30  ;;  %v1702_v52 = vsel %vm1688_vm5, %v1699_v22, %v1701_v61  ;;  %v1704_v9 = vand.u32 65535, %v4422_v53  ;;  %v1729_v21 = vshrl.u32 %v1698_v31, 16 }
 0x1ac   : > { %v820_v59 = vmul.f32 %v819_v6, %v817_v51  ;;  %v827_v56 = vmul.f32 %v826_v15, %v817_v51  ;;  %v1706_v37 = vand.u32 65535, %v1702_v52  ;;  %v1707_v32 = vshrl.u32 %v1702_v52, 16 }
 0x1ad   : > { %v1112_v13 = vshll.u32 %v4424_v55, 30  ;;  %vm835_vm7 = vcmp.lt.s32.totalorder %v834_v34, 2  ;;  %v1705_v11 = vshrl.u32 %v4422_v53, 16  ;;  %vm832_vm8 = vweird.f32 %v3331_v12 }
 0x1ae   : > { %v821_v33 = vadd.f32 -0.4999988, %v820_v59  ;;  %v828_v0 = vadd.f32 -0.16666654, %v827_v56  ;;  %v1709_v8 = vmul.u32 %v1707_v32, %v1704_v9  ;;  %vm836_vm9 = vcmp.eq.s32.totalorder %v834_v34, 0 }
 0x1af   : > { %v1113_v47 = vsub.s32 %v1109_v35, %v1112_v13  ;;  %v1708_v60 = vmul.u32 %v1706_v37, %v1704_v9  ;;  %v1710_v3 = vmul.u32 %v1706_v37, %v1705_v11  ;;  %vm839_vm11 = vcmp.eq.s32.totalorder %v834_v34, 2 }
 0x1b0   : > { %v822_v25 = vmul.f32 %v821_v33, %v817_v51  ;;  %v829_v7 = vmul.f32 %v828_v0, %v817_v51  ;;  %v1712_v41 = vshll.u32 %v1709_v8, 16  ;;  %v1728_v48 = vand.u32 65535, %v1698_v31 }
 0x1b1   : > { %vm1114_vm10 = vcmp.lt.s32.totalorder %v1113_v47, 0  ;;  %v1115_v26 = vsub.s32 0, %v1113_v47  ;;  %v1731_v44 = vmul.u32 %v1729_v21, %v1704_v9  ;;  %v1105_v51 = vadd.s32 %v4355_v58, %v4352_v63 }
 0x1b2   : > { %v823_v1 = vadd.f32 1.0, %v822_v25  ;;  %v830_v23 = vadd.f32 1.0, %v829_v7  ;;  %vm1716_vm12 = vc.u32 %v1708_v60, %v1712_v41  ;;  %v1671_v10 = vshrl.u32 %v3126_v42, %v4287_v50 }
 0x1b3   : > { %v1116_v36 = vsel %vm1114_vm10, %v1115_v26, %v1113_v47  ;;  %v1711_v20 = vmul.u32 %v1707_v32, %v1705_v11  ;;  %v1717_v35 = vsel %vm1716_vm12, 1, %v3124_v5  ;;  %v1714_v27 = vshll.u32 %v1710_v3, 16 }
 0x1b4   : > { %v831_v49 = vmul.f32 %v830_v23, %v815_v4  ;;  %v840_v2 = vxor.u32 2147483648, %v823_v1  ;;  %v1117_v40 = vclz %v1116_v36  ;;  %v1718_v18 = vadd.s32 %v1712_v41, %v1708_v60 }
 0x1b5   : > { %v1719_v30 = vadd.s32 %v1717_v35, %v1711_v20  ;;  %v1730_v28 = vmul.u32 %v1728_v48, %v1704_v9  ;;  %v1732_v22 = vmul.u32 %v1728_v48, %v1705_v11  ;;  %v1734_v4 = vshll.u32 %v1731_v44, 16  ;;  %v1843_v20 = vld [vmem:[#allocation7 + $0x108] sm:$0xff] }
 0x1b6   : > { %v837_v45 = vxor.u32 2147483648, %v831_v49  ;;  %v2751_v19 = vadd.s32 4294967294, %v1117_v40  ;;  %v841_v6 = vsel %vm839_vm11, %v840_v2, %v831_v49  ;;  %vm1720_vm14 = vc.u32 %v1718_v18, %v1714_v27 }
 0x1b7   : > { %v1713_v50 = vshrl.u32 %v1709_v8, 16  ;;  %v1721_v58 = vsel %vm1720_vm14, 1, %v3124_v5  ;;  %v1733_v59 = vmul.u32 %v1729_v21, %v1705_v11  ;;  %v1736_v31 = vshll.u32 %v1732_v22, 16  ;;  %v1915_v11 = vld [vmem:[#allocation7 + $0x348] sm:$0xff] }
 0x1b8   : > { %v838_v16 = vsel %vm836_vm9, %v823_v1, %v837_v45  ;;  %vm2752_vm13 = vcmp.lt.s32.totalorder %v2751_v19, 0  ;;  %v1723_v56 = vadd.s32 %v1721_v58, %v1719_v30  ;;  %vm1738_vm15 = vc.u32 %v1730_v28, %v1734_v4  ;;  %2116 = vmatpush.msrb.mxu3 %v1915_v11 }
 0x1b9   : > { %v842_v63 = vsel %vm835_vm7, %v838_v16, %v841_v6  ;;  %v1120_v42 = vsel %vm2752_vm13, 0, %v2751_v19  ;;  %v1740_v13 = vadd.s32 %v1734_v4, %v1730_v28  ;;  %v1739_v32 = vsel %vm1738_vm15, 1, %v3124_v5 }
 0x1ba   : > { %v4445_v15 = vsel %vm832_vm8, nan, %v842_v63  ;;  %v1121_v61 = vsub.s32 32, %v1120_v42  ;;  %v1125_v52 = vsub.s32 4294967266, %v1120_v42  ;;  %v1122_v9 = vshll.u32 %v1113_v47, %v1120_v42 }
 0x1bb   : > { %1963 = vmatmul.f32.gmra.mxu0 %v4445_v15  ;;  %v1692_v12 = vsel %vm1690_vm3, %v4396_v43, 2102212464  ;;  %v1724_v33 = vadd.s32 %v1723_v56, %v1713_v50  ;;  %v1741_v0 = vadd.s32 %v1739_v32, %v1733_v59  ;;  %vm1742_vm0 = vc.u32 %v1740_v13, %v1736_v31 }
 0x1bc   : > { %v1123_v34 = vshrl.u32 %v1105_v51, %v1121_v61  ;;  %v1126_v37 = vadd.s32 127, %v1125_v52  ;;  %v1715_v25 = vshrl.u32 %v1710_v3, 16  ;;  %v1743_v7 = vsel %vm1742_vm0, 1, %v3124_v5 }
 0x1bd   : > { %v1735_v26 = vshrl.u32 %v1731_v44, 16  ;;  %v1745_v60 = vadd.s32 %v1743_v7, %v1741_v0  ;;  %v1691_v1 = vsel %vm1687_vm4, %v1671_v10, %v4380_v54  ;;  %v1693_v43 = vsel %vm1689_vm6, %v4390_v14, %v1692_v12 }
 0x1be   : > { %v1124_v8 = vor.u32 %v1123_v34, %v1122_v9  ;;  %v1127_v21 = vshll.u32 %v1126_v37, 23  ;;  %v1725_v23 = vadd.s32 %v1724_v33, %v1715_v25  ;;  %v1737_v41 = vshrl.u32 %v1732_v22, 16 }
 0x1bf   : > { %v1746_v36 = vadd.s32 %v1745_v60, %v1735_v26  ;;  %v1744_v49 = vadd.s32 %v1740_v13, %v1736_v31  ;;  %v1694_v5 = vsel %vm1688_vm5, %v1691_v1, %v1693_v43  ;;  %vm1013_vm2 = vcmp.lt.s32.totalorder %v3339_v17, 0 }
 0x1c0   : > { %v1128_v47 = vor.u32 4788187, %v1127_v21  ;;  %v1131_v3 = vcvt.s32.f32 %v1124_v8  ;;  %v1748_v54 = vmul.u32 %v4422_v53, %v1694_v5  ;;  %v1135_v14 = vsub.s32 4, %v4424_v55  ;;  %v1913_v5 = vld [vmem:[#allocation7 + $0x338] sm:$0xff] }
 0x1c1   : > { %v1747_v44 = vadd.s32 %v1746_v36, %v1737_v41  ;;  %vm1750_vm1 = vc.u32 %v1725_v23, %v1744_v49  ;;  %vm4466_vm3 = vcmp.le.f32.partialorder %v1011_v38, 0.7853982  ;;  %v1749_v8 = vadd.s32 %v1744_v49, %v1725_v23  ;;  %v1815_v23 = vld [vmem:[#allocation7 + $0x28] sm:$0xff]  ;;  %2117 = vmatpush.msrb.mxu3 %v1913_v5  ;;  %v2146_v5 = vld [vmem:[#allocation9 + $0x70] sm:$0xff] }
 0x1c2   : > { %v1129_v48 = vand.u32 2147483647, %v1128_v47  ;;  %v1136_v53 = vsel %vm1013_vm2, %v1135_v14, %v4424_v55  ;;  %vm1154_vm8 = vweird.f32 %v3339_v17  ;;  %v1847_v49 = vld [vmem:[#allocation7 + $0x128] sm:$0xff]  ;;  %v1909_v14 = vld [vmem:[#allocation7 + $0x318] sm:$0xff]  ;;  %vm1657_vm10 = vcmp.lt.s32.totalorder %v3391_v46, 0 }
 0x1c3   : > { %v1751_v40 = vadd.s32 1, %v1747_v44  ;;  %v1138_v38 = vsel %vm4466_vm3, 0, %v1136_v53  ;;  %vm4485_vm11 = vcmp.le.f32.partialorder %v1655_v57, 0.7853982  ;;  %v2162_v57 = vld [vmem:[#allocation9 + $0xf0] sm:$0xff]  ;;  %vm1798_vm15 = vweird.f32 %v3391_v46 }
 0x1c4   : > { %v1132_v2 = vmul.f32 %v1131_v3, %v1129_v48  ;;  %v1155_v50 = vadd.s32 3, %v1138_v38  ;;  %v1817_v48 = vld [vmem:[#allocation7 + $0x38] sm:$0xff] }
 0x1c5   : > { %v1752_v10 = vsel %vm1750_vm1, %v1751_v40, %v1747_v44  ;;  %v1849_v3 = vld [vmem:[#allocation7 + $0x138] sm:$0xff]  ;;  %2048 = vmatpush.msrb.mxu0 %v1817_v48 }
 0x1c6   : > { %v1133_v51 = vxor.u32 2147483648, %v1132_v2  ;;  %v1753_v35 = vadd.s32 %v1752_v10, %v1748_v54  ;;  %v1156_v34 = vand.u32 3, %v1155_v50  ;;  %2071 = vmatpush.msrb.mxu1 %v1849_v3  ;;  %v1845_v40 = vld [vmem:[#allocation7 + $0x118] sm:$0xff]  ;;  %v1811_v10 = vld [vmem:[#allocation7 + $0x8] sm:$0xff] }
 0x1c7   : > { %2049 = vmatpush.msrb.mxu0 %v1815_v23  ;;  %v2190_v23 = vld [vmem:[#allocation9 + $0x1d0] sm:$0xff] }
 0x1c8   : > { %v1134_v29 = vsel %vm1013_vm2, %v1133_v51, %v1132_v2  ;;  %v1754_v27 = vadd.s32 536870912, %v1753_v35  ;;  %vm1158_vm6 = vcmp.eq.s32.totalorder %v1156_v34, 0  ;;  %vm1161_vm7 = vcmp.eq.s32.totalorder %v1156_v34, 2  ;;  %v1813_v2 = vld [vmem:[#allocation7 + $0x18] sm:$0xff]  ;;  %2072 = vmatpush.msrb.mxu1 %v1847_v49 }
 0x1c9   : > { %v1137_v45 = vsel %vm4466_vm3, %v3339_v17, %v1134_v29  ;;  %vm1157_vm9 = vcmp.lt.s32.totalorder %v1156_v34, 2  ;;  %v1911_v17 = vld [vmem:[#allocation7 + $0x328] sm:$0xff]  ;;  %2050 = vmatpush.msrb.mxu0 %v1813_v2  ;;  %v2155_v34 = vld [vmem:[#allocation9 + $0xb8] sm:$0xff]  ;;  %v2144_v2 = vld [vmem:[#allocation9 + $0x60] sm:$0xff] }
 0x1ca   : > { %v1139_v19 = vmul.f32 %v1137_v45, %v1137_v45  ;;  %v4474_v28 = vshrl.u32 %v1754_v27, 30  ;;  %2118 = vmatpush.msrb.mxu3 %v1911_v17  ;;  %2073 = vmatpush.msrb.mxu1 %v1845_v40  ;;  %v2191_v17 = vld [vmem:[#allocation9 + $0x1d8] sm:$0xff]  ;;  %v2145_v40 = vld [vmem:[#allocation9 + $0x68] sm:$0xff] }
 0x1cb   : > { %2051 = vmatpush.msrb.mxu0 %v1811_v10  ;;  %v2142_v10 = vld [vmem:[#allocation9 + $0x50] sm:$0xff] }
 0x1cc   : > { %v1140_v18 = vmul.f32 -0.001358992, %v1139_v19  ;;  %v1147_v30 = vmul.f32 -0.00019511016, %v1139_v19  ;;  %v1756_v16 = vshll.u32 %v4474_v28, 30  ;;  %2119 = vmatpush.msrb.mxu3 %v1909_v14  ;;  %2074 = vmatpush.msrb.mxu1 %v1843_v20  ;;  %v1779_v53 = vsub.s32 4, %v4474_v28 }
 0x1cd   : > { %2052 = vmatmul.f32.vlgmr.msrb.gmra.mxu0 %v4183_v24  ;;  %v2186_v14 = vld [vmem:[#allocation9 + $0x1b0] sm:$0xff]  ;;  %v2143_v20 = vld [vmem:[#allocation9 + $0x58] sm:$0xff] }
 0x1ce   : > { %v1141_v22 = vadd.f32 0.041655596, %v1140_v18  ;;  %v1148_v4 = vadd.f32 0.008332121, %v1147_v30  ;;  %v1757_v42 = vsub.s32 %v1753_v35, %v1756_v16  ;;  %v1907_v35 = vld [vmem:[#allocation7 + $0x308] sm:$0xff]  ;;  %v1780_v24 = vsel %vm1657_vm10, %v1779_v53, %v4474_v28  ;;  %v2163_v16 = vld [vmem:[#allocation9 + $0xf8] sm:$0xff]  ;;  %2202 = vmatpush.msra.mxu0 %v2162_v57 }
 0x1cf   : > { %2120 = vmatpush.msrb.mxu3 %v1907_v35  ;;  %2248 = vmatpush.msra.mxu2 %v2163_v16  ;;  %v2140_v35 = vld [vmem:[#allocation9 + $0x40] sm:$0xff]  ;;  %v2185_v53 = vld [vmem:[#allocation9 + $0x1a8] sm:$0xff] }
 0x1d0   : > { %v1142_v6 = vmul.f32 %v1141_v22, %v1139_v19  ;;  %v1149_v63 = vmul.f32 %v1148_v4, %v1139_v19  ;;  %vm1758_vm4 = vcmp.lt.s32.totalorder %v1757_v42, 0  ;;  %v1759_v52 = vsub.s32 0, %v1757_v42 }
 0x1d2   : > { %v1143_v58 = vadd.f32 -0.4999988, %v1142_v6  ;;  %v1150_v61 = vadd.f32 -0.16666654, %v1149_v63  ;;  %v1760_v56 = vsel %vm1758_vm4, %v1759_v52, %v1757_v42  ;;  %v2160_v6 = vld [vmem:[#allocation9 + $0xe0] sm:$0xff]  ;;  %v1782_v63 = vsel %vm4485_vm11, 0, %v1780_v24 }
 0x1d3   : > { %v1761_v31 = vclz %v1760_v56  ;;  %v2159_v52 = vld [vmem:[#allocation9 + $0xd8] sm:$0xff]  ;;  %2203 = vmatpush.msra.mxu0 %v2160_v6  ;;  %v2157_v56 = vld [vmem:[#allocation9 + $0xc8] sm:$0xff]  ;;  %v2030_v6 = vpop.f32.mrf.mxu3 }
 0x1d4   : > { %v1144_v55 = vmul.f32 %v1143_v58, %v1139_v19  ;;  %v1151_v59 = vmul.f32 %v1150_v61, %v1139_v19  ;;  %v2161_v58 = vld [vmem:[#allocation9 + $0xe8] sm:$0xff]  ;;  %v2158_v61 = vld [vmem:[#allocation9 + $0xd0] sm:$0xff] }
 0x1d5   : > { %v2763_v37 = vadd.s32 4294967294, %v1761_v31  ;;  %2055 = vmatmul.f32.gmra.mxu0 %v4445_v15  ;;  %2249 = vmatpush.msra.mxu2 %v2161_v58  ;;  %v2156_v15 = vld [vmem:[#allocation9 + $0xc0] sm:$0xff]  ;;  %v2138_v19 = vld [vmem:[#allocation9 + $0x30] sm:$0xff]  ;;  %v2135_v58 = vld [vmem:[#allocation9 + $0x18] sm:$0xff] }
 0x1d6   : > { %v1145_v13 = vadd.f32 1.0, %v1144_v55  ;;  %v1152_v9 = vadd.f32 1.0, %v1151_v59  ;;  %v1799_v59 = vadd.s32 3, %v1782_v63  ;;  %2204 = vmatpush.msra.mxu0 %v2158_v61  ;;  %v2182_v61 = vld [vmem:[#allocation9 + $0x190] sm:$0xff] }
 0x1d7   : > { %vm2764_vm5 = vcmp.lt.s32.totalorder %v2763_v37, 0  ;;  %2250 = vmatpush.msra.mxu2 %v2159_v52  ;;  %v2183_v52 = vld [vmem:[#allocation9 + $0x198] sm:$0xff] }
 0x1d8   : > { %v1153_v32 = vmul.f32 %v1152_v9, %v1137_v45  ;;  %v1162_v12 = vxor.u32 2147483648, %v1145_v13  ;;  %v1764_v0 = vsel %vm2764_vm5, 0, %v2763_v37  ;;  %v2154_v9 = vld [vmem:[#allocation9 + $0xb0] sm:$0xff]  ;;  %2205 = vmatpush.msra.mxu0 %v2156_v15  ;;  %v2181_v15 = vld [vmem:[#allocation9 + $0x188] sm:$0xff] }
 0x1d9   : > { %v1765_v21 = vsub.s32 32, %v1764_v0  ;;  %v1769_v25 = vsub.s32 4294967266, %v1764_v0  ;;  %v1766_v60 = vshll.u32 %v1757_v42, %v1764_v0  ;;  %v2194_v37 = vld [vmem:[#allocation9 + $0x1f0] sm:$0xff]  ;;  %2251 = vmatpush.msra.mxu2 %v2157_v56  ;;  %v2192_v0 = vld [vmem:[#allocation9 + $0x1e0] sm:$0xff] }
 0x1da   : > { %v1159_v33 = vxor.u32 2147483648, %v1153_v32  ;;  %v1163_v11 = vsel %vm1161_vm7, %v1162_v12, %v1153_v32  ;;  %v2195_v32 = vld [vmem:[#allocation9 + $0x1f8] sm:$0xff]  ;;  %2225 = vmatpush.msra.mxu1 %v2194_v37  ;;  %2206 = vmatpush.msra.mxu0 %v2154_v9  ;;  %v2178_v56 = vld [vmem:[#allocation9 + $0x170] sm:$0xff]  ;;  %v2177_v9 = vld [vmem:[#allocation9 + $0x168] sm:$0xff] }
 0x1db   : > { %v1767_v47 = vshrl.u32 %v1749_v8, %v1765_v21  ;;  %v1770_v1 = vadd.s32 127, %v1769_v25  ;;  %v1800_v8 = vand.u32 3, %v1799_v59  ;;  %v2152_v21 = vld [vmem:[#allocation9 + $0xa0] sm:$0xff]  ;;  %v2153_v25 = vld [vmem:[#allocation9 + $0xa8] sm:$0xff]  ;;  %2271 = vmatpush.msra.mxu3 %v2195_v32  ;;  %2252 = vmatpush.msra.mxu2 %v2155_v34  ;;  %v2174_v34 = vld [vmem:[#allocation9 + $0x150] sm:$0xff] }
 0x1dc   : > { %v1160_v7 = vsel %vm1158_vm6, %v1145_v13, %v1159_v33  ;;  %2226 = vmatpush.msra.mxu1 %v2192_v0  ;;  %2207 = vmatpush.msra.mxu0 %v2152_v21  ;;  %v2180_v59 = vld [vmem:[#allocation9 + $0x180] sm:$0xff]  ;;  %v2175_v37 = vld [vmem:[#allocation9 + $0x158] sm:$0xff]  ;;  %v2169_v21 = vld [vmem:[#allocation9 + $0x128] sm:$0xff] }
 0x1dd   : > { %v1164_v26 = vsel %vm1157_vm9, %v1160_v7, %v1163_v11  ;;  %v1768_v41 = vor.u32 %v1767_v47, %v1766_v60  ;;  %v1771_v36 = vshll.u32 %v1770_v1, 23  ;;  %v2193_v7 = vld [vmem:[#allocation9 + $0x1e8] sm:$0xff]  ;;  %v2150_v60 = vld [vmem:[#allocation9 + $0x90] sm:$0xff]  ;;  %v2151_v47 = vld [vmem:[#allocation9 + $0x98] sm:$0xff]  ;;  %2253 = vmatpush.msra.mxu2 %v2153_v25  ;;  %vm1802_vm12 = vcmp.eq.s32.totalorder %v1800_v8, 0 }
 0x1de   : > { %v1165_v43 = vsel %vm1154_vm8, nan, %v1164_v26  ;;  %2272 = vmatpush.msra.mxu3 %v2193_v7  ;;  %vm1805_vm13 = vcmp.eq.s32.totalorder %v1800_v8, 2  ;;  %vm1801_vm14 = vcmp.lt.s32.totalorder %v1800_v8, 2  ;;  %2208 = vmatpush.msra.mxu0 %v2150_v60  ;;  %v2172_v32 = vld [vmem:[#allocation9 + $0x140] sm:$0xff]  ;;  %v2171_v0 = vld [vmem:[#allocation9 + $0x138] sm:$0xff]  ;;  %v2166_v25 = vld [vmem:[#allocation9 + $0x110] sm:$0xff] }
 0x1df   : > { %1986 = vmatmul.f32.gmra.mxu1 %v1165_v43  ;;  %v1772_v44 = vor.u32 4788187, %v1771_v36  ;;  %v1775_v54 = vcvt.s32.f32 %v1768_v41  ;;  %v2149_v41 = vld [vmem:[#allocation9 + $0x88] sm:$0xff]  ;;  %2254 = vmatpush.msra.mxu2 %v2151_v47  ;;  %v2168_v8 = vld [vmem:[#allocation9 + $0x120] sm:$0xff]  ;;  %v2167_v7 = vld [vmem:[#allocation9 + $0x118] sm:$0xff] }
 0x1e0   : > { %2227 = vmatpush.msra.mxu1 %v2190_v23  ;;  %2273 = vmatpush.msra.mxu3 %v2191_v17 }
 0x1e1   : > { %v1773_v51 = vand.u32 2147483647, %v1772_v44  ;;  %v2147_v44 = vld [vmem:[#allocation9 + $0x78] sm:$0xff]  ;;  %2255 = vmatpush.msra.mxu2 %v2149_v41 }
 0x1e3   : > { %v1776_v29 = vmul.f32 %v1775_v54, %v1773_v51  ;;  %v2188_v51 = vld [vmem:[#allocation9 + $0x1c0] sm:$0xff]  ;;  %2256 = vmatpush.msra.mxu2 %v2147_v44  ;;  %v2189_v54 = vld [vmem:[#allocation9 + $0x1c8] sm:$0xff] }
 0x1e4   : > { %2228 = vmatpush.msra.mxu1 %v2188_v51  ;;  %2274 = vmatpush.msra.mxu3 %v2189_v54 }
 0x1e5   : > { %v1777_v45 = vxor.u32 2147483648, %v1776_v29  ;;  %2257 = vmatpush.msra.mxu2 %v2145_v40 }
 0x1e6   : > { %2229 = vmatpush.msra.mxu1 %v2186_v14 }
 0x1e7   : > { %2075 = vmatmul.f32.vlgmr.msrb.gmra.mxu1 %v4338_v62  ;;  %v1778_v27 = vsel %vm1657_vm10, %v1777_v45, %v1776_v29  ;;  %v2184_v29 = vld [vmem:[#allocation9 + $0x1a0] sm:$0xff]  ;;  %v2141_v45 = vld [vmem:[#allocation9 + $0x48] sm:$0xff]  ;;  %2258 = vmatpush.msra.mxu2 %v2143_v20 }
 0x1e8   : > { %v1781_v18 = vsel %vm4485_vm11, %v3391_v46, %v1778_v27  ;;  %v2187_v46 = vld [vmem:[#allocation9 + $0x1b8] sm:$0xff]  ;;  %2230 = vmatpush.msra.mxu1 %v2184_v29 }
 0x1e9   : > { %v1783_v30 = vmul.f32 %v1781_v18, %v1781_v18  ;;  %v2139_v27 = vld [vmem:[#allocation9 + $0x38] sm:$0xff]  ;;  %2275 = vmatpush.msra.mxu3 %v2187_v46  ;;  %2259 = vmatpush.msra.mxu2 %v2141_v45 }
 0x1ea   : > { %2231 = vmatpush.msra.mxu1 %v2182_v61 }
 0x1eb   : > { %v1784_v38 = vmul.f32 -0.001358992, %v1783_v30  ;;  %v1791_v22 = vmul.f32 -0.00019511016, %v1783_v30  ;;  %2260 = vmatpush.msra.mxu2 %v2139_v27  ;;  %2276 = vmatpush.msra.mxu3 %v2185_v53 }
 0x1ec   : > { %2232 = vmatpush.msra.mxu1 %v2180_v59 }
 0x1ed   : > { %v1785_v62 = vadd.f32 0.041655596, %v1784_v38  ;;  %v1792_v4 = vadd.f32 0.008332121, %v1791_v22  ;;  %v4502_v38 = vld [vmem:[%s4670_s5] sm:$0x3]  ;;  %2277 = vmatpush.msra.mxu3 %v2183_v52 }
 0x1ee   : > { %v1940_v22 = vperm.slane %v4502_v38, 0  ;;  %2233 = vmatpush.msra.mxu1 %v2178_v56 }
 0x1ef   : > { %2078 = vmatmul.f32.gmra.mxu1 %v1165_v43  ;;  %v1786_v42 = vmul.f32 %v1785_v62, %v1783_v30  ;;  %v1793_v50 = vmul.f32 %v1792_v4, %v1783_v30  ;;  %v2148_v43 = vld [vmem:[#allocation9 + $0x80] sm:$0xff]  ;;  %2278 = vmatpush.msra.mxu3 %v2181_v15 }
 0x1f0   : > { %2209 = vmatpush.msra.mxu0 %v2148_v43 }
 0x1f1   : > { %v1787_v55 = vadd.f32 -0.4999988, %v1786_v42  ;;  %v1794_v28 = vadd.f32 -0.16666654, %v1793_v50  ;;  %v2134_v50 = vld [vmem:[#allocation9 + $0x10] sm:$0xff] }
 0x1f2   : > { %2210 = vmatpush.msra.mxu0 %v2146_v5 }
 0x1f3   : > { %v1788_v31 = vmul.f32 %v1787_v55, %v1783_v30  ;;  %v1795_v13 = vmul.f32 %v1794_v28, %v1783_v30  ;;  %v2137_v30 = vld [vmem:[#allocation9 + $0x28] sm:$0xff]  ;;  %v1961_v24 = vpop.f32.mrf.mxu0  ;;  %v2132_v55 = vld [vmem:[#allocation9] sm:$0xff] }
 0x1f4   : > { %2211 = vmatpush.msra.mxu0 %v2144_v2  ;;  %2261 = vmatpush.msra.mxu2 %v2137_v30  ;;  %v1962_v62 = vadd.f32 %v1961_v24, %v1940_v22  ;;  %v2133_v28 = vld [vmem:[#allocation9 + $0x8] sm:$0xff]  ;;  %v2298_v30 = vld [vmem:[#allocation4] sm:$0xff]  ;;  %v2301_v24 = vld [vmem:[#allocation4 + $0x18] sm:$0xff] }
 0x1f5   : > { %v1789_v12 = vadd.f32 1.0, %v1788_v31  ;;  %v1796_v33 = vadd.f32 1.0, %v1795_v13  ;;  %v2179_v31 = vld [vmem:[#allocation9 + $0x178] sm:$0xff]  ;;  %v2176_v13 = vld [vmem:[#allocation9 + $0x160] sm:$0xff]  ;;  %2302 = vst [vmem:[#allocation2 + $0x10] sm:$0xff] %v2298_v30 }
 0x1f6   : > { %2212 = vmatpush.msra.mxu0 %v2142_v10  ;;  %2262 = vmatpush.msra.mxu2 %v2135_v58  ;;  %2305 = vst [vmem:[#allocation2 + $0x8] sm:$0xff] %v2301_v24 }
 0x1f7   : > { %v1797_v11 = vmul.f32 %v1796_v33, %v1781_v18  ;;  %v1806_v26 = vxor.u32 2147483648, %v1789_v12  ;;  %v2136_v18 = vld [vmem:[#allocation9 + $0x20] sm:$0xff]  ;;  %2279 = vmatpush.msra.mxu3 %v2179_v31  ;;  %2234 = vmatpush.msra.mxu1 %v2176_v13  ;;  %v2170_v33 = vld [vmem:[#allocation9 + $0x130] sm:$0xff] }
 0x1f8   : > { %2213 = vmatpush.msra.mxu0 %v2140_v35  ;;  %2263 = vmatpush.msra.mxu2 %v2133_v28 }
 0x1f9   : > { %v1803_v1 = vxor.u32 2147483648, %v1797_v11  ;;  %v1807_v48 = vsel %vm1805_vm13, %v1806_v26, %v1797_v11  ;;  %2280 = vmatpush.msra.mxu3 %v2177_v9  ;;  %2235 = vmatpush.msra.mxu1 %v2174_v34  ;;  %v2164_v11 = vld [vmem:[#allocation9 + $0x100] sm:$0xff]  ;;  %v2165_v26 = vld [vmem:[#allocation9 + $0x108] sm:$0xff] }
 0x1fa   : > { %2214 = vmatpush.msra.mxu0 %v2138_v19 }
 0x1fb   : > { %v1804_v36 = vsel %vm1802_vm12, %v1789_v12, %v1803_v1  ;;  %v2173_v12 = vld [vmem:[#allocation9 + $0x148] sm:$0xff]  ;;  %2281 = vmatpush.msra.mxu3 %v2175_v37  ;;  %2236 = vmatpush.msra.mxu1 %v2172_v32 }
 0x1fc   : > { %v1808_v3 = vsel %vm1801_vm14, %v1804_v36, %v1807_v48  ;;  %2215 = vmatpush.msra.mxu0 %v2136_v18  ;;  %v1941_v48 = vperm.slane %v4502_v38, 1  ;;  %v2299_v38 = vld [vmem:[#allocation4 + $0x8] sm:$0xff] }
 0x1fd   : > { %v1809_v49 = vsel %vm1798_vm15, nan, %v1808_v3  ;;  %2282 = vmatpush.msra.mxu3 %v2173_v12  ;;  %2237 = vmatpush.msra.mxu1 %v2170_v33  ;;  %2303 = vst [vmem:[#allocation2] sm:$0xff] %v2299_v38 }
 0x1fe   : > { %2032 = vmatmul.f32.gmra.mxu3 %v1809_v49  ;;  %2216 = vmatpush.msra.mxu0 %v2134_v50 }
 0x1ff   : > { %2283 = vmatpush.msra.mxu3 %v2171_v0  ;;  %2238 = vmatpush.msra.mxu1 %v2168_v8 }
 0x200   : > { %2217 = vmatpush.msra.mxu0 %v2132_v55 }
 0x201   : > { %2284 = vmatpush.msra.mxu3 %v2169_v21  ;;  %2239 = vmatpush.msra.mxu1 %v2166_v25 }
 0x203   : > { %2285 = vmatpush.msra.mxu3 %v2167_v7  ;;  %2240 = vmatpush.msra.mxu1 %v2164_v11 }
 0x205   : > { %2286 = vmatpush.msra.mxu3 %v2165_v26 }
 0x206   : > { %2121 = vmatmul.f32.vlgmr.msrb.gmra.mxu3 %v3880_v39  ;;  %v2007_v39 = vpop.f32.mrf.mxu2 }
 0x20e   : > { %2124 = vmatmul.f32.gmra.mxu3 %v1809_v49  ;;  %v2010_v43 = vpop.f32.mrf.mxu2 }
 0x216   : > { %v1984_v4 = vpop.f32.mrf.mxu1  ;;  %v2099_v2 = vpop.f32.mrf.mxu2 }
 0x217   : > { %v1985_v57 = vadd.f32 %v1984_v4, %v1962_v62  ;;  %v2196_v62 = vld [vmem:[%s4672_s7] sm:$0x3] }
 0x219   : > { %v2008_v16 = vadd.f32 %v2007_v39, %v1985_v57  ;;  %v2198_v57 = vperm.slane %v2196_v62, 0 }
 0x21b   : > { %v2031_v63 = vadd.f32 %v2030_v6, %v2008_v16 }
 0x21d   : > { %v2128_v42 = vmax.f32 %v2031_v63, 0.0  ;;  %v2199_v63 = vperm.slane %v2196_v62, 1 }
 0x21e   : > { %v2102_v45 = vpop.f32.mrf.mxu2 }
 0x21f   : > { %2218 = vmatmul.f32.vlgmr.msra.gmra.mxu0 %v2128_v42  ;;  %2264 = vmatmul.f32.vlgmr.msra.gmra.mxu2 %v2128_v42 }
 0x238   : > { %v1964_v60 = vpop.f32.mrf.mxu0 }
 0x239   : > { %v1965_v1 = vadd.f32 %v1964_v60, %v1940_v22  ;;  %v2300_v22 = vld [vmem:[#allocation4 + $0x10] sm:$0xff] }
 0x23a   : > { %2304 = vst [vmem:[#allocation2 + $0x18] sm:$0xff] %v2300_v22 }
 0x24a   : > { %v2053_v41 = vpop.f32.mrf.mxu0 }
 0x24b   : > { %v2054_v5 = vadd.f32 %v2053_v41, %v1941_v48 }
 0x252   : > { %v2056_v40 = vpop.f32.mrf.mxu0 }
 0x253   : > { %v2057_v14 = vadd.f32 %v2056_v40, %v1941_v48 }
 0x25c   : > { %v1987_v47 = vpop.f32.mrf.mxu1 }
 0x25d   : > { %v1988_v36 = vadd.f32 %v1987_v47, %v1965_v1 }
 0x25f   : > { %v2011_v3 = vadd.f32 %v2010_v43, %v1988_v36 }
 0x264   : > { %v2076_v44 = vpop.f32.mrf.mxu1 }
 0x265   : > { %v2077_v17 = vadd.f32 %v2076_v44, %v2054_v5 }
 0x267   : > { %v2100_v54 = vadd.f32 %v2099_v2, %v2077_v17 }
 0x26c   : > { %v2079_v20 = vpop.f32.mrf.mxu1 }
 0x26d   : > { %v2080_v29 = vadd.f32 %v2079_v20, %v2057_v14 }
 0x26f   : > { %v2103_v19 = vadd.f32 %v2102_v45, %v2080_v29 }
 0x281   : > { %v2033_v23 = vpop.f32.mrf.mxu3 }
 0x282   : > { %v2034_v49 = vadd.f32 %v2033_v23, %v2011_v3 }
 0x284   : > { %v2130_v51 = vmax.f32 %v2034_v49, 0.0 }
 0x286   : > { %2221 = vmatmul.f32.gmra.mxu0 %v2130_v51  ;;  %2267 = vmatmul.f32.gmra.mxu2 %v2130_v51 }
 0x289   : > { %v2122_v10 = vpop.f32.mrf.mxu3 }
 0x28a   : > { %v2123_v46 = vadd.f32 %v2122_v10, %v2100_v54 }
 0x28c   : > { %v2129_v35 = vmax.f32 %v2123_v46, 0.0 }
 0x28e   : > { %2241 = vmatmul.f32.vlgmr.msra.gmra.mxu1 %v2129_v35  ;;  %2287 = vmatmul.f32.vlgmr.msra.gmra.mxu3 %v2129_v35 }
 0x291   : > { %v2125_v27 = vpop.f32.mrf.mxu3 }
 0x292   : > { %v2126_v53 = vadd.f32 %v2125_v27, %v2103_v19 }
 0x294   : > { %v2131_v18 = vmax.f32 %v2126_v53, 0.0 }
 0x296   : > { %2244 = vmatmul.f32.gmra.mxu1 %v2131_v18  ;;  %2290 = vmatmul.f32.gmra.mxu3 %v2131_v18 }
 0x29c   : > { %v2219_v4 = vpop.f32.mrf.mxu0 }
 0x29d   : > { %v2220_v39 = vadd.f32 %v2219_v4, %v2198_v57 }
 0x2a2   : > { %v2265_v16 = vpop.f32.mrf.mxu2 }
 0x2a3   : > { %v2266_v58 = vadd.f32 %v2265_v16, %v2199_v63 }
 0x303   : > { %v2222_v50 = vpop.f32.mrf.mxu0 }
 0x304   : > { %v2223_v52 = vadd.f32 %v2222_v50, %v2198_v57 }
 0x309   : > { %v2268_v15 = vpop.f32.mrf.mxu2 }
 0x30a   : > { %v2269_v56 = vadd.f32 %v2268_v15, %v2199_v63 }
 0x30b   : > { %v2242_v6 = vpop.f32.mrf.mxu1 }
 0x30c   : > { %v2243_v42 = vadd.f32 %v2242_v6, %v2220_v39 }
 0x30e   : > { %2294 = vst [vmem:[#allocation3] sm:$0xff] %v2243_v42 }
 0x311   : > { %v2288_v61 = vpop.f32.mrf.mxu3 }
 0x312   : > { %v2289_v55 = vadd.f32 %v2288_v61, %v2266_v58 }
 0x313   : > { %v2245_v28 = vpop.f32.mrf.mxu1 }
 0x314   : > { %2295 = vst [vmem:[#allocation3 + $0x18] sm:$0xff] %v2289_v55  ;;  %v2246_v59 = vadd.f32 %v2245_v28, %v2223_v52 }
 0x316   : > { %2296 = vst [vmem:[#allocation3 + $0x8] sm:$0xff] %v2246_v59 }
 0x319   : > { %v2291_v31 = vpop.f32.mrf.mxu3 }
 0x31a   : > { %v2292_v13 = vadd.f32 %v2291_v31, %v2269_v56 }
 0x31c   : > { %2297 = vst [vmem:[#allocation3 + $0x10] sm:$0xff] %v2292_v13 }
 0x31d PF: > { %s2773_s27 = sshll.u32 %s3105_s24, 9  ;;  %v4563_v63 = vld [vmem:[#allocation2 + $0x10] sm:$0xff]  ;;  %v2380_v42 = vld [vmem:[#allocation3] sm:$0xff]  ;;  %v2381_v28 = vld [vmem:[#allocation3 + $0x18] sm:$0xff]  ;;  %s2767_s16 = sshll.u32 %s3105_s24, 1 }
 0x31e   : > { %s4510_s23 = scalar_lea.vmem [#allocation10], %s2773_s27  ;;  %v4567_v61 = vld [vmem:[#allocation2] sm:$0xff]  ;;  %s2374_s26 = scalar_lea.vmem %s4674_s9, %s2767_s16 }
 0x31f   : > { %v2340_v9 = vld [vmem:[%s4510_s23 + $0xf8] sm:$0xff]  ;;  %v2338_v34 = vld [vmem:[%s4510_s23 + $0xe8] sm:$0xff]  ;;  %v2339_v12 = vld [vmem:[%s4510_s23 + $0xf0] sm:$0xff]  ;;  %s2774_s18 = sshll.u32 %s3105_s24, 5  ;;  %s4720_s20 = sld [smem:[#allocation26_spill]] }
 0x320   : > { %v2372_v37 = vld [vmem:[%s4510_s23 + $0x1f8] sm:$0xff]  ;;  %2439 = vmatpush.msra.mxu2 %v2340_v9  ;;  %v2370_v32 = vld [vmem:[%s4510_s23 + $0x1e8] sm:$0xff]  ;;  %2393 = vmatpush.msra.mxu0 %v2339_v12  ;;  %v2337_v8 = vld [vmem:[%s4510_s23 + $0xe0] sm:$0xff]  ;;  %v2384_v9 = vadd.f32 %v2380_v42, %v4563_v63  ;;  %s2600_s28 = sshll.u32 %s3307_s21, 4  ;;  %s2601_s28 = int_to_ptr.vmem [resolvable:$true] %s2600_s28 }
 0x321   : > { %2462 = vmatpush.msra.mxu3 %v2372_v37  ;;  %v2336_v33 = vld [vmem:[%s4510_s23 + $0xd8] sm:$0xff]  ;;  %v2334_v21 = vld [vmem:[%s4510_s23 + $0xc8] sm:$0xff]  ;;  %v2371_v25 = vld [vmem:[%s4510_s23 + $0x1f0] sm:$0xff]  ;;  %v2385_v37 = vadd.f32 %v2381_v28, %v4567_v61 }
 0x322   : > { %v2368_v0 = vld [vmem:[%s4510_s23 + $0x1d8] sm:$0xff]  ;;  %2440 = vmatpush.msra.mxu2 %v2338_v34  ;;  %2394 = vmatpush.msra.mxu0 %v2337_v8  ;;  %v2366_v7 = vld [vmem:[%s4510_s23 + $0x1c8] sm:$0xff]  ;;  %v2335_v11 = vld [vmem:[%s4510_s23 + $0xd0] sm:$0xff] }
 0x323   : > { %2463 = vmatpush.msra.mxu3 %v2370_v32  ;;  %2416 = vmatpush.msra.mxu1 %v2371_v25  ;;  %v2369_v26 = vld [vmem:[%s4510_s23 + $0x1e0] sm:$0xff]  ;;  %v2367_v47 = vld [vmem:[%s4510_s23 + $0x1d0] sm:$0xff]  ;;  %v2332_v1 = vld [vmem:[%s4510_s23 + $0xb8] sm:$0xff] }
 0x324   : > { %2441 = vmatpush.msra.mxu2 %v2336_v33  ;;  %v2333_v60 = vld [vmem:[%s4510_s23 + $0xc0] sm:$0xff]  ;;  %2395 = vmatpush.msra.mxu0 %v2335_v11  ;;  %v2364_v43 = vld [vmem:[%s4510_s23 + $0x1b8] sm:$0xff]  ;;  %v2331_v41 = vld [vmem:[%s4510_s23 + $0xb0] sm:$0xff] }
 0x325   : > { %2464 = vmatpush.msra.mxu3 %v2368_v0  ;;  %2417 = vmatpush.msra.mxu1 %v2369_v26  ;;  %v2365_v36 = vld [vmem:[%s4510_s23 + $0x1c0] sm:$0xff]  ;;  %v2330_v48 = vld [vmem:[%s4510_s23 + $0xa8] sm:$0xff]  ;;  %v2363_v44 = vld [vmem:[%s4510_s23 + $0x1b0] sm:$0xff]  ;;  %s2599_s14 = scalar_lea.hbm %s4720_s20, %s2774_s18  ;;  %s3043_s29 = scalar_lea.hbm %s4720_s20, 64 }
 0x326   : > { %2442 = vmatpush.msra.mxu2 %v2334_v21  ;;  %2396 = vmatpush.msra.mxu0 %v2333_v60  ;;  %v2362_v3 = vld [vmem:[%s4510_s23 + $0x1a8] sm:$0xff]  ;;  %v2329_v5 = vld [vmem:[%s4510_s23 + $0xa0] sm:$0xff]  ;;  %v2328_v23 = vld [vmem:[%s4510_s23 + $0x98] sm:$0xff]  ;;  %s2602_s27 = sshll.u32 %s2599_s14, 4  ;;  %s2603_s27 = int_to_ptr.hbm [resolvable:$true] %s2602_s27 }
 0x327   : > { %2465 = vmatpush.msra.mxu3 %v2366_v7  ;;  %2418 = vmatpush.msra.mxu1 %v2367_v47  ;;  %v2360_v49 = vld [vmem:[%s4510_s23 + $0x198] sm:$0xff]  ;;  %v2327_v17 = vld [vmem:[%s4510_s23 + $0x90] sm:$0xff]  ;;  %v2361_v2 = vld [vmem:[%s4510_s23 + $0x1a0] sm:$0xff]  ;;  %s3037_s16 = sshra.s32 %s2603_s27, 4  ;;  %s3038_s16 = int_to_ptr.hbm [resolvable:$true] %s3037_s16 }
 0x328   : > { %2443 = vmatpush.msra.mxu2 %v2332_v1  ;;  %2397 = vmatpush.msra.mxu0 %v2331_v41  ;;  %v2326_v40 = vld [vmem:[%s4510_s23 + $0x88] sm:$0xff]  ;;  %v2325_v54 = vld [vmem:[%s4510_s23 + $0x80] sm:$0xff]  ;;  %v2359_v14 = vld [vmem:[%s4510_s23 + $0x190] sm:$0xff]  ;;  %s3039_s12 = scalar_lea.hbm %s3038_s16, 32  ;;  %p3044_p5 = scmp.lt.s32.totalorder %s3038_s16, %s4720_s20 }
 0x329   : > { %2466 = vmatpush.msra.mxu3 %v2364_v43  ;;  %2419 = vmatpush.msra.mxu1 %v2365_v36  ;;  %v2358_v51 = vld [vmem:[%s4510_s23 + $0x188] sm:$0xff]  ;;  %v2324_v10 = vld [vmem:[%s4510_s23 + $0x78] sm:$0xff]  ;;  %v2323_v46 = vld [vmem:[%s4510_s23 + $0x70] sm:$0xff]  ;;  %p3040_p1 = scmp.ne.s32.totalorder %s3038_s16, %s3039_s12  ;;  %p3045_p6 = scmp.lt.s32.totalorder %s3043_s29, %s3039_s12 }
 0x32a   : > { %2444 = vmatpush.msra.mxu2 %v2330_v48  ;;  %2398 = vmatpush.msra.mxu0 %v2329_v5  ;;  %v2356_v20 = vld [vmem:[%s4510_s23 + $0x178] sm:$0xff]  ;;  %v2357_v29 = vld [vmem:[%s4510_s23 + $0x180] sm:$0xff]  ;;  %v2322_v35 = vld [vmem:[%s4510_s23 + $0x68] sm:$0xff] }
 0x32b   : > { %2467 = vmatpush.msra.mxu3 %v2362_v3  ;;  %2420 = vmatpush.msra.mxu1 %v2363_v44  ;;  %v2354_v45 = vld [vmem:[%s4510_s23 + $0x168] sm:$0xff]  ;;  %v2321_v19 = vld [vmem:[%s4510_s23 + $0x60] sm:$0xff]  ;;  %v2355_v27 = vld [vmem:[%s4510_s23 + $0x170] sm:$0xff]  ;;  %p3041_p2 = pnand %p3040_p1, %p3239_p4  ;;  %p3046_p7 = por %p3045_p6, %p3044_p5 }
 0x32c   : > { %2445 = vmatpush.msra.mxu2 %v2328_v23  ;;  %2399 = vmatpush.msra.mxu0 %v2327_v17  ;;  %v2320_v53 = vld [vmem:[%s4510_s23 + $0x58] sm:$0xff]  ;;  %v2319_v30 = vld [vmem:[%s4510_s23 + $0x50] sm:$0xff]  ;;  %v2353_v38 = vld [vmem:[%s4510_s23 + $0x160] sm:$0xff] }
 0x32d   : > { %2468 = vmatpush.msra.mxu3 %v2360_v49  ;;  %2421 = vmatpush.msra.mxu1 %v2361_v2  ;;  %v2352_v18 = vld [vmem:[%s4510_s23 + $0x158] sm:$0xff]  ;;  %v2318_v22 = vld [vmem:[%s4510_s23 + $0x48] sm:$0xff]  ;;  %v2317_v62 = vld [vmem:[%s4510_s23 + $0x40] sm:$0xff]  ;;  %p3042_p3 = pneg %p3041_p2 }
 0x32e   : > { %2446 = vmatpush.msra.mxu2 %v2326_v40  ;;  %2400 = vmatpush.msra.mxu0 %v2325_v54  ;;  %v2350_v24 = vld [vmem:[%s4510_s23 + $0x148] sm:$0xff]  ;;  %v2351_v4 = vld [vmem:[%s4510_s23 + $0x150] sm:$0xff]  ;;  %v2316_v57 = vld [vmem:[%s4510_s23 + $0x38] sm:$0xff] }
 0x32f   : > { %2469 = vmatpush.msra.mxu3 %v2358_v51  ;;  %2422 = vmatpush.msra.mxu1 %v2359_v14  ;;  %v2348_v39 = vld [vmem:[%s4510_s23 + $0x138] sm:$0xff]  ;;  %v2315_v16 = vld [vmem:[%s4510_s23 + $0x30] sm:$0xff]  ;;  %v2349_v6 = vld [vmem:[%s4510_s23 + $0x140] sm:$0xff]  ;;  %p3047_p9 = pnand %p3046_p7, %p3042_p3 }
 0x330   : > { %2447 = vmatpush.msra.mxu2 %v2324_v10  ;;  %2401 = vmatpush.msra.mxu0 %v2323_v46  ;;  %v2314_v50 = vld [vmem:[%s4510_s23 + $0x28] sm:$0xff]  ;;  %v2313_v52 = vld [vmem:[%s4510_s23 + $0x20] sm:$0xff]  ;;  %v2347_v55 = vld [vmem:[%s4510_s23 + $0x130] sm:$0xff] }
 0x331   : > { %2470 = vmatpush.msra.mxu3 %v2356_v20  ;;  %2423 = vmatpush.msra.mxu1 %v2357_v29  ;;  %v2346_v58 = vld [vmem:[%s4510_s23 + $0x128] sm:$0xff]  ;;  %v2312_v59 = vld [vmem:[%s4510_s23 + $0x18] sm:$0xff]  ;;  %v2311_v56 = vld [vmem:[%s4510_s23 + $0x10] sm:$0xff] }
 0x332   : > { %2448 = vmatpush.msra.mxu2 %v2322_v35  ;;  %2402 = vmatpush.msra.mxu0 %v2321_v19  ;;  %v2344_v15 = vld [vmem:[%s4510_s23 + $0x118] sm:$0xff]  ;;  %v2345_v31 = vld [vmem:[%s4510_s23 + $0x120] sm:$0xff]  ;;  %v2310_v13 = vld [vmem:[%s4510_s23 + $0x8] sm:$0xff] }
 0x333   : > { %2471 = vmatpush.msra.mxu3 %v2354_v45  ;;  %2424 = vmatpush.msra.mxu1 %v2355_v27  ;;  %v2342_v34 = vld [vmem:[%s4510_s23 + $0x108] sm:$0xff]  ;;  %v2309_v32 = vld [vmem:[%s4510_s23] sm:$0xff]  ;;  %v2343_v12 = vld [vmem:[%s4510_s23 + $0x110] sm:$0xff] }
 0x334   : > { %2449 = vmatpush.msra.mxu2 %v2320_v53  ;;  %2403 = vmatpush.msra.mxu0 %v2319_v30  ;;  %v2341_v33 = vld [vmem:[%s4510_s23 + $0x100] sm:$0xff]  ;;  %v2378_v0 = vld [vmem:[#allocation2 + $0x18] sm:$0xff]  ;;  %v2382_v8 = vld [vmem:[#allocation3 + $0x8] sm:$0xff]  ;;  %s2585_s23 = scalar_lea.sflag [#allocation6], %s495_s4 }
 0x335   : > { %2472 = vmatpush.msra.mxu3 %v2352_v18  ;;  %2425 = vmatpush.msra.mxu1 %v2353_v38  ;;  %v2379_v21 = vld [vmem:[#allocation2 + $0x8] sm:$0xff]  ;;  %v2383_v25 = vld [vmem:[#allocation3 + $0x10] sm:$0xff]  ;;  %v2386_v7 = vadd.f32 %v2382_v8, %v2378_v0  ;;  %v2375_v26 = vld [vmem:[%s2374_s26] sm:$0x3] }
 0x336   : > { %2450 = vmatpush.msra.mxu2 %v2318_v22  ;;  %2404 = vmatpush.msra.mxu0 %v2317_v62  ;;  %v2387_v11 = vadd.f32 %v2383_v25, %v2379_v21  ;;  %v2389_v60 = vperm.slane %v2375_v26, 0  ;;  %v2390_v43 = vperm.slane %v2375_v26, 1  ;;  %v2570_v26 = vld [vmem:[%s4676_s11] sm:$0x3] }
 0x337   : > { %2473 = vmatpush.msra.mxu3 %v2350_v24  ;;  %2426 = vmatpush.msra.mxu1 %v2351_v4 }
 0x338   : > { %2451 = vmatpush.msra.mxu2 %v2316_v57  ;;  %2405 = vmatpush.msra.mxu0 %v2315_v16  ;;  %v3131_v57 = vmov 256.0  }
 0x339   : > { %2474 = vmatpush.msra.mxu3 %v2348_v39  ;;  %2427 = vmatpush.msra.mxu1 %v2349_v6  ;;  %2897 = vrcp.f32 %v3131_v57 }
 0x33a   : > { %2452 = vmatpush.msra.mxu2 %v2314_v50  ;;  %2406 = vmatpush.msra.mxu0 %v2313_v52 }
 0x33b   : > { %2475 = vmatpush.msra.mxu3 %v2346_v58  ;;  %2428 = vmatpush.msra.mxu1 %v2347_v55 }
 0x33c   : > { %2453 = vmatpush.msra.mxu2 %v2312_v59  ;;  %2407 = vmatpush.msra.mxu0 %v2311_v56 }
 0x33d   : > { %2476 = vmatpush.msra.mxu3 %v2344_v15  ;;  %2429 = vmatpush.msra.mxu1 %v2345_v31 }
 0x33e   : > { %2454 = vmatpush.msra.mxu2 %v2310_v13  ;;  %2408 = vmatpush.msra.mxu0 %v2309_v32 }
 0x33f   : > { %2477 = vmatpush.msra.mxu3 %v2342_v34  ;;  %2455 = vmatmul.f32.vlgmr.msra.gmra.mxu2 %v2384_v9  ;;  %v2898_v39 = vpop.eup %2897 }
 0x340   : > { %2478 = vmatmul.f32.vlgmr.msra.gmra.mxu3 %v2385_v37  ;;  %2430 = vmatpush.msra.mxu1 %v2343_v12  ;;  %v2504_v16 = vmul.f32 256.0, %v2898_v39  ;;  %vm2508_vm0 = vweird.f32 %v2898_v39 }
 0x341   : > { %2409 = vmatmul.f32.vlgmr.msra.gmra.mxu0 %v2384_v9 }
 0x342   : > { %2431 = vmatpush.msra.mxu1 %v2341_v33  ;;  %v2505_v6 = vsub.f32 1.0, %v2504_v16 }
 0x343   : > { %2432 = vmatmul.f32.vlgmr.msra.gmra.mxu1 %v2385_v37 }
 0x347   : > { %2458 = vmatmul.f32.gmra.mxu2 %v2386_v7 }
 0x348   : > { %2481 = vmatmul.f32.gmra.mxu3 %v2387_v11 }
 0x349   : > { %2412 = vmatmul.f32.gmra.mxu0 %v2386_v7  ;;  %v2560_v7 = vld [vmem:[%s4675_s10] sm:$0x3] }
 0x34b   : > { %2435 = vmatmul.f32.gmra.mxu1 %v2387_v11 }
 0x3be   : > { %v2410_v47 = vpop.f32.mrf.mxu0 }
 0x3bf   : > { %v2411_v1 = vadd.f32 %v2410_v47, %v2389_v60  ;;  %v2562_v47 = vperm.slane %v2560_v7, 0 }
 0x3c0   : > { %v2433_v41 = vpop.f32.mrf.mxu1 }
 0x3c1   : > { %v2434_v36 = vadd.f32 %v2433_v41, %v2411_v1 }
 0x3c2   : > { %v2456_v48 = vpop.f32.mrf.mxu2 }
 0x3c3   : > { %v2479_v3 = vpop.f32.mrf.mxu3  ;;  %v2457_v5 = vadd.f32 %v2456_v48, %v2390_v43  ;;  %v2485_v44 = vmax.f32 %v2434_v36, 0.0  ;;  %v2563_v36 = vperm.slane %v2560_v7, 1 }
 0x3c5   : > { %v4587_v23 = vadd.f32 %v2485_v44, %v4563_v63  ;;  %v2480_v49 = vadd.f32 %v2479_v3, %v2457_v5  ;;  %v2506_v63 = vmul.f32 %v2898_v39, %v2505_v6  ;;  %v2572_v3 = vperm.slane %v2570_v26, 0 }
 0x3c6   : > { %v2413_v17 = vpop.f32.mrf.mxu0  ;;  %v2573_v44 = vperm.slane %v2570_v26, 1 }
 0x3c7   : > { %2493 = vst [vmem:[#allocation2 + $0x10] sm:$0xff] %v4587_v23  ;;  %v2486_v2 = vmax.f32 %v2480_v49, 0.0  ;;  %v2414_v40 = vadd.f32 %v2413_v17, %v2389_v60  ;;  %v2512_v10 = vmul.f32 %v4587_v23, %v4587_v23  ;;  %v2507_v42 = vadd.f32 %v2898_v39, %v2506_v63 }
 0x3c8   : > { %v2436_v51 = vpop.f32.mrf.mxu1 }
 0x3c9   : > { %v4591_v54 = vadd.f32 %v2486_v2, %v4567_v61  ;;  %v2437_v14 = vadd.f32 %v2436_v51, %v2414_v40  ;;  %v2509_v50 = vsel %vm2508_vm0, %v2898_v39, %v2507_v42 }
 0x3ca   : > { %v2459_v20 = vpop.f32.mrf.mxu2 }
 0x3cb   : > { %v2482_v46 = vpop.f32.mrf.mxu3  ;;  %2494 = vst [vmem:[#allocation2] sm:$0xff] %v4591_v54  ;;  %v2460_v29 = vadd.f32 %v2459_v20, %v2390_v43  ;;  %v2487_v35 = vmax.f32 %v2437_v14, 0.0  ;;  %v2497_v45 = vadd.f32 %v4591_v54, %v4587_v23  ;;  %v2513_v19 = vmul.f32 %v4591_v54, %v4591_v54 }
 0x3cd   : > { %v4600_v27 = vadd.f32 %v2487_v35, %v2378_v0  ;;  %v2483_v53 = vadd.f32 %v2482_v46, %v2460_v29  ;;  %2498 = vadd.xlane.f32.xlu0 %v2497_v45  ;;  %v2516_v18 = vadd.f32 %v2513_v19, %v2512_v10 }
 0x3cf   : > { %2495 = vst [vmem:[#allocation2 + $0x18] sm:$0xff] %v4600_v27  ;;  %v2488_v30 = vmax.f32 %v2483_v53, 0.0  ;;  %2517 = vadd.xlane.f32.xlu1 %v2516_v18  ;;  %v2514_v22 = vmul.f32 %v4600_v27, %v4600_v27 }
 0x3d1   : > { %v4603_v38 = vadd.f32 %v2488_v30, %v2379_v21 }
 0x3d3   : > { %2496 = vst [vmem:[#allocation2 + $0x8] sm:$0xff] %v4603_v38  ;;  %v2500_v24 = vadd.f32 %v4603_v38, %v4600_v27  ;;  %v2515_v62 = vmul.f32 %v4603_v38, %v4603_v38 }
 0x3d5   : > { %2501 = vadd.xlane.f32.xlu0 %v2500_v24  ;;  %v2519_v4 = vadd.f32 %v2515_v62, %v2514_v22 }
 0x3d7   : > { %2520 = vadd.xlane.f32.xlu1 %v2519_v4 }
 0x440   : > { %v2499_v58 = vpop.xlane.xlu0 %2498 }
 0x441   : > { %v2510_v61 = vmul.f32 %v2509_v50, %v2499_v58 }
 0x442   : > { %v2518_v52 = vpop.xlane.xlu1 %2517 }
 0x443   : > { %v2522_v55 = vmul.f32 %v2518_v52, %v2509_v50  ;;  %v2524_v28 = vmul.f32 %v2510_v61, %v2510_v61  ;;  %v2530_v43 = vsub.f32 %v4587_v23, %v2510_v61  ;;  %v2531_v41 = vsub.f32 %v4591_v54, %v2510_v61 }
 0x445   : > { %v2526_v59 = vsub.f32 %v2522_v55, %v2524_v28 }
 0x447   : > { %v2528_v15 = vmax.f32 %v2526_v59, 0.0 }
 0x448   : > { %v2502_v56 = vpop.xlane.xlu0 %2501 }
 0x449   : > { %v2534_v31 = vadd.f32 1e-05, %v2528_v15  ;;  %v2511_v13 = vmul.f32 %v2509_v50, %v2502_v56 }
 0x44a   : > { %v2521_v9 = vpop.xlane.xlu1 %2520 }
 0x44b   : > { %2899 = vrsqrt.f32 %v2534_v31  ;;  %v2523_v34 = vmul.f32 %v2521_v9, %v2509_v50  ;;  %v2525_v37 = vmul.f32 %v2511_v13, %v2511_v13  ;;  %vm2542_vm2 = vweird.f32 %v2534_v31 }
 0x44c   : > { %v2532_v46 = vsub.f32 %v4600_v27, %v2511_v13  ;;  %v2533_v29 = vsub.f32 %v4603_v38, %v2511_v13 }
 0x44d   : > { %v2527_v32 = vsub.f32 %v2523_v34, %v2525_v37 }
 0x44f   : > { %v2529_v12 = vmax.f32 %v2527_v32, 0.0 }
 0x451   : > { %v2900_v33 = vpop.eup %2899  ;;  %v2535_v8 = vadd.f32 1e-05, %v2529_v12 }
 0x452   : > { %v2537_v0 = vmul.f32 %v2900_v33, %v2534_v31  ;;  %vm2543_vm1 = vweird.f32 %v2900_v33 }
 0x453   : > { %2901 = vrsqrt.f32 %v2535_v8  ;;  %vm2544_vm3 = vmor %vm2542_vm2, %vm2543_vm1  ;;  %vm2552_vm5 = vweird.f32 %v2535_v8 }
 0x454   : > { %v2538_v21 = vmul.f32 %v2900_v33, %v2537_v0 }
 0x456   : > { %v2539_v25 = vmul.f32 0.5, %v2538_v21 }
 0x458   : > { %v2540_v11 = vsub.f32 1.5, %v2539_v25 }
 0x459   : > { %v2902_v60 = vpop.eup %2901 }
 0x45a   : > { %v2541_v1 = vmul.f32 %v2900_v33, %v2540_v11  ;;  %v2547_v48 = vmul.f32 %v2902_v60, %v2535_v8  ;;  %vm2553_vm4 = vweird.f32 %v2902_v60 }
 0x45b   : > { %vm2554_vm6 = vmor %vm2552_vm5, %vm2553_vm4 }
 0x45c   : > { %v2545_v5 = vsel %vm2544_vm3, %v2900_v33, %v2541_v1  ;;  %v2548_v2 = vmul.f32 %v2902_v60, %v2547_v48 }
 0x45d   : > { %v2556_v49 = vmul.f32 %v2545_v5, %v2530_v43  ;;  %v2557_v17 = vmul.f32 %v2545_v5, %v2531_v41 }
 0x45e   : > { %v2549_v14 = vmul.f32 0.5, %v2548_v2 }
 0x45f   : > { %v2566_v40 = vmul.f32 %v2562_v47, %v2556_v49  ;;  %v2567_v51 = vmul.f32 %v2563_v36, %v2557_v17 }
 0x460   : > { %v2550_v20 = vsub.f32 1.5, %v2549_v14 }
 0x461   : > { %v2576_v10 = vadd.f32 %v2572_v3, %v2566_v40  ;;  %v2577_v23 = vadd.f32 %v2573_v44, %v2567_v51 }
 0x462   : > { %v2551_v54 = vmul.f32 %v2902_v60, %v2550_v20 }
 0x463   : > { %2580 = vst [vmem:[%s3307_s21] sm:$0xff] %v2576_v10 }
 0x464   : > { %2581 = vst [vmem:[%s3307_s21 + $0x8] sm:$0xff] %v2577_v23  ;;  %v2555_v35 = vsel %vm2554_vm6, %v2902_v60, %v2551_v54 }
 0x465   : > { %v2558_v45 = vmul.f32 %v2555_v35, %v2532_v46  ;;  %v2559_v19 = vmul.f32 %v2555_v35, %v2533_v29 }
 0x467   : > { %v2568_v53 = vmul.f32 %v2562_v47, %v2558_v45  ;;  %v2569_v18 = vmul.f32 %v2563_v36, %v2559_v19 }
 0x469   : > { %v2578_v30 = vadd.f32 %v2572_v3, %v2568_v53  ;;  %v2579_v22 = vadd.f32 %v2573_v44, %v2569_v18 }
 0x46b   : > { %2582 = vst [vmem:[%s3307_s21 + $0x10] sm:$0xff] %v2578_v30 }
 0x46c   : > { %2583 = vst [vmem:[%s3307_s21 + $0x18] sm:$0xff] %v2579_v22 }
 0x46d   : > { %3050 = shalt.err (!%p3047_p9)
}
 0x46e   : > { %s3132_s4 = smov 256   ;;  %s3133_s21 = smov 16  }
 0x46f   : > { %2791 = dma.vmem_to_hbm [thread:$0]  (%p3239_p4), %s2601_s28, 512, %s2603_s27, %s2585_s23, %s3132_s4, %s3132_s4, %s3133_s21  }
 0x470 PF: > { %s4722_s17 = sld [smem:[#allocation20_spill]] }
 0x471   : > { %s4723_s18 = sld [smem:[#allocation17_spill]] }
 0x476   : > { %p2818_p10 = scmp.ge.s32.totalorder %s4722_s17, 2 }
 0x477   : > { %s2617_s19 = sand.u32 1, %s4723_s18  }
 0x478   : > { %p2807_p11 = pnand %p2818_p10, %p3246_p8  ;;  %s2618_s14 = scalar_lea.sflag [#allocation6], %s2617_s19 }
 0x47a   : > { %p2808_p12 = pneg %p2807_p11 }
 0x47c   : > { %3088 = dma.done.wait (%p2808_p12), %s2618_s14, 512  }
 0x47d   : > { %3090 = vsyncadd (%p2808_p12), %s2618_s14, 4294966784  ;;  %s28_s26 = sadd.s32 1, %s4722_s17   ;;  %s4725_s16 = sld [smem:[#allocation18_spill]] }
 0x47e   : > { %p25_p13 = scmp.ge.s32.totalorder %s28_s26, 4   ;;  %s4726_s23 = sld [smem:[#allocation24_spill]] }
 0x47f   : > { %s4727_s24 = sld [smem:[#allocation19_spill]]  ;;  %s4729_s21 = smov %s3097_s22 }
 0x480   : > { %s4728_s25 = sld [smem:[#allocation21_spill]]  ;;  %27 = sbr.rel (!%p25_p13) target bundleno = 10 (0xa), region = 127 }
 0x483   : > { %s4730_s22 = smov %s4725_s16 }
 0x485   :  { %2624 = vsyncpa [#allocation5], 1 }
 0x486   :  { %2626 = vsyncpa [#allocation5 + $0x1], 1 }
 0x487   :  { %2627 = vsyncpa [#allocation8], 1 }
 0x488   :  { %2628 = vsyncpa [#allocation11], 1 }
 0x489   :  { %2629 = vsyncpa [#allocation6], 1 }
 0x48a   :  { %2631 = vsyncpa [#allocation6 + $0x1], 1 }

</bundles_post_ra>
